<compile_context>
chip_gen: v7x
topology: tpu7x:2x2x1
jax: 0.10.0
libtpu: 0.0.40
codegen_flags: <defaults>
</compile_context>

<pallas_src>
import functools

import numpy as np
import jax
import jax.numpy as jnp
from jax.experimental import pallas as pl
from jax.experimental.pallas import tpu as pltpu

BN_EPS = 1e-5
WEIGHT_DTYPE = jnp.bfloat16


# ----------------------------------------------------------------------------
# The single fused kernel: a static sequence of (selection-matmul, weight-matmul,
# bias, relu) layers, driven by the static `layer_struct` description.
# ----------------------------------------------------------------------------
def _mnist_kernel(layer_struct, *refs):
    x_ref = refs[0]          # (H, W*Cin) for the current sample
    o_ref = refs[-1]         # (1, 10)
    prm = refs[1:-1]

    a = x_ref[...].astype(jnp.float32)
    idx = 0
    for taps, has_sel, relu in layer_struct:
        ab = a.astype(WEIGHT_DTYPE)
        acc = None
        for _ in range(taps):
            if has_sel:
                sel = prm[idx][...]          # (M_out, M_in)  0/1 row selection (bf16)
                wmat = prm[idx + 1][...]     # (K, J)         folded weights (bf16)
                idx += 2
                rows = jnp.dot(sel, ab, preferred_element_type=jnp.float32)
                y = jnp.dot(rows.astype(WEIGHT_DTYPE), wmat,
                            preferred_element_type=jnp.float32)
            else:
                wmat = prm[idx][...]
                idx += 1
                y = jnp.dot(ab, wmat, preferred_element_type=jnp.float32)
            acc = y if acc is None else acc + y
        bias = prm[idx][...]                 # (1, J) f32
        idx += 1
        acc = acc + bias
        if relu:
            acc = jnp.maximum(acc, 0.0)
        a = acc
    o_ref[...] = a.astype(o_ref.dtype)


# ----------------------------------------------------------------------------
# Host-side parameter construction (synthetic weights, eval-mode BN folding,
# conv -> (row-selection, width-Toeplitz) factorization, flatten folded into fc1).
# ----------------------------------------------------------------------------
def _fold_bn(conv_bias, gamma, beta, mean, var):
    scale = gamma / np.sqrt(var + BN_EPS)
    return scale, beta + (conv_bias - mean) * scale


def _rand(key, shape, scale=0.05):
    return np.asarray(jax.random.normal(key, shape, jnp.float32) * scale)


def build_mnist_params(key, init_width=8, img_hw=28):
    iw = init_width
    conv_cfg = [  # (cin, cout, stride, has_bn)
        (1, iw, 1, False), (iw, iw, 2, True),
        (iw, 2 * iw, 1, False), (2 * iw, 2 * iw, 2, True),
        (2 * iw, 4 * iw, 1, False), (4 * iw, 4 * iw, 2, True),
        (4 * iw, 8 * iw, 1, False), (8 * iw, 8 * iw, 2, True),
    ]
    fc_cfg = [  # (din, dout, has_bn)
        (32 * iw, 16 * iw, True), (16 * iw, 8 * iw, True),
        (8 * iw, 4 * iw, True), (4 * iw, 10, False),
    ]

    operands, specs, layer_struct = [], [], []

    def add(arr, dtype):
        arr = jnp.asarray(np.asarray(arr), dtype)
        operands.append(arr)
        specs.append(pl.BlockSpec(arr.shape, lambda n: (0, 0)))  # grid-invariant block

    def bn_or_identity(keys, b, cout, has_bn):
        if not has_bn:
            return np.ones((cout,), np.float32), b
        k3, k4, k5, k6 = keys
        gamma = 1.0 + 0.1 * np.asarray(jax.random.normal(k3, (cout,), jnp.float32))
        beta = 0.1 * np.asarray(jax.random.normal(k4, (cout,), jnp.float32))
        mean = 0.1 * np.asarray(jax.random.normal(k5, (cout,), jnp.float32))
        var = np.asarray(jax.random.uniform(k6, (cout,), jnp.float32, 0.5, 1.5))
        return _fold_bn(b, gamma, beta, mean, var)

    h_cur = w_cur = img_hw
    c_cur = conv_cfg[0][0]

    # ---- conv stack: 3x3, padding=1, stride in {1,2} ----
    for cin, cout, stride, has_bn in conv_cfg:
        key, k1, k2, k3, k4, k5, k6 = jax.random.split(key, 7)
        wgt = _rand(k1, (3, 3, cin, cout))            # (dy, dx, ci, co)
        b = _rand(k2, (cout,))
        scale, bias = bn_or_identity((k3, k4, k5, k6), b, cout, has_bn)
        h_out = (h_cur - 1) // stride + 1
        w_out = (w_cur - 1) // stride + 1
        for dy in range(3):
            # S_dy: picks input row (stride*oh + dy - 1); missing rows == zero padding.
            sel = np.zeros((h_out, h_cur), np.float32)
            for oh in range(h_out):
                ih = stride * oh + dy - 1
                if 0 <= ih < h_cur:
                    sel[oh, ih] = 1.0
            # T_dy: width-Toeplitz with BN/conv scale folded in; zero-pad columns implicit.
            toep = np.zeros((w_cur * cin, w_out * cout), np.float32)
            for dx in range(3):
                for ow in range(w_out):
                    wi = stride * ow + dx - 1
                    if 0 <= wi < w_cur:
                        toep[wi * cin:(wi + 1) * cin, ow * cout:(ow + 1) * cout] = \
                            wgt[dy, dx] * scale[None, :]
            add(sel, WEIGHT_DTYPE)
            add(toep, WEIGHT_DTYPE)
        add(np.tile(bias, w_out).reshape(1, -1), jnp.float32)   # bias[ow*cout + co]
        layer_struct.append((3, True, True))
        h_cur, w_cur, c_cur = h_out, w_out, cout

    # ---- fc1: torch.flatten(NCHW) + Linear + BN + ReLU (flatten folded into weights) ----
    din, dout, has_bn = fc_cfg[0]
    assert din == c_cur * h_cur * w_cur
    key, k1, k2, k3, k4, k5, k6 = jax.random.split(key, 7)
    wfc = _rand(k1, (din, dout))                      # rows in torch flatten order (c,h,w)
    b = _rand(k2, (dout,))
    scale, bias = bn_or_identity((k3, k4, k5, k6), b, dout, has_bn)
    w_eff = wfc * scale[None, :]
    for h_i in range(h_cur):
        sel = np.zeros((1, h_cur), np.float32)
        sel[0, h_i] = 1.0
        chunk = np.zeros((w_cur * c_cur, dout), np.float32)
        for w_i in range(w_cur):
            for c_i in range(c_cur):
                chunk[w_i * c_cur + c_i, :] = \
                    w_eff[c_i * h_cur * w_cur + h_i * w_cur + w_i, :]
        add(sel, WEIGHT_DTYPE)
        add(chunk, WEIGHT_DTYPE)
    add(bias.reshape(1, -1), jnp.float32)
    layer_struct.append((h_cur, True, True))

    # ---- fc2 / fc3 / out ----
    for (din, dout, has_bn), relu in zip(fc_cfg[1:], (True, True, False)):
        key, k1, k2, k3, k4, k5, k6 = jax.random.split(key, 7)
        wfc = _rand(k1, (din, dout))
        b = _rand(k2, (dout,))
        scale, bias = bn_or_identity((k3, k4, k5, k6), b, dout, has_bn)
        add(wfc * scale[None, :], WEIGHT_DTYPE)
        add(bias.reshape(1, -1), jnp.float32)
        layer_struct.append((1, False, relu))

    return operands, specs, tuple(layer_struct)


# ----------------------------------------------------------------------------
# Wrapper: single pallas_call over a batch-parallel grid.
# ----------------------------------------------------------------------------
def make_mnist_forward(specs, layer_struct, *, batch, img_hw, cin=1, num_out=10):
    kern = functools.partial(_mnist_kernel, layer_struct)
    call = pl.pallas_call(
        kern,
        grid=(batch,),
        in_specs=[pl.BlockSpec((None, img_hw, img_hw * cin), lambda n: (n, 0, 0))] + specs,
        out_specs=pl.BlockSpec((None, 1, num_out), lambda n: (n, 0, 0)),
        out_shape=jax.ShapeDtypeStruct((batch, 1, num_out), jnp.float32),
        compiler_params=pltpu.CompilerParams(dimension_semantics=("parallel",)),
    )

    @jax.jit
    def forward(x_nchw, params):
        n, c, h, w = x_nchw.shape
        # NCHW -> (N, H, W*C): lanes pack (w, c); all spatial logic is in the S/T matrices.
        x2 = jnp.transpose(x_nchw, (0, 2, 3, 1)).reshape(n, h, w * c).astype(jnp.float32)
        out = call(x2, *params)
        return out.reshape(n, num_out)

    return forward


if __name__ == "__main__":
    key = jax.random.PRNGKey(0)
    pkey, xkey = jax.random.split(key)

    init_width = 8          # channels 8/8/16/16/32/32/64/64, fc 256->128->64->32->10
    batch, img_hw = 2, 28   # MNIST-shaped input

    operands, specs, layer_struct = build_mnist_params(
        pkey, init_width=init_width, img_hw=img_hw)
    forward = make_mnist_forward(specs, layer_struct, batch=batch, img_hw=img_hw, cin=1)

    x = jax.random.normal(xkey, (batch, 1, img_hw, img_hw), jnp.float32)  # NCHW
    out = forward(x, operands)
    out = jax.block_until_ready(out)

    assert out.shape == (batch, 10) and out.dtype == jnp.float32
    assert bool(jnp.all(jnp.isfinite(out)))
    print("KERNEL_OK")
</pallas_src>

<mosaic_0001>
module attributes {stable_mosaic.version = 11 : i64} {
  func.func @_mnist_kernel(%arg0: i32, %arg1: memref<1x28x28xf32, #tpu.memory_space<vmem>>, %arg2: memref<28x28xbf16, #tpu.memory_space<vmem>>, %arg3: memref<28x224xbf16, #tpu.memory_space<vmem>>, %arg4: memref<28x28xbf16, #tpu.memory_space<vmem>>, %arg5: memref<28x224xbf16, #tpu.memory_space<vmem>>, %arg6: memref<28x28xbf16, #tpu.memory_space<vmem>>, %arg7: memref<28x224xbf16, #tpu.memory_space<vmem>>, %arg8: memref<1x224xf32, #tpu.memory_space<vmem>>, %arg9: memref<14x28xbf16, #tpu.memory_space<vmem>>, %arg10: memref<224x112xbf16, #tpu.memory_space<vmem>>, %arg11: memref<14x28xbf16, #tpu.memory_space<vmem>>, %arg12: memref<224x112xbf16, #tpu.memory_space<vmem>>, %arg13: memref<14x28xbf16, #tpu.memory_space<vmem>>, %arg14: memref<224x112xbf16, #tpu.memory_space<vmem>>, %arg15: memref<1x112xf32, #tpu.memory_space<vmem>>, %arg16: memref<14x14xbf16, #tpu.memory_space<vmem>>, %arg17: memref<112x224xbf16, #tpu.memory_space<vmem>>, %arg18: memref<14x14xbf16, #tpu.memory_space<vmem>>, %arg19: memref<112x224xbf16, #tpu.memory_space<vmem>>, %arg20: memref<14x14xbf16, #tpu.memory_space<vmem>>, %arg21: memref<112x224xbf16, #tpu.memory_space<vmem>>, %arg22: memref<1x224xf32, #tpu.memory_space<vmem>>, %arg23: memref<7x14xbf16, #tpu.memory_space<vmem>>, %arg24: memref<224x112xbf16, #tpu.memory_space<vmem>>, %arg25: memref<7x14xbf16, #tpu.memory_space<vmem>>, %arg26: memref<224x112xbf16, #tpu.memory_space<vmem>>, %arg27: memref<7x14xbf16, #tpu.memory_space<vmem>>, %arg28: memref<224x112xbf16, #tpu.memory_space<vmem>>, %arg29: memref<1x112xf32, #tpu.memory_space<vmem>>, %arg30: memref<7x7xbf16, #tpu.memory_space<vmem>>, %arg31: memref<112x224xbf16, #tpu.memory_space<vmem>>, %arg32: memref<7x7xbf16, #tpu.memory_space<vmem>>, %arg33: memref<112x224xbf16, #tpu.memory_space<vmem>>, %arg34: memref<7x7xbf16, #tpu.memory_space<vmem>>, %arg35: memref<112x224xbf16, #tpu.memory_space<vmem>>, %arg36: memref<1x224xf32, #tpu.memory_space<vmem>>, %arg37: memref<4x7xbf16, #tpu.memory_space<vmem>>, %arg38: memref<224x128xbf16, #tpu.memory_space<vmem>>, %arg39: memref<4x7xbf16, #tpu.memory_space<vmem>>, %arg40: memref<224x128xbf16, #tpu.memory_space<vmem>>, %arg41: memref<4x7xbf16, #tpu.memory_space<vmem>>, %arg42: memref<224x128xbf16, #tpu.memory_space<vmem>>, %arg43: memref<1x128xf32, #tpu.memory_space<vmem>>, %arg44: memref<4x4xbf16, #tpu.memory_space<vmem>>, %arg45: memref<128x256xbf16, #tpu.memory_space<vmem>>, %arg46: memref<4x4xbf16, #tpu.memory_space<vmem>>, %arg47: memref<128x256xbf16, #tpu.memory_space<vmem>>, %arg48: memref<4x4xbf16, #tpu.memory_space<vmem>>, %arg49: memref<128x256xbf16, #tpu.memory_space<vmem>>, %arg50: memref<1x256xf32, #tpu.memory_space<vmem>>, %arg51: memref<2x4xbf16, #tpu.memory_space<vmem>>, %arg52: memref<256x128xbf16, #tpu.memory_space<vmem>>, %arg53: memref<2x4xbf16, #tpu.memory_space<vmem>>, %arg54: memref<256x128xbf16, #tpu.memory_space<vmem>>, %arg55: memref<2x4xbf16, #tpu.memory_space<vmem>>, %arg56: memref<256x128xbf16, #tpu.memory_space<vmem>>, %arg57: memref<1x128xf32, #tpu.memory_space<vmem>>, %arg58: memref<1x2xbf16, #tpu.memory_space<vmem>>, %arg59: memref<128x128xbf16, #tpu.memory_space<vmem>>, %arg60: memref<1x2xbf16, #tpu.memory_space<vmem>>, %arg61: memref<128x128xbf16, #tpu.memory_space<vmem>>, %arg62: memref<1x128xf32, #tpu.memory_space<vmem>>, %arg63: memref<128x64xbf16, #tpu.memory_space<vmem>>, %arg64: memref<1x64xf32, #tpu.memory_space<vmem>>, %arg65: memref<64x32xbf16, #tpu.memory_space<vmem>>, %arg66: memref<1x32xf32, #tpu.memory_space<vmem>>, %arg67: memref<32x10xbf16, #tpu.memory_space<vmem>>, %arg68: memref<1x10xf32, #tpu.memory_space<vmem>>, %arg69: memref<1x1x10xf32, #tpu.memory_space<vmem>>) attributes {dimension_semantics = [#tpu.dimension_semantics<parallel>], iteration_bounds = array<i64: 2>, scalar_prefetch = 0 : i64, scratch_operands = 0 : i64, tpu.core_type = #tpu.core_type<tc>, window_params = [{transform_indices = @transform_0, window_bounds = array<i64: 1, 28, 28>}, {pipeline_mode = #tpu.pipeline_mode<synchronous>, transform_indices = @transform_1, window_bounds = array<i64: 28, 28>}, {pipeline_mode = #tpu.pipeline_mode<synchronous>, transform_indices = @transform_2, window_bounds = array<i64: 28, 224>}, {pipeline_mode = #tpu.pipeline_mode<synchronous>, transform_indices = @transform_3, window_bounds = array<i64: 28, 28>}, {pipeline_mode = #tpu.pipeline_mode<synchronous>, transform_indices = @transform_4, window_bounds = array<i64: 28, 224>}, {pipeline_mode = #tpu.pipeline_mode<synchronous>, transform_indices = @transform_5, window_bounds = array<i64: 28, 28>}, {pipeline_mode = #tpu.pipeline_mode<synchronous>, transform_indices = @transform_6, window_bounds = array<i64: 28, 224>}, {pipeline_mode = #tpu.pipeline_mode<synchronous>, transform_indices = @transform_7, window_bounds = array<i64: 1, 224>}, {pipeline_mode = #tpu.pipeline_mode<synchronous>, transform_indices = @transform_8, window_bounds = array<i64: 14, 28>}, {pipeline_mode = #tpu.pipeline_mode<synchronous>, transform_indices = @transform_9, window_bounds = array<i64: 224, 112>}, {pipeline_mode = #tpu.pipeline_mode<synchronous>, transform_indices = @transform_10, window_bounds = array<i64: 14, 28>}, {pipeline_mode = #tpu.pipeline_mode<synchronous>, transform_indices = @transform_11, window_bounds = array<i64: 224, 112>}, {pipeline_mode = #tpu.pipeline_mode<synchronous>, transform_indices = @transform_12, window_bounds = array<i64: 14, 28>}, {pipeline_mode = #tpu.pipeline_mode<synchronous>, transform_indices = @transform_13, window_bounds = array<i64: 224, 112>}, {pipeline_mode = #tpu.pipeline_mode<synchronous>, transform_indices = @transform_14, window_bounds = array<i64: 1, 112>}, {pipeline_mode = #tpu.pipeline_mode<synchronous>, transform_indices = @transform_15, window_bounds = array<i64: 14, 14>}, {pipeline_mode = #tpu.pipeline_mode<synchronous>, transform_indices = @transform_16, window_bounds = array<i64: 112, 224>}, {pipeline_mode = #tpu.pipeline_mode<synchronous>, transform_indices = @transform_17, window_bounds = array<i64: 14, 14>}, {pipeline_mode = #tpu.pipeline_mode<synchronous>, transform_indices = @transform_18, window_bounds = array<i64: 112, 224>}, {pipeline_mode = #tpu.pipeline_mode<synchronous>, transform_indices = @transform_19, window_bounds = array<i64: 14, 14>}, {pipeline_mode = #tpu.pipeline_mode<synchronous>, transform_indices = @transform_20, window_bounds = array<i64: 112, 224>}, {pipeline_mode = #tpu.pipeline_mode<synchronous>, transform_indices = @transform_21, window_bounds = array<i64: 1, 224>}, {pipeline_mode = #tpu.pipeline_mode<synchronous>, transform_indices = @transform_22, window_bounds = array<i64: 7, 14>}, {pipeline_mode = #tpu.pipeline_mode<synchronous>, transform_indices = @transform_23, window_bounds = array<i64: 224, 112>}, {pipeline_mode = #tpu.pipeline_mode<synchronous>, transform_indices = @transform_24, window_bounds = array<i64: 7, 14>}, {pipeline_mode = #tpu.pipeline_mode<synchronous>, transform_indices = @transform_25, window_bounds = array<i64: 224, 112>}, {pipeline_mode = #tpu.pipeline_mode<synchronous>, transform_indices = @transform_26, window_bounds = array<i64: 7, 14>}, {pipeline_mode = #tpu.pipeline_mode<synchronous>, transform_indices = @transform_27, window_bounds = array<i64: 224, 112>}, {pipeline_mode = #tpu.pipeline_mode<synchronous>, transform_indices = @transform_28, window_bounds = array<i64: 1, 112>}, {pipeline_mode = #tpu.pipeline_mode<synchronous>, transform_indices = @transform_29, window_bounds = array<i64: 7, 7>}, {pipeline_mode = #tpu.pipeline_mode<synchronous>, transform_indices = @transform_30, window_bounds = array<i64: 112, 224>}, {pipeline_mode = #tpu.pipeline_mode<synchronous>, transform_indices = @transform_31, window_bounds = array<i64: 7, 7>}, {pipeline_mode = #tpu.pipeline_mode<synchronous>, transform_indices = @transform_32, window_bounds = array<i64: 112, 224>}, {pipeline_mode = #tpu.pipeline_mode<synchronous>, transform_indices = @transform_33, window_bounds = array<i64: 7, 7>}, {pipeline_mode = #tpu.pipeline_mode<synchronous>, transform_indices = @transform_34, window_bounds = array<i64: 112, 224>}, {pipeline_mode = #tpu.pipeline_mode<synchronous>, transform_indices = @transform_35, window_bounds = array<i64: 1, 224>}, {pipeline_mode = #tpu.pipeline_mode<synchronous>, transform_indices = @transform_36, window_bounds = array<i64: 4, 7>}, {pipeline_mode = #tpu.pipeline_mode<synchronous>, transform_indices = @transform_37, window_bounds = array<i64: 224, 128>}, {pipeline_mode = #tpu.pipeline_mode<synchronous>, transform_indices = @transform_38, window_bounds = array<i64: 4, 7>}, {pipeline_mode = #tpu.pipeline_mode<synchronous>, transform_indices = @transform_39, window_bounds = array<i64: 224, 128>}, {pipeline_mode = #tpu.pipeline_mode<synchronous>, transform_indices = @transform_40, window_bounds = array<i64: 4, 7>}, {pipeline_mode = #tpu.pipeline_mode<synchronous>, transform_indices = @transform_41, window_bounds = array<i64: 224, 128>}, {pipeline_mode = #tpu.pipeline_mode<synchronous>, transform_indices = @transform_42, window_bounds = array<i64: 1, 128>}, {pipeline_mode = #tpu.pipeline_mode<synchronous>, transform_indices = @transform_43, window_bounds = array<i64: 4, 4>}, {pipeline_mode = #tpu.pipeline_mode<synchronous>, transform_indices = @transform_44, window_bounds = array<i64: 128, 256>}, {pipeline_mode = #tpu.pipeline_mode<synchronous>, transform_indices = @transform_45, window_bounds = array<i64: 4, 4>}, {pipeline_mode = #tpu.pipeline_mode<synchronous>, transform_indices = @transform_46, window_bounds = array<i64: 128, 256>}, {pipeline_mode = #tpu.pipeline_mode<synchronous>, transform_indices = @transform_47, window_bounds = array<i64: 4, 4>}, {pipeline_mode = #tpu.pipeline_mode<synchronous>, transform_indices = @transform_48, window_bounds = array<i64: 128, 256>}, {pipeline_mode = #tpu.pipeline_mode<synchronous>, transform_indices = @transform_49, window_bounds = array<i64: 1, 256>}, {pipeline_mode = #tpu.pipeline_mode<synchronous>, transform_indices = @transform_50, window_bounds = array<i64: 2, 4>}, {pipeline_mode = #tpu.pipeline_mode<synchronous>, transform_indices = @transform_51, window_bounds = array<i64: 256, 128>}, {pipeline_mode = #tpu.pipeline_mode<synchronous>, transform_indices = @transform_52, window_bounds = array<i64: 2, 4>}, {pipeline_mode = #tpu.pipeline_mode<synchronous>, transform_indices = @transform_53, window_bounds = array<i64: 256, 128>}, {pipeline_mode = #tpu.pipeline_mode<synchronous>, transform_indices = @transform_54, window_bounds = array<i64: 2, 4>}, {pipeline_mode = #tpu.pipeline_mode<synchronous>, transform_indices = @transform_55, window_bounds = array<i64: 256, 128>}, {pipeline_mode = #tpu.pipeline_mode<synchronous>, transform_indices = @transform_56, window_bounds = array<i64: 1, 128>}, {pipeline_mode = #tpu.pipeline_mode<synchronous>, transform_indices = @transform_57, window_bounds = array<i64: 1, 2>}, {pipeline_mode = #tpu.pipeline_mode<synchronous>, transform_indices = @transform_58, window_bounds = array<i64: 128, 128>}, {pipeline_mode = #tpu.pipeline_mode<synchronous>, transform_indices = @transform_59, window_bounds = array<i64: 1, 2>}, {pipeline_mode = #tpu.pipeline_mode<synchronous>, transform_indices = @transform_60, window_bounds = array<i64: 128, 128>}, {pipeline_mode = #tpu.pipeline_mode<synchronous>, transform_indices = @transform_61, window_bounds = array<i64: 1, 128>}, {pipeline_mode = #tpu.pipeline_mode<synchronous>, transform_indices = @transform_62, window_bounds = array<i64: 128, 64>}, {pipeline_mode = #tpu.pipeline_mode<synchronous>, transform_indices = @transform_63, window_bounds = array<i64: 1, 64>}, {pipeline_mode = #tpu.pipeline_mode<synchronous>, transform_indices = @transform_64, window_bounds = array<i64: 64, 32>}, {pipeline_mode = #tpu.pipeline_mode<synchronous>, transform_indices = @transform_65, window_bounds = array<i64: 1, 32>}, {pipeline_mode = #tpu.pipeline_mode<synchronous>, transform_indices = @transform_66, window_bounds = array<i64: 32, 10>}, {pipeline_mode = #tpu.pipeline_mode<synchronous>, transform_indices = @transform_67, window_bounds = array<i64: 1, 10>}, {transform_indices = @transform_68, window_bounds = array<i64: 1, 1, 10>}]} {
    %c0 = arith.constant 0 : index
    %c0_0 = arith.constant 0 : index
    %c0_1 = arith.constant 0 : index
    %0 = vector.load %arg1[%c0, %c0_0, %c0_1] : memref<1x28x28xf32, #tpu.memory_space<vmem>>, vector<1x28x28xf32>
    %1 = vector.shape_cast %0 : vector<1x28x28xf32> to vector<28x28xf32>
    %2 = arith.truncf %1 : vector<28x28xf32> to vector<28x28xbf16>
    %c0_2 = arith.constant 0 : index
    %c0_3 = arith.constant 0 : index
    %3 = vector.load %arg2[%c0_2, %c0_3] : memref<28x28xbf16, #tpu.memory_space<vmem>>, vector<28x28xbf16>
    %c0_4 = arith.constant 0 : index
    %c0_5 = arith.constant 0 : index
    %4 = vector.load %arg3[%c0_4, %c0_5] : memref<28x224xbf16, #tpu.memory_space<vmem>>, vector<28x224xbf16>
    %cst = arith.constant dense<0.000000e+00> : vector<28x28xf32>
    %5 = tpu.matmul %3, %2, %cst {dimension_numbers = #tpu.dot_dimension_numbers<[1], [0], [0], [1], [0, 0, 1, 1], [], []>} : vector<28x28xbf16>, vector<28x28xbf16>, vector<28x28xf32> -> vector<28x28xf32>
    %6 = arith.truncf %5 : vector<28x28xf32> to vector<28x28xbf16>
    %cst_6 = arith.constant dense<0.000000e+00> : vector<28x224xf32>
    %7 = tpu.matmul %6, %4, %cst_6 {dimension_numbers = #tpu.dot_dimension_numbers<[1], [0], [0], [1], [0, 0, 1, 1], [], []>} : vector<28x28xbf16>, vector<28x224xbf16>, vector<28x224xf32> -> vector<28x224xf32>
    %c0_7 = arith.constant 0 : index
    %c0_8 = arith.constant 0 : index
    %8 = vector.load %arg4[%c0_7, %c0_8] : memref<28x28xbf16, #tpu.memory_space<vmem>>, vector<28x28xbf16>
    %c0_9 = arith.constant 0 : index
    %c0_10 = arith.constant 0 : index
    %9 = vector.load %arg5[%c0_9, %c0_10] : memref<28x224xbf16, #tpu.memory_space<vmem>>, vector<28x224xbf16>
    %cst_11 = arith.constant dense<0.000000e+00> : vector<28x28xf32>
    %10 = tpu.matmul %8, %2, %cst_11 {dimension_numbers = #tpu.dot_dimension_numbers<[1], [0], [0], [1], [0, 0, 1, 1], [], []>} : vector<28x28xbf16>, vector<28x28xbf16>, vector<28x28xf32> -> vector<28x28xf32>
    %11 = arith.truncf %10 : vector<28x28xf32> to vector<28x28xbf16>
    %cst_12 = arith.constant dense<0.000000e+00> : vector<28x224xf32>
    %12 = tpu.matmul %11, %9, %cst_12 {dimension_numbers = #tpu.dot_dimension_numbers<[1], [0], [0], [1], [0, 0, 1, 1], [], []>} : vector<28x28xbf16>, vector<28x224xbf16>, vector<28x224xf32> -> vector<28x224xf32>
    %13 = arith.addf %7, %12 : vector<28x224xf32>
    %c0_13 = arith.constant 0 : index
    %c0_14 = arith.constant 0 : index
    %14 = vector.load %arg6[%c0_13, %c0_14] : memref<28x28xbf16, #tpu.memory_space<vmem>>, vector<28x28xbf16>
    %c0_15 = arith.constant 0 : index
    %c0_16 = arith.constant 0 : index
    %15 = vector.load %arg7[%c0_15, %c0_16] : memref<28x224xbf16, #tpu.memory_space<vmem>>, vector<28x224xbf16>
    %cst_17 = arith.constant dense<0.000000e+00> : vector<28x28xf32>
    %16 = tpu.matmul %14, %2, %cst_17 {dimension_numbers = #tpu.dot_dimension_numbers<[1], [0], [0], [1], [0, 0, 1, 1], [], []>} : vector<28x28xbf16>, vector<28x28xbf16>, vector<28x28xf32> -> vector<28x28xf32>
    %17 = arith.truncf %16 : vector<28x28xf32> to vector<28x28xbf16>
    %cst_18 = arith.constant dense<0.000000e+00> : vector<28x224xf32>
    %18 = tpu.matmul %17, %15, %cst_18 {dimension_numbers = #tpu.dot_dimension_numbers<[1], [0], [0], [1], [0, 0, 1, 1], [], []>} : vector<28x28xbf16>, vector<28x224xbf16>, vector<28x224xf32> -> vector<28x224xf32>
    %19 = arith.addf %13, %18 : vector<28x224xf32>
    %c0_19 = arith.constant 0 : index
    %c0_20 = arith.constant 0 : index
    %20 = vector.load %arg8[%c0_19, %c0_20] : memref<1x224xf32, #tpu.memory_space<vmem>>, vector<1x224xf32>
    %21 = vector.broadcast %20 : vector<1x224xf32> to vector<28x224xf32>
    %22 = arith.addf %19, %21 : vector<28x224xf32>
    %cst_21 = arith.constant 0.000000e+00 : f32
    %23 = vector.broadcast %cst_21 : f32 to vector<28x224xf32>
    %24 = arith.maximumf %22, %23 : vector<28x224xf32>
    %25 = arith.truncf %24 : vector<28x224xf32> to vector<28x224xbf16>
    %c0_22 = arith.constant 0 : index
    %c0_23 = arith.constant 0 : index
    %26 = vector.load %arg9[%c0_22, %c0_23] : memref<14x28xbf16, #tpu.memory_space<vmem>>, vector<14x28xbf16>
    %c0_24 = arith.constant 0 : index
    %c0_25 = arith.constant 0 : index
    %27 = vector.load %arg10[%c0_24, %c0_25] : memref<224x112xbf16, #tpu.memory_space<vmem>>, vector<224x112xbf16>
    %cst_26 = arith.constant dense<0.000000e+00> : vector<14x224xf32>
    %28 = tpu.matmul %26, %25, %cst_26 {dimension_numbers = #tpu.dot_dimension_numbers<[1], [0], [0], [1], [0, 0, 1, 1], [], []>} : vector<14x28xbf16>, vector<28x224xbf16>, vector<14x224xf32> -> vector<14x224xf32>
    %29 = arith.truncf %28 : vector<14x224xf32> to vector<14x224xbf16>
    %cst_27 = arith.constant dense<0.000000e+00> : vector<14x112xf32>
    %30 = tpu.matmul %29, %27, %cst_27 {dimension_numbers = #tpu.dot_dimension_numbers<[1], [0], [0], [1], [0, 0, 1, 1], [], []>} : vector<14x224xbf16>, vector<224x112xbf16>, vector<14x112xf32> -> vector<14x112xf32>
    %c0_28 = arith.constant 0 : index
    %c0_29 = arith.constant 0 : index
    %31 = vector.load %arg11[%c0_28, %c0_29] : memref<14x28xbf16, #tpu.memory_space<vmem>>, vector<14x28xbf16>
    %c0_30 = arith.constant 0 : index
    %c0_31 = arith.constant 0 : index
    %32 = vector.load %arg12[%c0_30, %c0_31] : memref<224x112xbf16, #tpu.memory_space<vmem>>, vector<224x112xbf16>
    %cst_32 = arith.constant dense<0.000000e+00> : vector<14x224xf32>
    %33 = tpu.matmul %31, %25, %cst_32 {dimension_numbers = #tpu.dot_dimension_numbers<[1], [0], [0], [1], [0, 0, 1, 1], [], []>} : vector<14x28xbf16>, vector<28x224xbf16>, vector<14x224xf32> -> vector<14x224xf32>
    %34 = arith.truncf %33 : vector<14x224xf32> to vector<14x224xbf16>
    %cst_33 = arith.constant dense<0.000000e+00> : vector<14x112xf32>
    %35 = tpu.matmul %34, %32, %cst_33 {dimension_numbers = #tpu.dot_dimension_numbers<[1], [0], [0], [1], [0, 0, 1, 1], [], []>} : vector<14x224xbf16>, vector<224x112xbf16>, vector<14x112xf32> -> vector<14x112xf32>
    %36 = arith.addf %30, %35 : vector<14x112xf32>
    %c0_34 = arith.constant 0 : index
    %c0_35 = arith.constant 0 : index
    %37 = vector.load %arg13[%c0_34, %c0_35] : memref<14x28xbf16, #tpu.memory_space<vmem>>, vector<14x28xbf16>
    %c0_36 = arith.constant 0 : index
    %c0_37 = arith.constant 0 : index
    %38 = vector.load %arg14[%c0_36, %c0_37] : memref<224x112xbf16, #tpu.memory_space<vmem>>, vector<224x112xbf16>
    %cst_38 = arith.constant dense<0.000000e+00> : vector<14x224xf32>
    %39 = tpu.matmul %37, %25, %cst_38 {dimension_numbers = #tpu.dot_dimension_numbers<[1], [0], [0], [1], [0, 0, 1, 1], [], []>} : vector<14x28xbf16>, vector<28x224xbf16>, vector<14x224xf32> -> vector<14x224xf32>
    %40 = arith.truncf %39 : vector<14x224xf32> to vector<14x224xbf16>
    %cst_39 = arith.constant dense<0.000000e+00> : vector<14x112xf32>
    %41 = tpu.matmul %40, %38, %cst_39 {dimension_numbers = #tpu.dot_dimension_numbers<[1], [0], [0], [1], [0, 0, 1, 1], [], []>} : vector<14x224xbf16>, vector<224x112xbf16>, vector<14x112xf32> -> vector<14x112xf32>
    %42 = arith.addf %36, %41 : vector<14x112xf32>
    %c0_40 = arith.constant 0 : index
    %c0_41 = arith.constant 0 : index
    %43 = vector.load %arg15[%c0_40, %c0_41] : memref<1x112xf32, #tpu.memory_space<vmem>>, vector<1x112xf32>
    %44 = vector.broadcast %43 : vector<1x112xf32> to vector<14x112xf32>
    %45 = arith.addf %42, %44 : vector<14x112xf32>
    %cst_42 = arith.constant 0.000000e+00 : f32
    %46 = vector.broadcast %cst_42 : f32 to vector<14x112xf32>
    %47 = arith.maximumf %45, %46 : vector<14x112xf32>
    %48 = arith.truncf %47 : vector<14x112xf32> to vector<14x112xbf16>
    %c0_43 = arith.constant 0 : index
    %c0_44 = arith.constant 0 : index
    %49 = vector.load %arg16[%c0_43, %c0_44] : memref<14x14xbf16, #tpu.memory_space<vmem>>, vector<14x14xbf16>
    %c0_45 = arith.constant 0 : index
    %c0_46 = arith.constant 0 : index
    %50 = vector.load %arg17[%c0_45, %c0_46] : memref<112x224xbf16, #tpu.memory_space<vmem>>, vector<112x224xbf16>
    %cst_47 = arith.constant dense<0.000000e+00> : vector<14x112xf32>
    %51 = tpu.matmul %49, %48, %cst_47 {dimension_numbers = #tpu.dot_dimension_numbers<[1], [0], [0], [1], [0, 0, 1, 1], [], []>} : vector<14x14xbf16>, vector<14x112xbf16>, vector<14x112xf32> -> vector<14x112xf32>
    %52 = arith.truncf %51 : vector<14x112xf32> to vector<14x112xbf16>
    %cst_48 = arith.constant dense<0.000000e+00> : vector<14x224xf32>
    %53 = tpu.matmul %52, %50, %cst_48 {dimension_numbers = #tpu.dot_dimension_numbers<[1], [0], [0], [1], [0, 0, 1, 1], [], []>} : vector<14x112xbf16>, vector<112x224xbf16>, vector<14x224xf32> -> vector<14x224xf32>
    %c0_49 = arith.constant 0 : index
    %c0_50 = arith.constant 0 : index
    %54 = vector.load %arg18[%c0_49, %c0_50] : memref<14x14xbf16, #tpu.memory_space<vmem>>, vector<14x14xbf16>
    %c0_51 = arith.constant 0 : index
    %c0_52 = arith.constant 0 : index
    %55 = vector.load %arg19[%c0_51, %c0_52] : memref<112x224xbf16, #tpu.memory_space<vmem>>, vector<112x224xbf16>
    %cst_53 = arith.constant dense<0.000000e+00> : vector<14x112xf32>
    %56 = tpu.matmul %54, %48, %cst_53 {dimension_numbers = #tpu.dot_dimension_numbers<[1], [0], [0], [1], [0, 0, 1, 1], [], []>} : vector<14x14xbf16>, vector<14x112xbf16>, vector<14x112xf32> -> vector<14x112xf32>
    %57 = arith.truncf %56 : vector<14x112xf32> to vector<14x112xbf16>
    %cst_54 = arith.constant dense<0.000000e+00> : vector<14x224xf32>
    %58 = tpu.matmul %57, %55, %cst_54 {dimension_numbers = #tpu.dot_dimension_numbers<[1], [0], [0], [1], [0, 0, 1, 1], [], []>} : vector<14x112xbf16>, vector<112x224xbf16>, vector<14x224xf32> -> vector<14x224xf32>
    %59 = arith.addf %53, %58 : vector<14x224xf32>
    %c0_55 = arith.constant 0 : index
    %c0_56 = arith.constant 0 : index
    %60 = vector.load %arg20[%c0_55, %c0_56] : memref<14x14xbf16, #tpu.memory_space<vmem>>, vector<14x14xbf16>
    %c0_57 = arith.constant 0 : index
    %c0_58 = arith.constant 0 : index
    %61 = vector.load %arg21[%c0_57, %c0_58] : memref<112x224xbf16, #tpu.memory_space<vmem>>, vector<112x224xbf16>
    %cst_59 = arith.constant dense<0.000000e+00> : vector<14x112xf32>
    %62 = tpu.matmul %60, %48, %cst_59 {dimension_numbers = #tpu.dot_dimension_numbers<[1], [0], [0], [1], [0, 0, 1, 1], [], []>} : vector<14x14xbf16>, vector<14x112xbf16>, vector<14x112xf32> -> vector<14x112xf32>
    %63 = arith.truncf %62 : vector<14x112xf32> to vector<14x112xbf16>
    %cst_60 = arith.constant dense<0.000000e+00> : vector<14x224xf32>
    %64 = tpu.matmul %63, %61, %cst_60 {dimension_numbers = #tpu.dot_dimension_numbers<[1], [0], [0], [1], [0, 0, 1, 1], [], []>} : vector<14x112xbf16>, vector<112x224xbf16>, vector<14x224xf32> -> vector<14x224xf32>
    %65 = arith.addf %59, %64 : vector<14x224xf32>
    %c0_61 = arith.constant 0 : index
    %c0_62 = arith.constant 0 : index
    %66 = vector.load %arg22[%c0_61, %c0_62] : memref<1x224xf32, #tpu.memory_space<vmem>>, vector<1x224xf32>
    %67 = vector.broadcast %66 : vector<1x224xf32> to vector<14x224xf32>
    %68 = arith.addf %65, %67 : vector<14x224xf32>
    %cst_63 = arith.constant 0.000000e+00 : f32
    %69 = vector.broadcast %cst_63 : f32 to vector<14x224xf32>
    %70 = arith.maximumf %68, %69 : vector<14x224xf32>
    %71 = arith.truncf %70 : vector<14x224xf32> to vector<14x224xbf16>
    %c0_64 = arith.constant 0 : index
    %c0_65 = arith.constant 0 : index
    %72 = vector.load %arg23[%c0_64, %c0_65] : memref<7x14xbf16, #tpu.memory_space<vmem>>, vector<7x14xbf16>
    %c0_66 = arith.constant 0 : index
    %c0_67 = arith.constant 0 : index
    %73 = vector.load %arg24[%c0_66, %c0_67] : memref<224x112xbf16, #tpu.memory_space<vmem>>, vector<224x112xbf16>
    %cst_68 = arith.constant dense<0.000000e+00> : vector<7x224xf32>
    %74 = tpu.matmul %72, %71, %cst_68 {dimension_numbers = #tpu.dot_dimension_numbers<[1], [0], [0], [1], [0, 0, 1, 1], [], []>} : vector<7x14xbf16>, vector<14x224xbf16>, vector<7x224xf32> -> vector<7x224xf32>
    %75 = arith.truncf %74 : vector<7x224xf32> to vector<7x224xbf16>
    %cst_69 = arith.constant dense<0.000000e+00> : vector<7x112xf32>
    %76 = tpu.matmul %75, %73, %cst_69 {dimension_numbers = #tpu.dot_dimension_numbers<[1], [0], [0], [1], [0, 0, 1, 1], [], []>} : vector<7x224xbf16>, vector<224x112xbf16>, vector<7x112xf32> -> vector<7x112xf32>
    %c0_70 = arith.constant 0 : index
    %c0_71 = arith.constant 0 : index
    %77 = vector.load %arg25[%c0_70, %c0_71] : memref<7x14xbf16, #tpu.memory_space<vmem>>, vector<7x14xbf16>
    %c0_72 = arith.constant 0 : index
    %c0_73 = arith.constant 0 : index
    %78 = vector.load %arg26[%c0_72, %c0_73] : memref<224x112xbf16, #tpu.memory_space<vmem>>, vector<224x112xbf16>
    %cst_74 = arith.constant dense<0.000000e+00> : vector<7x224xf32>
    %79 = tpu.matmul %77, %71, %cst_74 {dimension_numbers = #tpu.dot_dimension_numbers<[1], [0], [0], [1], [0, 0, 1, 1], [], []>} : vector<7x14xbf16>, vector<14x224xbf16>, vector<7x224xf32> -> vector<7x224xf32>
    %80 = arith.truncf %79 : vector<7x224xf32> to vector<7x224xbf16>
    %cst_75 = arith.constant dense<0.000000e+00> : vector<7x112xf32>
    %81 = tpu.matmul %80, %78, %cst_75 {dimension_numbers = #tpu.dot_dimension_numbers<[1], [0], [0], [1], [0, 0, 1, 1], [], []>} : vector<7x224xbf16>, vector<224x112xbf16>, vector<7x112xf32> -> vector<7x112xf32>
    %82 = arith.addf %76, %81 : vector<7x112xf32>
    %c0_76 = arith.constant 0 : index
    %c0_77 = arith.constant 0 : index
    %83 = vector.load %arg27[%c0_76, %c0_77] : memref<7x14xbf16, #tpu.memory_space<vmem>>, vector<7x14xbf16>
    %c0_78 = arith.constant 0 : index
    %c0_79 = arith.constant 0 : index
    %84 = vector.load %arg28[%c0_78, %c0_79] : memref<224x112xbf16, #tpu.memory_space<vmem>>, vector<224x112xbf16>
    %cst_80 = arith.constant dense<0.000000e+00> : vector<7x224xf32>
    %85 = tpu.matmul %83, %71, %cst_80 {dimension_numbers = #tpu.dot_dimension_numbers<[1], [0], [0], [1], [0, 0, 1, 1], [], []>} : vector<7x14xbf16>, vector<14x224xbf16>, vector<7x224xf32> -> vector<7x224xf32>
    %86 = arith.truncf %85 : vector<7x224xf32> to vector<7x224xbf16>
    %cst_81 = arith.constant dense<0.000000e+00> : vector<7x112xf32>
    %87 = tpu.matmul %86, %84, %cst_81 {dimension_numbers = #tpu.dot_dimension_numbers<[1], [0], [0], [1], [0, 0, 1, 1], [], []>} : vector<7x224xbf16>, vector<224x112xbf16>, vector<7x112xf32> -> vector<7x112xf32>
    %88 = arith.addf %82, %87 : vector<7x112xf32>
    %c0_82 = arith.constant 0 : index
    %c0_83 = arith.constant 0 : index
    %89 = vector.load %arg29[%c0_82, %c0_83] : memref<1x112xf32, #tpu.memory_space<vmem>>, vector<1x112xf32>
    %90 = vector.broadcast %89 : vector<1x112xf32> to vector<7x112xf32>
    %91 = arith.addf %88, %90 : vector<7x112xf32>
    %cst_84 = arith.constant 0.000000e+00 : f32
    %92 = vector.broadcast %cst_84 : f32 to vector<7x112xf32>
    %93 = arith.maximumf %91, %92 : vector<7x112xf32>
    %94 = arith.truncf %93 : vector<7x112xf32> to vector<7x112xbf16>
    %c0_85 = arith.constant 0 : index
    %c0_86 = arith.constant 0 : index
    %95 = vector.load %arg30[%c0_85, %c0_86] : memref<7x7xbf16, #tpu.memory_space<vmem>>, vector<7x7xbf16>
    %c0_87 = arith.constant 0 : index
    %c0_88 = arith.constant 0 : index
    %96 = vector.load %arg31[%c0_87, %c0_88] : memref<112x224xbf16, #tpu.memory_space<vmem>>, vector<112x224xbf16>
    %cst_89 = arith.constant dense<0.000000e+00> : vector<7x112xf32>
    %97 = tpu.matmul %95, %94, %cst_89 {dimension_numbers = #tpu.dot_dimension_numbers<[1], [0], [0], [1], [0, 0, 1, 1], [], []>} : vector<7x7xbf16>, vector<7x112xbf16>, vector<7x112xf32> -> vector<7x112xf32>
    %98 = arith.truncf %97 : vector<7x112xf32> to vector<7x112xbf16>
    %cst_90 = arith.constant dense<0.000000e+00> : vector<7x224xf32>
    %99 = tpu.matmul %98, %96, %cst_90 {dimension_numbers = #tpu.dot_dimension_numbers<[1], [0], [0], [1], [0, 0, 1, 1], [], []>} : vector<7x112xbf16>, vector<112x224xbf16>, vector<7x224xf32> -> vector<7x224xf32>
    %c0_91 = arith.constant 0 : index
    %c0_92 = arith.constant 0 : index
    %100 = vector.load %arg32[%c0_91, %c0_92] : memref<7x7xbf16, #tpu.memory_space<vmem>>, vector<7x7xbf16>
    %c0_93 = arith.constant 0 : index
    %c0_94 = arith.constant 0 : index
    %101 = vector.load %arg33[%c0_93, %c0_94] : memref<112x224xbf16, #tpu.memory_space<vmem>>, vector<112x224xbf16>
    %cst_95 = arith.constant dense<0.000000e+00> : vector<7x112xf32>
    %102 = tpu.matmul %100, %94, %cst_95 {dimension_numbers = #tpu.dot_dimension_numbers<[1], [0], [0], [1], [0, 0, 1, 1], [], []>} : vector<7x7xbf16>, vector<7x112xbf16>, vector<7x112xf32> -> vector<7x112xf32>
    %103 = arith.truncf %102 : vector<7x112xf32> to vector<7x112xbf16>
    %cst_96 = arith.constant dense<0.000000e+00> : vector<7x224xf32>
    %104 = tpu.matmul %103, %101, %cst_96 {dimension_numbers = #tpu.dot_dimension_numbers<[1], [0], [0], [1], [0, 0, 1, 1], [], []>} : vector<7x112xbf16>, vector<112x224xbf16>, vector<7x224xf32> -> vector<7x224xf32>
    %105 = arith.addf %99, %104 : vector<7x224xf32>
    %c0_97 = arith.constant 0 : index
    %c0_98 = arith.constant 0 : index
    %106 = vector.load %arg34[%c0_97, %c0_98] : memref<7x7xbf16, #tpu.memory_space<vmem>>, vector<7x7xbf16>
    %c0_99 = arith.constant 0 : index
    %c0_100 = arith.constant 0 : index
    %107 = vector.load %arg35[%c0_99, %c0_100] : memref<112x224xbf16, #tpu.memory_space<vmem>>, vector<112x224xbf16>
    %cst_101 = arith.constant dense<0.000000e+00> : vector<7x112xf32>
    %108 = tpu.matmul %106, %94, %cst_101 {dimension_numbers = #tpu.dot_dimension_numbers<[1], [0], [0], [1], [0, 0, 1, 1], [], []>} : vector<7x7xbf16>, vector<7x112xbf16>, vector<7x112xf32> -> vector<7x112xf32>
    %109 = arith.truncf %108 : vector<7x112xf32> to vector<7x112xbf16>
    %cst_102 = arith.constant dense<0.000000e+00> : vector<7x224xf32>
    %110 = tpu.matmul %109, %107, %cst_102 {dimension_numbers = #tpu.dot_dimension_numbers<[1], [0], [0], [1], [0, 0, 1, 1], [], []>} : vector<7x112xbf16>, vector<112x224xbf16>, vector<7x224xf32> -> vector<7x224xf32>
    %111 = arith.addf %105, %110 : vector<7x224xf32>
    %c0_103 = arith.constant 0 : index
    %c0_104 = arith.constant 0 : index
    %112 = vector.load %arg36[%c0_103, %c0_104] : memref<1x224xf32, #tpu.memory_space<vmem>>, vector<1x224xf32>
    %113 = vector.broadcast %112 : vector<1x224xf32> to vector<7x224xf32>
    %114 = arith.addf %111, %113 : vector<7x224xf32>
    %cst_105 = arith.constant 0.000000e+00 : f32
    %115 = vector.broadcast %cst_105 : f32 to vector<7x224xf32>
    %116 = arith.maximumf %114, %115 : vector<7x224xf32>
    %117 = arith.truncf %116 : vector<7x224xf32> to vector<7x224xbf16>
    %c0_106 = arith.constant 0 : index
    %c0_107 = arith.constant 0 : index
    %118 = vector.load %arg37[%c0_106, %c0_107] : memref<4x7xbf16, #tpu.memory_space<vmem>>, vector<4x7xbf16>
    %c0_108 = arith.constant 0 : index
    %c0_109 = arith.constant 0 : index
    %119 = vector.load %arg38[%c0_108, %c0_109] : memref<224x128xbf16, #tpu.memory_space<vmem>>, vector<224x128xbf16>
    %cst_110 = arith.constant dense<0.000000e+00> : vector<4x224xf32>
    %120 = tpu.matmul %118, %117, %cst_110 {dimension_numbers = #tpu.dot_dimension_numbers<[1], [0], [0], [1], [0, 0, 1, 1], [], []>} : vector<4x7xbf16>, vector<7x224xbf16>, vector<4x224xf32> -> vector<4x224xf32>
    %121 = arith.truncf %120 : vector<4x224xf32> to vector<4x224xbf16>
    %cst_111 = arith.constant dense<0.000000e+00> : vector<4x128xf32>
    %122 = tpu.matmul %121, %119, %cst_111 {dimension_numbers = #tpu.dot_dimension_numbers<[1], [0], [0], [1], [0, 0, 1, 1], [], []>} : vector<4x224xbf16>, vector<224x128xbf16>, vector<4x128xf32> -> vector<4x128xf32>
    %c0_112 = arith.constant 0 : index
    %c0_113 = arith.constant 0 : index
    %123 = vector.load %arg39[%c0_112, %c0_113] : memref<4x7xbf16, #tpu.memory_space<vmem>>, vector<4x7xbf16>
    %c0_114 = arith.constant 0 : index
    %c0_115 = arith.constant 0 : index
    %124 = vector.load %arg40[%c0_114, %c0_115] : memref<224x128xbf16, #tpu.memory_space<vmem>>, vector<224x128xbf16>
    %cst_116 = arith.constant dense<0.000000e+00> : vector<4x224xf32>
    %125 = tpu.matmul %123, %117, %cst_116 {dimension_numbers = #tpu.dot_dimension_numbers<[1], [0], [0], [1], [0, 0, 1, 1], [], []>} : vector<4x7xbf16>, vector<7x224xbf16>, vector<4x224xf32> -> vector<4x224xf32>
    %126 = arith.truncf %125 : vector<4x224xf32> to vector<4x224xbf16>
    %cst_117 = arith.constant dense<0.000000e+00> : vector<4x128xf32>
    %127 = tpu.matmul %126, %124, %cst_117 {dimension_numbers = #tpu.dot_dimension_numbers<[1], [0], [0], [1], [0, 0, 1, 1], [], []>} : vector<4x224xbf16>, vector<224x128xbf16>, vector<4x128xf32> -> vector<4x128xf32>
    %128 = arith.addf %122, %127 : vector<4x128xf32>
    %c0_118 = arith.constant 0 : index
    %c0_119 = arith.constant 0 : index
    %129 = vector.load %arg41[%c0_118, %c0_119] : memref<4x7xbf16, #tpu.memory_space<vmem>>, vector<4x7xbf16>
    %c0_120 = arith.constant 0 : index
    %c0_121 = arith.constant 0 : index
    %130 = vector.load %arg42[%c0_120, %c0_121] : memref<224x128xbf16, #tpu.memory_space<vmem>>, vector<224x128xbf16>
    %cst_122 = arith.constant dense<0.000000e+00> : vector<4x224xf32>
    %131 = tpu.matmul %129, %117, %cst_122 {dimension_numbers = #tpu.dot_dimension_numbers<[1], [0], [0], [1], [0, 0, 1, 1], [], []>} : vector<4x7xbf16>, vector<7x224xbf16>, vector<4x224xf32> -> vector<4x224xf32>
    %132 = arith.truncf %131 : vector<4x224xf32> to vector<4x224xbf16>
    %cst_123 = arith.constant dense<0.000000e+00> : vector<4x128xf32>
    %133 = tpu.matmul %132, %130, %cst_123 {dimension_numbers = #tpu.dot_dimension_numbers<[1], [0], [0], [1], [0, 0, 1, 1], [], []>} : vector<4x224xbf16>, vector<224x128xbf16>, vector<4x128xf32> -> vector<4x128xf32>
    %134 = arith.addf %128, %133 : vector<4x128xf32>
    %c0_124 = arith.constant 0 : index
    %c0_125 = arith.constant 0 : index
    %135 = vector.load %arg43[%c0_124, %c0_125] : memref<1x128xf32, #tpu.memory_space<vmem>>, vector<1x128xf32>
    %136 = vector.broadcast %135 : vector<1x128xf32> to vector<4x128xf32>
    %137 = arith.addf %134, %136 : vector<4x128xf32>
    %cst_126 = arith.constant 0.000000e+00 : f32
    %138 = vector.broadcast %cst_126 : f32 to vector<4x128xf32>
    %139 = arith.maximumf %137, %138 : vector<4x128xf32>
    %140 = arith.truncf %139 : vector<4x128xf32> to vector<4x128xbf16>
    %c0_127 = arith.constant 0 : index
    %c0_128 = arith.constant 0 : index
    %141 = vector.load %arg44[%c0_127, %c0_128] : memref<4x4xbf16, #tpu.memory_space<vmem>>, vector<4x4xbf16>
    %c0_129 = arith.constant 0 : index
    %c0_130 = arith.constant 0 : index
    %142 = vector.load %arg45[%c0_129, %c0_130] : memref<128x256xbf16, #tpu.memory_space<vmem>>, vector<128x256xbf16>
    %cst_131 = arith.constant dense<0.000000e+00> : vector<4x128xf32>
    %143 = tpu.matmul %141, %140, %cst_131 {dimension_numbers = #tpu.dot_dimension_numbers<[1], [0], [0], [1], [0, 0, 1, 1], [], []>} : vector<4x4xbf16>, vector<4x128xbf16>, vector<4x128xf32> -> vector<4x128xf32>
    %144 = arith.truncf %143 : vector<4x128xf32> to vector<4x128xbf16>
    %cst_132 = arith.constant dense<0.000000e+00> : vector<4x256xf32>
    %145 = tpu.matmul %144, %142, %cst_132 {dimension_numbers = #tpu.dot_dimension_numbers<[1], [0], [0], [1], [0, 0, 1, 1], [], []>} : vector<4x128xbf16>, vector<128x256xbf16>, vector<4x256xf32> -> vector<4x256xf32>
    %c0_133 = arith.constant 0 : index
    %c0_134 = arith.constant 0 : index
    %146 = vector.load %arg46[%c0_133, %c0_134] : memref<4x4xbf16, #tpu.memory_space<vmem>>, vector<4x4xbf16>
    %c0_135 = arith.constant 0 : index
    %c0_136 = arith.constant 0 : index
    %147 = vector.load %arg47[%c0_135, %c0_136] : memref<128x256xbf16, #tpu.memory_space<vmem>>, vector<128x256xbf16>
    %cst_137 = arith.constant dense<0.000000e+00> : vector<4x128xf32>
    %148 = tpu.matmul %146, %140, %cst_137 {dimension_numbers = #tpu.dot_dimension_numbers<[1], [0], [0], [1], [0, 0, 1, 1], [], []>} : vector<4x4xbf16>, vector<4x128xbf16>, vector<4x128xf32> -> vector<4x128xf32>
    %149 = arith.truncf %148 : vector<4x128xf32> to vector<4x128xbf16>
    %cst_138 = arith.constant dense<0.000000e+00> : vector<4x256xf32>
    %150 = tpu.matmul %149, %147, %cst_138 {dimension_numbers = #tpu.dot_dimension_numbers<[1], [0], [0], [1], [0, 0, 1, 1], [], []>} : vector<4x128xbf16>, vector<128x256xbf16>, vector<4x256xf32> -> vector<4x256xf32>
    %151 = arith.addf %145, %150 : vector<4x256xf32>
    %c0_139 = arith.constant 0 : index
    %c0_140 = arith.constant 0 : index
    %152 = vector.load %arg48[%c0_139, %c0_140] : memref<4x4xbf16, #tpu.memory_space<vmem>>, vector<4x4xbf16>
    %c0_141 = arith.constant 0 : index
    %c0_142 = arith.constant 0 : index
    %153 = vector.load %arg49[%c0_141, %c0_142] : memref<128x256xbf16, #tpu.memory_space<vmem>>, vector<128x256xbf16>
    %cst_143 = arith.constant dense<0.000000e+00> : vector<4x128xf32>
    %154 = tpu.matmul %152, %140, %cst_143 {dimension_numbers = #tpu.dot_dimension_numbers<[1], [0], [0], [1], [0, 0, 1, 1], [], []>} : vector<4x4xbf16>, vector<4x128xbf16>, vector<4x128xf32> -> vector<4x128xf32>
    %155 = arith.truncf %154 : vector<4x128xf32> to vector<4x128xbf16>
    %cst_144 = arith.constant dense<0.000000e+00> : vector<4x256xf32>
    %156 = tpu.matmul %155, %153, %cst_144 {dimension_numbers = #tpu.dot_dimension_numbers<[1], [0], [0], [1], [0, 0, 1, 1], [], []>} : vector<4x128xbf16>, vector<128x256xbf16>, vector<4x256xf32> -> vector<4x256xf32>
    %157 = arith.addf %151, %156 : vector<4x256xf32>
    %c0_145 = arith.constant 0 : index
    %c0_146 = arith.constant 0 : index
    %158 = vector.load %arg50[%c0_145, %c0_146] : memref<1x256xf32, #tpu.memory_space<vmem>>, vector<1x256xf32>
    %159 = vector.broadcast %158 : vector<1x256xf32> to vector<4x256xf32>
    %160 = arith.addf %157, %159 : vector<4x256xf32>
    %cst_147 = arith.constant 0.000000e+00 : f32
    %161 = vector.broadcast %cst_147 : f32 to vector<4x256xf32>
    %162 = arith.maximumf %160, %161 : vector<4x256xf32>
    %163 = arith.truncf %162 : vector<4x256xf32> to vector<4x256xbf16>
    %c0_148 = arith.constant 0 : index
    %c0_149 = arith.constant 0 : index
    %164 = vector.load %arg51[%c0_148, %c0_149] : memref<2x4xbf16, #tpu.memory_space<vmem>>, vector<2x4xbf16>
    %c0_150 = arith.constant 0 : index
    %c0_151 = arith.constant 0 : index
    %165 = vector.load %arg52[%c0_150, %c0_151] : memref<256x128xbf16, #tpu.memory_space<vmem>>, vector<256x128xbf16>
    %cst_152 = arith.constant dense<0.000000e+00> : vector<2x256xf32>
    %166 = tpu.matmul %164, %163, %cst_152 {dimension_numbers = #tpu.dot_dimension_numbers<[1], [0], [0], [1], [0, 0, 1, 1], [], []>} : vector<2x4xbf16>, vector<4x256xbf16>, vector<2x256xf32> -> vector<2x256xf32>
    %167 = arith.truncf %166 : vector<2x256xf32> to vector<2x256xbf16>
    %cst_153 = arith.constant dense<0.000000e+00> : vector<2x128xf32>
    %168 = tpu.matmul %167, %165, %cst_153 {dimension_numbers = #tpu.dot_dimension_numbers<[1], [0], [0], [1], [0, 0, 1, 1], [], []>} : vector<2x256xbf16>, vector<256x128xbf16>, vector<2x128xf32> -> vector<2x128xf32>
    %c0_154 = arith.constant 0 : index
    %c0_155 = arith.constant 0 : index
    %169 = vector.load %arg53[%c0_154, %c0_155] : memref<2x4xbf16, #tpu.memory_space<vmem>>, vector<2x4xbf16>
    %c0_156 = arith.constant 0 : index
    %c0_157 = arith.constant 0 : index
    %170 = vector.load %arg54[%c0_156, %c0_157] : memref<256x128xbf16, #tpu.memory_space<vmem>>, vector<256x128xbf16>
    %cst_158 = arith.constant dense<0.000000e+00> : vector<2x256xf32>
    %171 = tpu.matmul %169, %163, %cst_158 {dimension_numbers = #tpu.dot_dimension_numbers<[1], [0], [0], [1], [0, 0, 1, 1], [], []>} : vector<2x4xbf16>, vector<4x256xbf16>, vector<2x256xf32> -> vector<2x256xf32>
    %172 = arith.truncf %171 : vector<2x256xf32> to vector<2x256xbf16>
    %cst_159 = arith.constant dense<0.000000e+00> : vector<2x128xf32>
    %173 = tpu.matmul %172, %170, %cst_159 {dimension_numbers = #tpu.dot_dimension_numbers<[1], [0], [0], [1], [0, 0, 1, 1], [], []>} : vector<2x256xbf16>, vector<256x128xbf16>, vector<2x128xf32> -> vector<2x128xf32>
    %174 = arith.addf %168, %173 : vector<2x128xf32>
    %c0_160 = arith.constant 0 : index
    %c0_161 = arith.constant 0 : index
    %175 = vector.load %arg55[%c0_160, %c0_161] : memref<2x4xbf16, #tpu.memory_space<vmem>>, vector<2x4xbf16>
    %c0_162 = arith.constant 0 : index
    %c0_163 = arith.constant 0 : index
    %176 = vector.load %arg56[%c0_162, %c0_163] : memref<256x128xbf16, #tpu.memory_space<vmem>>, vector<256x128xbf16>
    %cst_164 = arith.constant dense<0.000000e+00> : vector<2x256xf32>
    %177 = tpu.matmul %175, %163, %cst_164 {dimension_numbers = #tpu.dot_dimension_numbers<[1], [0], [0], [1], [0, 0, 1, 1], [], []>} : vector<2x4xbf16>, vector<4x256xbf16>, vector<2x256xf32> -> vector<2x256xf32>
    %178 = arith.truncf %177 : vector<2x256xf32> to vector<2x256xbf16>
    %cst_165 = arith.constant dense<0.000000e+00> : vector<2x128xf32>
    %179 = tpu.matmul %178, %176, %cst_165 {dimension_numbers = #tpu.dot_dimension_numbers<[1], [0], [0], [1], [0, 0, 1, 1], [], []>} : vector<2x256xbf16>, vector<256x128xbf16>, vector<2x128xf32> -> vector<2x128xf32>
    %180 = arith.addf %174, %179 : vector<2x128xf32>
    %c0_166 = arith.constant 0 : index
    %c0_167 = arith.constant 0 : index
    %181 = vector.load %arg57[%c0_166, %c0_167] : memref<1x128xf32, #tpu.memory_space<vmem>>, vector<1x128xf32>
    %182 = vector.broadcast %181 : vector<1x128xf32> to vector<2x128xf32>
    %183 = arith.addf %180, %182 : vector<2x128xf32>
    %cst_168 = arith.constant 0.000000e+00 : f32
    %184 = vector.broadcast %cst_168 : f32 to vector<2x128xf32>
    %185 = arith.maximumf %183, %184 : vector<2x128xf32>
    %186 = arith.truncf %185 : vector<2x128xf32> to vector<2x128xbf16>
    %c0_169 = arith.constant 0 : index
    %c0_170 = arith.constant 0 : index
    %187 = vector.load %arg58[%c0_169, %c0_170] : memref<1x2xbf16, #tpu.memory_space<vmem>>, vector<1x2xbf16>
    %c0_171 = arith.constant 0 : index
    %c0_172 = arith.constant 0 : index
    %188 = vector.load %arg59[%c0_171, %c0_172] : memref<128x128xbf16, #tpu.memory_space<vmem>>, vector<128x128xbf16>
    %cst_173 = arith.constant dense<0.000000e+00> : vector<1x128xf32>
    %189 = tpu.matmul %187, %186, %cst_173 {dimension_numbers = #tpu.dot_dimension_numbers<[1], [0], [0], [1], [0, 0, 1, 1], [], []>} : vector<1x2xbf16>, vector<2x128xbf16>, vector<1x128xf32> -> vector<1x128xf32>
    %190 = arith.truncf %189 : vector<1x128xf32> to vector<1x128xbf16>
    %cst_174 = arith.constant dense<0.000000e+00> : vector<1x128xf32>
    %191 = tpu.matmul %190, %188, %cst_174 {dimension_numbers = #tpu.dot_dimension_numbers<[1], [0], [0], [1], [0, 0, 1, 1], [], []>} : vector<1x128xbf16>, vector<128x128xbf16>, vector<1x128xf32> -> vector<1x128xf32>
    %c0_175 = arith.constant 0 : index
    %c0_176 = arith.constant 0 : index
    %192 = vector.load %arg60[%c0_175, %c0_176] : memref<1x2xbf16, #tpu.memory_space<vmem>>, vector<1x2xbf16>
    %c0_177 = arith.constant 0 : index
    %c0_178 = arith.constant 0 : index
    %193 = vector.load %arg61[%c0_177, %c0_178] : memref<128x128xbf16, #tpu.memory_space<vmem>>, vector<128x128xbf16>
    %cst_179 = arith.constant dense<0.000000e+00> : vector<1x128xf32>
    %194 = tpu.matmul %192, %186, %cst_179 {dimension_numbers = #tpu.dot_dimension_numbers<[1], [0], [0], [1], [0, 0, 1, 1], [], []>} : vector<1x2xbf16>, vector<2x128xbf16>, vector<1x128xf32> -> vector<1x128xf32>
    %195 = arith.truncf %194 : vector<1x128xf32> to vector<1x128xbf16>
    %cst_180 = arith.constant dense<0.000000e+00> : vector<1x128xf32>
    %196 = tpu.matmul %195, %193, %cst_180 {dimension_numbers = #tpu.dot_dimension_numbers<[1], [0], [0], [1], [0, 0, 1, 1], [], []>} : vector<1x128xbf16>, vector<128x128xbf16>, vector<1x128xf32> -> vector<1x128xf32>
    %197 = arith.addf %191, %196 : vector<1x128xf32>
    %c0_181 = arith.constant 0 : index
    %c0_182 = arith.constant 0 : index
    %198 = vector.load %arg62[%c0_181, %c0_182] : memref<1x128xf32, #tpu.memory_space<vmem>>, vector<1x128xf32>
    %199 = arith.addf %197, %198 : vector<1x128xf32>
    %cst_183 = arith.constant 0.000000e+00 : f32
    %200 = vector.broadcast %cst_183 : f32 to vector<1x128xf32>
    %201 = arith.maximumf %199, %200 : vector<1x128xf32>
    %202 = arith.truncf %201 : vector<1x128xf32> to vector<1x128xbf16>
    %c0_184 = arith.constant 0 : index
    %c0_185 = arith.constant 0 : index
    %203 = vector.load %arg63[%c0_184, %c0_185] : memref<128x64xbf16, #tpu.memory_space<vmem>>, vector<128x64xbf16>
    %cst_186 = arith.constant dense<0.000000e+00> : vector<1x64xf32>
    %204 = tpu.matmul %202, %203, %cst_186 {dimension_numbers = #tpu.dot_dimension_numbers<[1], [0], [0], [1], [0, 0, 1, 1], [], []>} : vector<1x128xbf16>, vector<128x64xbf16>, vector<1x64xf32> -> vector<1x64xf32>
    %c0_187 = arith.constant 0 : index
    %c0_188 = arith.constant 0 : index
    %205 = vector.load %arg64[%c0_187, %c0_188] : memref<1x64xf32, #tpu.memory_space<vmem>>, vector<1x64xf32>
    %206 = arith.addf %204, %205 : vector<1x64xf32>
    %cst_189 = arith.constant 0.000000e+00 : f32
    %207 = vector.broadcast %cst_189 : f32 to vector<1x64xf32>
    %208 = arith.maximumf %206, %207 : vector<1x64xf32>
    %209 = arith.truncf %208 : vector<1x64xf32> to vector<1x64xbf16>
    %c0_190 = arith.constant 0 : index
    %c0_191 = arith.constant 0 : index
    %210 = vector.load %arg65[%c0_190, %c0_191] : memref<64x32xbf16, #tpu.memory_space<vmem>>, vector<64x32xbf16>
    %cst_192 = arith.constant dense<0.000000e+00> : vector<1x32xf32>
    %211 = tpu.matmul %209, %210, %cst_192 {dimension_numbers = #tpu.dot_dimension_numbers<[1], [0], [0], [1], [0, 0, 1, 1], [], []>} : vector<1x64xbf16>, vector<64x32xbf16>, vector<1x32xf32> -> vector<1x32xf32>
    %c0_193 = arith.constant 0 : index
    %c0_194 = arith.constant 0 : index
    %212 = vector.load %arg66[%c0_193, %c0_194] : memref<1x32xf32, #tpu.memory_space<vmem>>, vector<1x32xf32>
    %213 = arith.addf %211, %212 : vector<1x32xf32>
    %cst_195 = arith.constant 0.000000e+00 : f32
    %214 = vector.broadcast %cst_195 : f32 to vector<1x32xf32>
    %215 = arith.maximumf %213, %214 : vector<1x32xf32>
    %216 = arith.truncf %215 : vector<1x32xf32> to vector<1x32xbf16>
    %c0_196 = arith.constant 0 : index
    %c0_197 = arith.constant 0 : index
    %217 = vector.load %arg67[%c0_196, %c0_197] : memref<32x10xbf16, #tpu.memory_space<vmem>>, vector<32x10xbf16>
    %cst_198 = arith.constant dense<0.000000e+00> : vector<1x10xf32>
    %218 = tpu.matmul %216, %217, %cst_198 {dimension_numbers = #tpu.dot_dimension_numbers<[1], [0], [0], [1], [0, 0, 1, 1], [], []>} : vector<1x32xbf16>, vector<32x10xbf16>, vector<1x10xf32> -> vector<1x10xf32>
    %c0_199 = arith.constant 0 : index
    %c0_200 = arith.constant 0 : index
    %219 = vector.load %arg68[%c0_199, %c0_200] : memref<1x10xf32, #tpu.memory_space<vmem>>, vector<1x10xf32>
    %220 = arith.addf %218, %219 : vector<1x10xf32>
    %c0_201 = arith.constant 0 : index
    %c0_202 = arith.constant 0 : index
    %c0_203 = arith.constant 0 : index
    %221 = vector.load %arg69[%c0_201, %c0_202, %c0_203] : memref<1x1x10xf32, #tpu.memory_space<vmem>>, vector<1x1x10xf32>
    %222 = vector.shape_cast %221 : vector<1x1x10xf32> to vector<1x10xf32>
    %223 = vector.shape_cast %220 : vector<1x10xf32> to vector<1x1x10xf32>
    tpu.vector_store %arg69[%c0_201, %c0_202, %c0_203], %223 {strides = array<i32>} : memref<1x1x10xf32, #tpu.memory_space<vmem>>, vector<1x1x10xf32>,
    return
  }
  func.func @transform_0(%arg0: i32) -> (i32, i32, i32) {
    %c0_i32 = arith.constant 0 : i32
    %c0_i32_0 = arith.constant 0 : i32
    %c0_i32_1 = arith.constant 0 : i32
    return %arg0, %c0_i32, %c0_i32_0 : i32, i32, i32
  }
  func.func @transform_1(%arg0: i32) -> (i32, i32) {
    %c0_i32 = arith.constant 0 : i32
    %c0_i32_0 = arith.constant 0 : i32
    %c0_i32_1 = arith.constant 0 : i32
    return %c0_i32, %c0_i32_0 : i32, i32
  }
  func.func @transform_2(%arg0: i32) -> (i32, i32) {
    %c0_i32 = arith.constant 0 : i32
    %c0_i32_0 = arith.constant 0 : i32
    %c0_i32_1 = arith.constant 0 : i32
    return %c0_i32, %c0_i32_0 : i32, i32
  }
  func.func @transform_3(%arg0: i32) -> (i32, i32) {
    %c0_i32 = arith.constant 0 : i32
    %c0_i32_0 = arith.constant 0 : i32
    %c0_i32_1 = arith.constant 0 : i32
    return %c0_i32, %c0_i32_0 : i32, i32
  }
  func.func @transform_4(%arg0: i32) -> (i32, i32) {
    %c0_i32 = arith.constant 0 : i32
    %c0_i32_0 = arith.constant 0 : i32
    %c0_i32_1 = arith.constant 0 : i32
    return %c0_i32, %c0_i32_0 : i32, i32
  }
  func.func @transform_5(%arg0: i32) -> (i32, i32) {
    %c0_i32 = arith.constant 0 : i32
    %c0_i32_0 = arith.constant 0 : i32
    %c0_i32_1 = arith.constant 0 : i32
    return %c0_i32, %c0_i32_0 : i32, i32
  }
  func.func @transform_6(%arg0: i32) -> (i32, i32) {
    %c0_i32 = arith.constant 0 : i32
    %c0_i32_0 = arith.constant 0 : i32
    %c0_i32_1 = arith.constant 0 : i32
    return %c0_i32, %c0_i32_0 : i32, i32
  }
  func.func @transform_7(%arg0: i32) -> (i32, i32) {
    %c0_i32 = arith.constant 0 : i32
    %c0_i32_0 = arith.constant 0 : i32
    %c0_i32_1 = arith.constant 0 : i32
    return %c0_i32, %c0_i32_0 : i32, i32
  }
  func.func @transform_8(%arg0: i32) -> (i32, i32) {
    %c0_i32 = arith.constant 0 : i32
    %c0_i32_0 = arith.constant 0 : i32
    %c0_i32_1 = arith.constant 0 : i32
    return %c0_i32, %c0_i32_0 : i32, i32
  }
  func.func @transform_9(%arg0: i32) -> (i32, i32) {
    %c0_i32 = arith.constant 0 : i32
    %c0_i32_0 = arith.constant 0 : i32
    %c0_i32_1 = arith.constant 0 : i32
    return %c0_i32, %c0_i32_0 : i32, i32
  }
  func.func @transform_10(%arg0: i32) -> (i32, i32) {
    %c0_i32 = arith.constant 0 : i32
    %c0_i32_0 = arith.constant 0 : i32
    %c0_i32_1 = arith.constant 0 : i32
    return %c0_i32, %c0_i32_0 : i32, i32
  }
  func.func @transform_11(%arg0: i32) -> (i32, i32) {
    %c0_i32 = arith.constant 0 : i32
    %c0_i32_0 = arith.constant 0 : i32
    %c0_i32_1 = arith.constant 0 : i32
    return %c0_i32, %c0_i32_0 : i32, i32
  }
  func.func @transform_12(%arg0: i32) -> (i32, i32) {
    %c0_i32 = arith.constant 0 : i32
    %c0_i32_0 = arith.constant 0 : i32
    %c0_i32_1 = arith.constant 0 : i32
    return %c0_i32, %c0_i32_0 : i32, i32
  }
  func.func @transform_13(%arg0: i32) -> (i32, i32) {
    %c0_i32 = arith.constant 0 : i32
    %c0_i32_0 = arith.constant 0 : i32
    %c0_i32_1 = arith.constant 0 : i32
    return %c0_i32, %c0_i32_0 : i32, i32
  }
  func.func @transform_14(%arg0: i32) -> (i32, i32) {
    %c0_i32 = arith.constant 0 : i32
    %c0_i32_0 = arith.constant 0 : i32
    %c0_i32_1 = arith.constant 0 : i32
    return %c0_i32, %c0_i32_0 : i32, i32
  }
  func.func @transform_15(%arg0: i32) -> (i32, i32) {
    %c0_i32 = arith.constant 0 : i32
    %c0_i32_0 = arith.constant 0 : i32
    %c0_i32_1 = arith.constant 0 : i32
    return %c0_i32, %c0_i32_0 : i32, i32
  }
  func.func @transform_16(%arg0: i32) -> (i32, i32) {
    %c0_i32 = arith.constant 0 : i32
    %c0_i32_0 = arith.constant 0 : i32
    %c0_i32_1 = arith.constant 0 : i32
    return %c0_i32, %c0_i32_0 : i32, i32
  }
  func.func @transform_17(%arg0: i32) -> (i32, i32) {
    %c0_i32 = arith.constant 0 : i32
    %c0_i32_0 = arith.constant 0 : i32
    %c0_i32_1 = arith.constant 0 : i32
    return %c0_i32, %c0_i32_0 : i32, i32
  }
  func.func @transform_18(%arg0: i32) -> (i32, i32) {
    %c0_i32 = arith.constant 0 : i32
    %c0_i32_0 = arith.constant 0 : i32
    %c0_i32_1 = arith.constant 0 : i32
    return %c0_i32, %c0_i32_0 : i32, i32
  }
  func.func @transform_19(%arg0: i32) -> (i32, i32) {
    %c0_i32 = arith.constant 0 : i32
    %c0_i32_0 = arith.constant 0 : i32
    %c0_i32_1 = arith.constant 0 : i32
    return %c0_i32, %c0_i32_0 : i32, i32
  }
  func.func @transform_20(%arg0: i32) -> (i32, i32) {
    %c0_i32 = arith.constant 0 : i32
    %c0_i32_0 = arith.constant 0 : i32
    %c0_i32_1 = arith.constant 0 : i32
    return %c0_i32, %c0_i32_0 : i32, i32
  }
  func.func @transform_21(%arg0: i32) -> (i32, i32) {
    %c0_i32 = arith.constant 0 : i32
    %c0_i32_0 = arith.constant 0 : i32
    %c0_i32_1 = arith.constant 0 : i32
    return %c0_i32, %c0_i32_0 : i32, i32
  }
  func.func @transform_22(%arg0: i32) -> (i32, i32) {
    %c0_i32 = arith.constant 0 : i32
    %c0_i32_0 = arith.constant 0 : i32
    %c0_i32_1 = arith.constant 0 : i32
    return %c0_i32, %c0_i32_0 : i32, i32
  }
  func.func @transform_23(%arg0: i32) -> (i32, i32) {
    %c0_i32 = arith.constant 0 : i32
    %c0_i32_0 = arith.constant 0 : i32
    %c0_i32_1 = arith.constant 0 : i32
    return %c0_i32, %c0_i32_0 : i32, i32
  }
  func.func @transform_24(%arg0: i32) -> (i32, i32) {
    %c0_i32 = arith.constant 0 : i32
    %c0_i32_0 = arith.constant 0 : i32
    %c0_i32_1 = arith.constant 0 : i32
    return %c0_i32, %c0_i32_0 : i32, i32
  }
  func.func @transform_25(%arg0: i32) -> (i32, i32) {
    %c0_i32 = arith.constant 0 : i32
    %c0_i32_0 = arith.constant 0 : i32
    %c0_i32_1 = arith.constant 0 : i32
    return %c0_i32, %c0_i32_0 : i32, i32
  }
  func.func @transform_26(%arg0: i32) -> (i32, i32) {
    %c0_i32 = arith.constant 0 : i32
    %c0_i32_0 = arith.constant 0 : i32
    %c0_i32_1 = arith.constant 0 : i32
    return %c0_i32, %c0_i32_0 : i32, i32
  }
  func.func @transform_27(%arg0: i32) -> (i32, i32) {
    %c0_i32 = arith.constant 0 : i32
    %c0_i32_0 = arith.constant 0 : i32
    %c0_i32_1 = arith.constant 0 : i32
    return %c0_i32, %c0_i32_0 : i32, i32
  }
  func.func @transform_28(%arg0: i32) -> (i32, i32) {
    %c0_i32 = arith.constant 0 : i32
    %c0_i32_0 = arith.constant 0 : i32
    %c0_i32_1 = arith.constant 0 : i32
    return %c0_i32, %c0_i32_0 : i32, i32
  }
  func.func @transform_29(%arg0: i32) -> (i32, i32) {
    %c0_i32 = arith.constant 0 : i32
    %c0_i32_0 = arith.constant 0 : i32
    %c0_i32_1 = arith.constant 0 : i32
    return %c0_i32, %c0_i32_0 : i32, i32
  }
  func.func @transform_30(%arg0: i32) -> (i32, i32) {
    %c0_i32 = arith.constant 0 : i32
    %c0_i32_0 = arith.constant 0 : i32
    %c0_i32_1 = arith.constant 0 : i32
    return %c0_i32, %c0_i32_0 : i32, i32
  }
  func.func @transform_31(%arg0: i32) -> (i32, i32) {
    %c0_i32 = arith.constant 0 : i32
    %c0_i32_0 = arith.constant 0 : i32
    %c0_i32_1 = arith.constant 0 : i32
    return %c0_i32, %c0_i32_0 : i32, i32
  }
  func.func @transform_32(%arg0: i32) -> (i32, i32) {
    %c0_i32 = arith.constant 0 : i32
    %c0_i32_0 = arith.constant 0 : i32
    %c0_i32_1 = arith.constant 0 : i32
    return %c0_i32, %c0_i32_0 : i32, i32
  }
  func.func @transform_33(%arg0: i32) -> (i32, i32) {
    %c0_i32 = arith.constant 0 : i32
    %c0_i32_0 = arith.constant 0 : i32
    %c0_i32_1 = arith.constant 0 : i32
    return %c0_i32, %c0_i32_0 : i32, i32
  }
  func.func @transform_34(%arg0: i32) -> (i32, i32) {
    %c0_i32 = arith.constant 0 : i32
    %c0_i32_0 = arith.constant 0 : i32
    %c0_i32_1 = arith.constant 0 : i32
    return %c0_i32, %c0_i32_0 : i32, i32
  }
  func.func @transform_35(%arg0: i32) -> (i32, i32) {
    %c0_i32 = arith.constant 0 : i32
    %c0_i32_0 = arith.constant 0 : i32
    %c0_i32_1 = arith.constant 0 : i32
    return %c0_i32, %c0_i32_0 : i32, i32
  }
  func.func @transform_36(%arg0: i32) -> (i32, i32) {
    %c0_i32 = arith.constant 0 : i32
    %c0_i32_0 = arith.constant 0 : i32
    %c0_i32_1 = arith.constant 0 : i32
    return %c0_i32, %c0_i32_0 : i32, i32
  }
  func.func @transform_37(%arg0: i32) -> (i32, i32) {
    %c0_i32 = arith.constant 0 : i32
    %c0_i32_0 = arith.constant 0 : i32
    %c0_i32_1 = arith.constant 0 : i32
    return %c0_i32, %c0_i32_0 : i32, i32
  }
  func.func @transform_38(%arg0: i32) -> (i32, i32) {
    %c0_i32 = arith.constant 0 : i32
    %c0_i32_0 = arith.constant 0 : i32
    %c0_i32_1 = arith.constant 0 : i32
    return %c0_i32, %c0_i32_0 : i32, i32
  }
  func.func @transform_39(%arg0: i32) -> (i32, i32) {
    %c0_i32 = arith.constant 0 : i32
    %c0_i32_0 = arith.constant 0 : i32
    %c0_i32_1 = arith.constant 0 : i32
    return %c0_i32, %c0_i32_0 : i32, i32
  }
  func.func @transform_40(%arg0: i32) -> (i32, i32) {
    %c0_i32 = arith.constant 0 : i32
    %c0_i32_0 = arith.constant 0 : i32
    %c0_i32_1 = arith.constant 0 : i32
    return %c0_i32, %c0_i32_0 : i32, i32
  }
  func.func @transform_41(%arg0: i32) -> (i32, i32) {
    %c0_i32 = arith.constant 0 : i32
    %c0_i32_0 = arith.constant 0 : i32
    %c0_i32_1 = arith.constant 0 : i32
    return %c0_i32, %c0_i32_0 : i32, i32
  }
  func.func @transform_42(%arg0: i32) -> (i32, i32) {
    %c0_i32 = arith.constant 0 : i32
    %c0_i32_0 = arith.constant 0 : i32
    %c0_i32_1 = arith.constant 0 : i32
    return %c0_i32, %c0_i32_0 : i32, i32
  }
  func.func @transform_43(%arg0: i32) -> (i32, i32) {
    %c0_i32 = arith.constant 0 : i32
    %c0_i32_0 = arith.constant 0 : i32
    %c0_i32_1 = arith.constant 0 : i32
    return %c0_i32, %c0_i32_0 : i32, i32
  }
  func.func @transform_44(%arg0: i32) -> (i32, i32) {
    %c0_i32 = arith.constant 0 : i32
    %c0_i32_0 = arith.constant 0 : i32
    %c0_i32_1 = arith.constant 0 : i32
    return %c0_i32, %c0_i32_0 : i32, i32
  }
  func.func @transform_45(%arg0: i32) -> (i32, i32) {
    %c0_i32 = arith.constant 0 : i32
    %c0_i32_0 = arith.constant 0 : i32
    %c0_i32_1 = arith.constant 0 : i32
    return %c0_i32, %c0_i32_0 : i32, i32
  }
  func.func @transform_46(%arg0: i32) -> (i32, i32) {
    %c0_i32 = arith.constant 0 : i32
    %c0_i32_0 = arith.constant 0 : i32
    %c0_i32_1 = arith.constant 0 : i32
    return %c0_i32, %c0_i32_0 : i32, i32
  }
  func.func @transform_47(%arg0: i32) -> (i32, i32) {
    %c0_i32 = arith.constant 0 : i32
    %c0_i32_0 = arith.constant 0 : i32
    %c0_i32_1 = arith.constant 0 : i32
    return %c0_i32, %c0_i32_0 : i32, i32
  }
  func.func @transform_48(%arg0: i32) -> (i32, i32) {
    %c0_i32 = arith.constant 0 : i32
    %c0_i32_0 = arith.constant 0 : i32
    %c0_i32_1 = arith.constant 0 : i32
    return %c0_i32, %c0_i32_0 : i32, i32
  }
  func.func @transform_49(%arg0: i32) -> (i32, i32) {
    %c0_i32 = arith.constant 0 : i32
    %c0_i32_0 = arith.constant 0 : i32
    %c0_i32_1 = arith.constant 0 : i32
    return %c0_i32, %c0_i32_0 : i32, i32
  }
  func.func @transform_50(%arg0: i32) -> (i32, i32) {
    %c0_i32 = arith.constant 0 : i32
    %c0_i32_0 = arith.constant 0 : i32
    %c0_i32_1 = arith.constant 0 : i32
    return %c0_i32, %c0_i32_0 : i32, i32
  }
  func.func @transform_51(%arg0: i32) -> (i32, i32) {
    %c0_i32 = arith.constant 0 : i32
    %c0_i32_0 = arith.constant 0 : i32
    %c0_i32_1 = arith.constant 0 : i32
    return %c0_i32, %c0_i32_0 : i32, i32
  }
  func.func @transform_52(%arg0: i32) -> (i32, i32) {
    %c0_i32 = arith.constant 0 : i32
    %c0_i32_0 = arith.constant 0 : i32
    %c0_i32_1 = arith.constant 0 : i32
    return %c0_i32, %c0_i32_0 : i32, i32
  }
  func.func @transform_53(%arg0: i32) -> (i32, i32) {
    %c0_i32 = arith.constant 0 : i32
    %c0_i32_0 = arith.constant 0 : i32
    %c0_i32_1 = arith.constant 0 : i32
    return %c0_i32, %c0_i32_0 : i32, i32
  }
  func.func @transform_54(%arg0: i32) -> (i32, i32) {
    %c0_i32 = arith.constant 0 : i32
    %c0_i32_0 = arith.constant 0 : i32
    %c0_i32_1 = arith.constant 0 : i32
    return %c0_i32, %c0_i32_0 : i32, i32
  }
  func.func @transform_55(%arg0: i32) -> (i32, i32) {
    %c0_i32 = arith.constant 0 : i32
    %c0_i32_0 = arith.constant 0 : i32
    %c0_i32_1 = arith.constant 0 : i32
    return %c0_i32, %c0_i32_0 : i32, i32
  }
  func.func @transform_56(%arg0: i32) -> (i32, i32) {
    %c0_i32 = arith.constant 0 : i32
    %c0_i32_0 = arith.constant 0 : i32
    %c0_i32_1 = arith.constant 0 : i32
    return %c0_i32, %c0_i32_0 : i32, i32
  }
  func.func @transform_57(%arg0: i32) -> (i32, i32) {
    %c0_i32 = arith.constant 0 : i32
    %c0_i32_0 = arith.constant 0 : i32
    %c0_i32_1 = arith.constant 0 : i32
    return %c0_i32, %c0_i32_0 : i32, i32
  }
  func.func @transform_58(%arg0: i32) -> (i32, i32) {
    %c0_i32 = arith.constant 0 : i32
    %c0_i32_0 = arith.constant 0 : i32
    %c0_i32_1 = arith.constant 0 : i32
    return %c0_i32, %c0_i32_0 : i32, i32
  }
  func.func @transform_59(%arg0: i32) -> (i32, i32) {
    %c0_i32 = arith.constant 0 : i32
    %c0_i32_0 = arith.constant 0 : i32
    %c0_i32_1 = arith.constant 0 : i32
    return %c0_i32, %c0_i32_0 : i32, i32
  }
  func.func @transform_60(%arg0: i32) -> (i32, i32) {
    %c0_i32 = arith.constant 0 : i32
    %c0_i32_0 = arith.constant 0 : i32
    %c0_i32_1 = arith.constant 0 : i32
    return %c0_i32, %c0_i32_0 : i32, i32
  }
  func.func @transform_61(%arg0: i32) -> (i32, i32) {
    %c0_i32 = arith.constant 0 : i32
    %c0_i32_0 = arith.constant 0 : i32
    %c0_i32_1 = arith.constant 0 : i32
    return %c0_i32, %c0_i32_0 : i32, i32
  }
  func.func @transform_62(%arg0: i32) -> (i32, i32) {
    %c0_i32 = arith.constant 0 : i32
    %c0_i32_0 = arith.constant 0 : i32
    %c0_i32_1 = arith.constant 0 : i32
    return %c0_i32, %c0_i32_0 : i32, i32
  }
  func.func @transform_63(%arg0: i32) -> (i32, i32) {
    %c0_i32 = arith.constant 0 : i32
    %c0_i32_0 = arith.constant 0 : i32
    %c0_i32_1 = arith.constant 0 : i32
    return %c0_i32, %c0_i32_0 : i32, i32
  }
  func.func @transform_64(%arg0: i32) -> (i32, i32) {
    %c0_i32 = arith.constant 0 : i32
    %c0_i32_0 = arith.constant 0 : i32
    %c0_i32_1 = arith.constant 0 : i32
    return %c0_i32, %c0_i32_0 : i32, i32
  }
  func.func @transform_65(%arg0: i32) -> (i32, i32) {
    %c0_i32 = arith.constant 0 : i32
    %c0_i32_0 = arith.constant 0 : i32
    %c0_i32_1 = arith.constant 0 : i32
    return %c0_i32, %c0_i32_0 : i32, i32
  }
  func.func @transform_66(%arg0: i32) -> (i32, i32) {
    %c0_i32 = arith.constant 0 : i32
    %c0_i32_0 = arith.constant 0 : i32
    %c0_i32_1 = arith.constant 0 : i32
    return %c0_i32, %c0_i32_0 : i32, i32
  }
  func.func @transform_67(%arg0: i32) -> (i32, i32) {
    %c0_i32 = arith.constant 0 : i32
    %c0_i32_0 = arith.constant 0 : i32
    %c0_i32_1 = arith.constant 0 : i32
    return %c0_i32, %c0_i32_0 : i32, i32
  }
  func.func @transform_68(%arg0: i32) -> (i32, i32, i32) {
    %c0_i32 = arith.constant 0 : i32
    %c0_i32_0 = arith.constant 0 : i32
    %c0_i32_1 = arith.constant 0 : i32
    return %arg0, %c0_i32, %c0_i32_0 : i32, i32, i32
  }
}

</mosaic_0001>

<bundles_post_ra>
// kernel: forward.1
= control target key start
LH: loop header
LB: loop body
LE: loop exit
PB: predicated region body
PF: predicated region fallthrough
CT: control target
= control target key end

     0   :  { %s12221_s6 = smov 1   ;;  %s12222_s10 = smov 2   ;;  %s14113_s0 = inlined_call_operand.smem [shape: u32[69], index: -1, kind: input, shape index: {}] }
   0x1   :  { %s12362_s5 = sld [smem:[%s14113_s0]]   ;;  %s12223_s14 = smov 3  }
   0x2   :  { %s12367_s9 = sld [smem:[%s14113_s0 + %s12221_s6]]   ;;  %s12224_s18 = smov 4  }
   0x3   :  { %s12372_s13 = sld [smem:[%s14113_s0 + %s12222_s10]]   ;;  %s12225_s22 = smov 5  }
   0x4   :  { %s12377_s17 = sld [smem:[%s14113_s0 + %s12223_s14]]   ;;  %s12226_s26 = smov 6  }
   0x5   :  { %s12382_s21 = sld [smem:[%s14113_s0 + %s12224_s18]]   ;;  %s12227_s30 = smov 7  }
   0x6   :  { %s12387_s25 = sld [smem:[%s14113_s0 + %s12225_s22]]   ;;  %s12228_s4 = smov 8  }
   0x7   :  { %14226 = sst [smem:[#allocation119_spill]] %s12362_s5  ;;  %s12229_s10 = smov 9  }
   0x8   :  { %14227 = sst [smem:[#allocation120_spill]] %s12367_s9  ;;  %s12230_s15 = smov 10  }
   0x9   :  { %14228 = sst [smem:[#allocation121_spill]] %s12372_s13  ;;  %s12231_s20 = smov 11  }
   0xa   :  { %14229 = sst [smem:[#allocation122_spill]] %s12377_s17  ;;  %s12233_s1 = smov 13  }
   0xb   :  { %s12392_s29 = sld [smem:[%s14113_s0 + %s12226_s26]]   ;;  %s12232_s26 = smov 12  }
   0xc   :  { %14230 = sst [smem:[#allocation123_spill]] %s12387_s25  ;;  %s12234_s7 = smov 14  }
   0xd   :  { %s12397_s3 = sld [smem:[%s14113_s0 + %s12227_s30]]   ;;  %s12236_s22 = smov 16  }
   0xe   :  { %s12402_s8 = sld [smem:[%s14113_s0 + %s12228_s4]]   ;;  %s12237_s28 = smov 17  }
   0xf   :  { %s12407_s14 = sld [smem:[%s14113_s0 + %s12229_s10]]  }
  0x10   :  { %s12412_s19 = sld [smem:[%s14113_s0 + %s12230_s15]]   ;;  %s12235_s15 = smov 15  }
  0x11   :  { %s12417_s24 = sld [smem:[%s14113_s0 + %s12231_s20]]  }
  0x12   :  { %s12422_s30 = sld [smem:[%s14113_s0 + %s12232_s26]]  }
  0x13   :  { %14231 = sst [smem:[#allocation124_spill]] %s12397_s3 }
  0x14   :  { %14232 = sst [smem:[#allocation125_spill]] %s12402_s8 }
  0x15   :  { %14233 = sst [smem:[#allocation126_spill]] %s12407_s14 }
  0x16   :  { %s12427_s6 = sld [smem:[%s14113_s0 + %s12233_s1]]  }
  0x17   :  { %14234 = sst [smem:[#allocation127_spill]] %s12417_s24 }
  0x18   :  { %s12432_s12 = sld [smem:[%s14113_s0 + %s12234_s7]]   ;;  %s12238_s7 = smov 18  }
  0x19   :  { %s12437_s20 = sld [smem:[%s14113_s0 + %s12235_s15]]   ;;  %s12239_s15 = smov 19  }
  0x1a   :  { %s12442_s27 = sld [smem:[%s14113_s0 + %s12236_s22]]   ;;  %s12240_s22 = smov 20  }
  0x1b   :  { %s12447_s4 = sld [smem:[%s14113_s0 + %s12237_s28]]   ;;  %s12241_s28 = smov 21  }
  0x1c   :  { %14235 = sst [smem:[#allocation128_spill]] %s12427_s6 }
  0x1d   :  { %s12452_s5 = sld [smem:[%s14113_s0 + %s12238_s7]]   ;;  %s12242_s7 = smov 22  }
  0x1e   :  { %14236 = sst [smem:[#allocation129_spill]] %s12432_s12 }
  0x1f   :  { %14237 = sst [smem:[#allocation130_spill]] %s12437_s20 }
  0x20   :  { %s12457_s20 = sld [smem:[%s14113_s0 + %s12239_s15]]   ;;  %s12243_s15 = smov 23  }
  0x21   :  { %14238 = sst [smem:[#allocation131_spill]] %s12447_s4 }
  0x22   :  { %s12462_s6 = sld [smem:[%s14113_s0 + %s12240_s22]]   ;;  %s12244_s22 = smov 24  }
  0x23   :  { %14239 = sst [smem:[#allocation132_spill]] %s12452_s5 }
  0x24   :  { %s12467_s4 = sld [smem:[%s14113_s0 + %s12241_s28]]   ;;  %s12245_s28 = smov 25  }
  0x25   :  { %s12472_s24 = sld [smem:[%s14113_s0 + %s12242_s7]]   ;;  %s12246_s7 = smov 26  }
  0x26   :  { %14240 = sst [smem:[#allocation133_spill]] %s12457_s20 }
  0x27   :  { %s12477_s20 = sld [smem:[%s14113_s0 + %s12243_s15]]   ;;  %s12247_s15 = smov 27  }
  0x28   :  { %14241 = sst [smem:[#allocation134_spill]] %s12462_s6 }
  0x29   :  { %s12482_s14 = sld [smem:[%s14113_s0 + %s12244_s22]]   ;;  %s12248_s22 = smov 28  }
  0x2a   :  { %14242 = sst [smem:[#allocation135_spill]] %s12467_s4 }
  0x2b   :  { %s12487_s4 = sld [smem:[%s14113_s0 + %s12245_s28]]   ;;  %s12249_s28 = smov 29  }
  0x2c   :  { %s12492_s3 = sld [smem:[%s14113_s0 + %s12246_s7]]   ;;  %s12250_s7 = smov 30  }
  0x2d   :  { %14243 = sst [smem:[#allocation136_spill]] %s12477_s20 }
  0x2e   :  { %s12497_s20 = sld [smem:[%s14113_s0 + %s12247_s15]]   ;;  %s12251_s15 = smov 31  }
  0x2f   :  { %14244 = sst [smem:[#allocation137_spill]] %s12482_s14 }
  0x30   :  { %s12502_s25 = sld [smem:[%s14113_s0 + %s12248_s22]]   ;;  %s12252_s22 = smov 32  }
  0x31   :  { %14245 = sst [smem:[#allocation138_spill]] %s12487_s4 }
  0x32   :  { %14246 = sst [smem:[#allocation139_spill]] %s12492_s3 }
  0x33   :  { %s12507_s4 = sld [smem:[%s14113_s0 + %s12249_s28]]   ;;  %s12253_s28 = smov 33  }
  0x34   :  { %14247 = sst [smem:[#allocation140_spill]] %s12497_s20 }
  0x35   :  { %s12512_s17 = sld [smem:[%s14113_s0 + %s12250_s7]]   ;;  %s12254_s7 = smov 34  }
  0x36   :  { %s12517_s20 = sld [smem:[%s14113_s0 + %s12251_s15]]   ;;  %s12255_s15 = smov 35  }
  0x37   :  { %s12522_s9 = sld [smem:[%s14113_s0 + %s12252_s22]]   ;;  %s12256_s22 = smov 36  }
  0x39   :  { %14248 = sst [smem:[#allocation141_spill]] %s12507_s4 }
  0x3a   :  { %s12527_s4 = sld [smem:[%s14113_s0 + %s12253_s28]]   ;;  %s12257_s28 = smov 37  }
  0x3b   :  { %14249 = sst [smem:[#allocation142_spill]] %s12512_s17 }
  0x3c   :  { %14250 = sst [smem:[#allocation143_spill]] %s12517_s20 }
  0x3d   :  { %14251 = sst [smem:[#allocation144_spill]] %s12522_s9 }
  0x3e   :  { %s12532_s17 = sld [smem:[%s14113_s0 + %s12254_s7]]   ;;  %s12258_s7 = smov 38  }
  0x3f   :  { %s12537_s20 = sld [smem:[%s14113_s0 + %s12255_s15]]   ;;  %s12259_s15 = smov 39  }
  0x40   :  { %14252 = sst [smem:[#allocation145_spill]] %s12527_s4 }
  0x41   :  { %s12542_s9 = sld [smem:[%s14113_s0 + %s12256_s22]]   ;;  %s12260_s22 = smov 40  }
  0x42   :  { %s12547_s4 = sld [smem:[%s14113_s0 + %s12257_s28]]   ;;  %s12261_s28 = smov 41  }
  0x44   :  { %14253 = sst [smem:[#allocation146_spill]] %s12532_s17 }
  0x45   :  { %14254 = sst [smem:[#allocation147_spill]] %s12537_s20 }
  0x46   :  { %s12552_s17 = sld [smem:[%s14113_s0 + %s12258_s7]]   ;;  %s12262_s7 = smov 42  }
  0x47   :  { %14255 = sst [smem:[#allocation148_spill]] %s12542_s9 }
  0x48   :  { %14256 = sst [smem:[#allocation149_spill]] %s12547_s4 }
  0x49   :  { %s12557_s20 = sld [smem:[%s14113_s0 + %s12259_s15]]   ;;  %s12263_s15 = smov 43  }
  0x4a   :  { %s12562_s9 = sld [smem:[%s14113_s0 + %s12260_s22]]   ;;  %s12264_s22 = smov 44  }
  0x4b   :  { %s12567_s4 = sld [smem:[%s14113_s0 + %s12261_s28]]   ;;  %s12265_s28 = smov 45  }
  0x4c   :  { %14257 = sst [smem:[#allocation150_spill]] %s12552_s17 }
  0x4d   :  { %s12572_s17 = sld [smem:[%s14113_s0 + %s12262_s7]]   ;;  %s12266_s7 = smov 46  }
  0x4f   :  { %14258 = sst [smem:[#allocation151_spill]] %s12557_s20 }
  0x50   :  { %14259 = sst [smem:[#allocation152_spill]] %s12562_s9 }
  0x51   :  { %14260 = sst [smem:[#allocation153_spill]] %s12567_s4 }
  0x52   :  { %s12577_s20 = sld [smem:[%s14113_s0 + %s12263_s15]]   ;;  %s12267_s15 = smov 47  }
  0x53   :  { %14261 = sst [smem:[#allocation154_spill]] %s12572_s17 }
  0x54   :  { %s12582_s9 = sld [smem:[%s14113_s0 + %s12264_s22]]   ;;  %s12268_s22 = smov 48  }
  0x55   :  { %s12587_s4 = sld [smem:[%s14113_s0 + %s12265_s28]]   ;;  %s12269_s28 = smov 49  }
  0x56   :  { %s12592_s17 = sld [smem:[%s14113_s0 + %s12266_s7]]   ;;  %s12270_s7 = smov 50  }
  0x58   :  { %14262 = sst [smem:[#allocation155_spill]] %s12577_s20 }
  0x59   :  { %s12597_s20 = sld [smem:[%s14113_s0 + %s12267_s15]]   ;;  %s12271_s15 = smov 51  }
  0x5a   :  { %14263 = sst [smem:[#allocation156_spill]] %s12582_s9 }
  0x5b   :  { %14264 = sst [smem:[#allocation157_spill]] %s12587_s4 }
  0x5c   :  { %14265 = sst [smem:[#allocation158_spill]] %s12592_s17 }
  0x5d   :  { %s12602_s9 = sld [smem:[%s14113_s0 + %s12268_s22]]   ;;  %s12272_s22 = smov 52  }
  0x5e   :  { %s12607_s4 = sld [smem:[%s14113_s0 + %s12269_s28]]   ;;  %s12273_s28 = smov 53  }
  0x5f   :  { %14266 = sst [smem:[#allocation159_spill]] %s12597_s20 }
  0x60   :  { %s12612_s17 = sld [smem:[%s14113_s0 + %s12270_s7]]   ;;  %s12274_s7 = smov 54  }
  0x61   :  { %s12617_s20 = sld [smem:[%s14113_s0 + %s12271_s15]]   ;;  %s12275_s15 = smov 55  }
  0x63   :  { %14267 = sst [smem:[#allocation160_spill]] %s12602_s9 }
  0x64   :  { %14268 = sst [smem:[#allocation161_spill]] %s12607_s4 }
  0x65   :  { %s12622_s9 = sld [smem:[%s14113_s0 + %s12272_s22]]   ;;  %s12276_s22 = smov 56  }
  0x66   :  { %14269 = sst [smem:[#allocation162_spill]] %s12612_s17 }
  0x67   :  { %14270 = sst [smem:[#allocation163_spill]] %s12617_s20 }
  0x68   :  { %s12627_s4 = sld [smem:[%s14113_s0 + %s12273_s28]]   ;;  %s12277_s28 = smov 57  }
  0x69   :  { %s12632_s17 = sld [smem:[%s14113_s0 + %s12274_s7]]   ;;  %s12278_s7 = smov 58  }
  0x6a   :  { %s12637_s20 = sld [smem:[%s14113_s0 + %s12275_s15]]   ;;  %s12279_s15 = smov 59  }
  0x6b   :  { %14271 = sst [smem:[#allocation164_spill]] %s12622_s9 }
  0x6c   :  { %s12642_s9 = sld [smem:[%s14113_s0 + %s12276_s22]]   ;;  %s12280_s22 = smov 60  }
  0x6e   :  { %14272 = sst [smem:[#allocation165_spill]] %s12627_s4 }
  0x6f   :  { %14273 = sst [smem:[#allocation166_spill]] %s12632_s17 }
  0x70   :  { %14274 = sst [smem:[#allocation167_spill]] %s12637_s20 }
  0x71   :  { %s12647_s4 = sld [smem:[%s14113_s0 + %s12277_s28]]   ;;  %s12281_s28 = smov 61  }
  0x72   :  { %14275 = sst [smem:[#allocation168_spill]] %s12642_s9 }
  0x73   :  { %s12652_s17 = sld [smem:[%s14113_s0 + %s12278_s7]]   ;;  %s12282_s7 = smov 62  }
  0x74   :  { %s12657_s20 = sld [smem:[%s14113_s0 + %s12279_s15]]   ;;  %s12283_s15 = smov 63  }
  0x75   :  { %s12662_s9 = sld [smem:[%s14113_s0 + %s12280_s22]]   ;;  %s12284_s22 = smov 64  }
  0x77   :  { %14276 = sst [smem:[#allocation169_spill]] %s12647_s4 }
  0x78   :  { %s12667_s4 = sld [smem:[%s14113_s0 + %s12281_s28]]   ;;  %s12285_s28 = smov 65  }
  0x79   :  { %14277 = sst [smem:[#allocation170_spill]] %s12652_s17 }
  0x7a   :  { %14278 = sst [smem:[#allocation171_spill]] %s12657_s20 }
  0x7b   :  { %14279 = sst [smem:[#allocation172_spill]] %s12662_s9 }
  0x7c   :  { %s12672_s17 = sld [smem:[%s14113_s0 + %s12282_s7]]   ;;  %s12286_s7 = smov 66  }
  0x7d   :  { %s12677_s20 = sld [smem:[%s14113_s0 + %s12283_s15]]   ;;  %s12287_s15 = smov 67  }
  0x7e   :  { %14280 = sst [smem:[#allocation173_spill]] %s12667_s4 }
  0x7f   :  { %s12682_s9 = sld [smem:[%s14113_s0 + %s12284_s22]]   ;;  %s12288_s22 = smov 68  }
  0x80   :  { %s12687_s4 = sld [smem:[%s14113_s0 + %s12285_s28]]  }
  0x82   :  { %14281 = sst [smem:[#allocation174_spill]] %s12672_s17 }
  0x83   :  { %14282 = sst [smem:[#allocation175_spill]] %s12677_s20 }
  0x84   :  { %s12692_s17 = sld [smem:[%s14113_s0 + %s12286_s7]]  }
  0x85   :  { %14283 = sst [smem:[#allocation176_spill]] %s12682_s9 }
  0x86   :  { %14284 = sst [smem:[#allocation177_spill]] %s12687_s4 }
  0x87   :  { %s12697_s20 = sld [smem:[%s14113_s0 + %s12287_s15]]  }
  0x88   :  { %s12702_s9 = sld [smem:[%s14113_s0 + %s12288_s22]]  }
  0x8e   :  { %14285 = sst [smem:[#allocation178_spill]] %s12702_s9 }
  0x8f   :  { %142 = vsyncpa [#allocation3], 0 }
  0x90   :  { %143 = vsyncpa [#allocation6], 0 }
  0x91   :  { %144 = vsyncpa [#allocation9], 0 }
  0x92   :  { %145 = vsyncpa [#allocation12], 0 }
  0x93   :  { %146 = vsyncpa [#allocation15], 0 }
  0x94   :  { %147 = vsyncpa [#allocation18], 0 }
  0x95   :  { %148 = vsyncpa [#allocation21], 0 }
  0x96   :  { %149 = vsyncpa [#allocation24], 0 }
  0x97   :  { %150 = vsyncpa [#allocation27], 0 }
  0x98   :  { %151 = vsyncpa [#allocation30], 0 }
  0x99   :  { %152 = vsyncpa [#allocation33], 0 }
  0x9a   :  { %153 = vsyncpa [#allocation36], 0 }
  0x9b   :  { %154 = vsyncpa [#allocation39], 0 }
  0x9c   :  { %155 = vsyncpa [#allocation42], 0 }
  0x9d   :  { %156 = vsyncpa [#allocation45], 0 }
  0x9e   :  { %157 = vsyncpa [#allocation48], 0 }
  0x9f   :  { %158 = vsyncpa [#allocation51], 0 }
  0xa0   :  { %159 = vsyncpa [#allocation54], 0 }
  0xa1   :  { %160 = vsyncpa [#allocation57], 0 }
  0xa2   :  { %161 = vsyncpa [#allocation60], 0 }
  0xa3   :  { %162 = vsyncpa [#allocation63], 0 }
  0xa4   :  { %163 = vsyncpa [#allocation66], 0 }
  0xa5   :  { %164 = vsyncpa [#allocation69], 0 }
  0xa6   :  { %165 = vsyncpa [#allocation72], 0 }
  0xa7   :  { %166 = vsyncpa [#allocation75], 0 }
  0xa8   :  { %167 = vsyncpa [#allocation78], 0 }
  0xa9   :  { %168 = vsyncpa [#allocation81], 0 }
  0xaa   :  { %169 = vsyncpa [#allocation84], 0 }
  0xab   :  { %170 = vsyncpa [#allocation87], 0 }
  0xac   :  { %171 = vsyncpa [#allocation4], 0 }
  0xad   :  { %173 = vsyncpa [#allocation4 + $0x1], 0  ;;  %s12704_s0 = smov 0   ;;  %s12706_s28 = smov 0  }
  0xae   :  { %s12708_s1 = smov 0   ;;  %s12710_s2 = smov 0  }
  0xaf LB: > { %s14286_s9 = sld [smem:[#allocation178_spill]]  ;;  %s14287_s14 = sld [smem:[#allocation137_spill]]  ;;  %s12219_s2 = sphi %s12710_s2, %s14387_s2   ;;  %s12215_s1 = sphi %s12708_s1, %s14392_s1   ;;  %s12211_s28 = sphi %s12706_s28, %s14391_s28   ;;  %s12207_s0 = sphi %s12704_s0, %s14390_s0  }
  0xb0   : > { %s14288_s13 = sld [smem:[#allocation121_spill]]  ;;  %s14290_s8 = sld [smem:[#allocation125_spill]] }
  0xb1   : > { %s14289_s12 = sld [smem:[#allocation129_spill]]  ;;  %s14291_s6 = sld [smem:[#allocation134_spill]] }
  0xb2   : > { %s14292_s5 = sld [smem:[#allocation132_spill]]  ;;  %s14293_s3 = sld [smem:[#allocation139_spill]] }
  0xb3   : > { %14294 = sst [smem:[#allocation179_spill]] %s12207_s0  ;;  %s12725_s7 = sadd.s32 4294967295, %s12219_s2  }
  0xb4   : > { %14295 = sst [smem:[#allocation180_spill]] %s12215_s1  ;;  %s8764_s10 = sadd.s32 4294967294, %s12219_s2  }
  0xb5   : > { %14296 = sst [smem:[#allocation181_spill]] %s12219_s2  ;;  %s12729_s11 = sadd.s32 1, %s12219_s2  }
  0xb6   : > { %14297 = sst [smem:[#allocation182_spill]] %s12729_s11  ;;  %s1619_s15 = sadd.s32 1, %s12215_s1 }
  0xb7   : > { %s1616_s16 = ssub.s32 %s12219_s2, %s12729_s11  ;;  %p1629_p0 = scmp.ne.s32.totalorder %s12215_s1, %s12211_s28 }
  0xb8   : > { %p1617_p1 = scmp.eq.s32.totalorder %s1616_s16, 0  ;;  %p1630_p2 = scmp.eq.s32.totalorder %s12725_s7, 1 }
  0xb9   : > { %p1635_p3 = scmp.ne.s32.totalorder %s12211_s28, %s12207_s0  ;;  %p1636_p4 = scmp.eq.s32.totalorder %s8764_s10, 1 }
  0xba   : > { %s12740_s18 = scalar_select %p1617_p1, %s12215_s1, %s1619_s15  }
  0xbb   : > { %p12742_p5 = por %p1630_p2, %p1629_p0  ;;  %p12746_p6 = por %p1636_p4, %p1635_p3 }
  0xbc   : > { %14298 = sst [smem:[#allocation183_spill]] %s12740_s18  ;;  %p8765_p7 = scmp.ge.s32.totalorder %s12219_s2, 1 }
  0xbd   : > { %s14299_s22 = scalar_select %p12742_p5, 1, 0 }
  0xbe   : > { %s14300_s23 = scalar_select %p12746_p6, 1, 0 }
  0xbf   : > { %p1643_p8 = scmp.lt.s32.totalorder %s12219_s2, 3 }
  0xc0   : > { %14301 = sst [smem:[#allocation184_spill]] %s14300_s23 }
  0xc1   : > { %p12752_p9 = pnand %p8765_p7, %p1643_p8 }
  0xc2   : > { %p9876_p10 = scmp.eq.s32.totalorder (!%p12752_p9), %s12725_s7, 0  ;;  %s12289_s10 = smov (!%p12752_p9), [#allocation5]  }
  0xc3   : > { %1647 = sbr.rel (%p12752_p9) target bundleno = 1600 (0x640), region = 12  ;;  %s1668_s15 = sshll.u32 (!%p12752_p9), %s12289_s10, 4  ;;  %s1669_s15 = int_to_ptr.vmem [resolvable:$true] %s1668_s15 }
  0xc4   : > { %s10585_s16 = scalar_lea.hbm (!%p12752_p9), %s14288_s13, 512 }
  0xc5   : > { %p10586_p11 = scmp.ne.s32.totalorder (!%p12752_p9), %s14288_s13, %s10585_s16  ;;  %p10591_p0 = scmp.lt.u32.totalorder (!%p12752_p9), %s10585_s16, %s14288_s13 }
  0xc7   : > { %p10587_p12 = pnand (!%p12752_p9), %p10586_p11, %p9876_p10 }
  0xc9   : > { %p10588_p13 = pneg (!%p12752_p9), %p10587_p12 }
  0xcb   : > { %p10593_p1 = pnand %p10591_p0, %p10588_p13 }
  0xcd   : > { %10596 = shalt.err (!%p10593_p1)
}
  0xce   : > { %s10597_s18 = scalar_lea.vmem %s1669_s15, 512  ;;  %p10604_p7 = scmp.lt.s32.totalorder %s1669_s15, %s1669_s15 }
  0xcf   : > { %p10598_p2 = scmp.ne.s32.totalorder %s1669_s15, %s10597_s18  ;;  %p10605_p8 = scmp.lt.s32.totalorder %s10597_s18, %s10597_s18 }
  0xd1   : > { %p10599_p3 = pnand %p10598_p2, %p9876_p10  ;;  %p10606_p6 = por %p10605_p8, %p10604_p7 }
  0xd3   : > { %p10600_p4 = pneg %p10599_p3 }
  0xd5   : > { %p10607_p5 = pnand %p10606_p6, %p10600_p4 }
  0xd7   : > { %10610 = shalt.err (!%p10607_p5)
}
  0xd8   : > { %s14170_s10 = smov 128   ;;  %s14172_s16 = smov 8  }
  0xd9   : > { %9649 = dma.hbm_to_vmem [thread:$0]  (%p9876_p10), %s14288_s13, 512, %s1669_s15, [#allocation6], %s14170_s10, %s14170_s10, %s14172_s16  }
  0xda   : > { %s12292_s1 = smov [#allocation8]   ;;  %s12293_s23 = smov [#allocation11]  }
  0xdb   : > { %s1694_s11 = sshll.u32 %s12292_s1, 4  ;;  %s1720_s18 = sshll.u32 %s12293_s23, 4  ;;  %s1695_s11 = int_to_ptr.vmem [resolvable:$true] %s1694_s11  ;;  %s12772_s18 = int_to_ptr.vmem [resolvable:$true] %s1720_s18 }
  0xdc   : > { %s10611_s0 = scalar_lea.hbm %s12382_s21, 512 }
  0xdd   : > { %p10612_p5 = scmp.ne.s32.totalorder %s12382_s21, %s10611_s0  ;;  %p10617_p12 = scmp.lt.u32.totalorder %s10611_s0, %s12382_s21 }
  0xdf   : > { %p10613_p6 = pnand %p10612_p5, %p9876_p10 }
  0xe1   : > { %p10614_p11 = pneg %p10613_p6 }
  0xe3   : > { %p10619_p13 = pnand %p10617_p12, %p10614_p11 }
  0xe5   : > { %10622 = shalt.err (!%p10619_p13)
}
  0xe6   : > { %s10623_s2 = scalar_lea.vmem %s1695_s11, 512  ;;  %p10630_p3 = scmp.lt.s32.totalorder %s1695_s11, %s1695_s11 }
  0xe7   : > { %p10624_p0 = scmp.ne.s32.totalorder %s1695_s11, %s10623_s2  ;;  %p10631_p4 = scmp.lt.s32.totalorder %s10623_s2, %s10623_s2 }
  0xe9   : > { %p10625_p1 = pnand %p10624_p0, %p9876_p10  ;;  %p10632_p7 = por %p10631_p4, %p10630_p3 }
  0xeb   : > { %p10626_p2 = pneg %p10625_p1 }
  0xed   : > { %p10633_p8 = pnand %p10632_p7, %p10626_p2 }
  0xef   : > { %10636 = shalt.err (!%p10633_p8)
}
  0xf0   : > { %9653 = dma.hbm_to_vmem [thread:$0]  (%p9876_p10), %s12382_s21, 512, %s1695_s11, [#allocation9], %s14170_s10, %s14170_s10, %s14172_s16  }
  0xf1   : > { %s10637_s0 = scalar_lea.hbm %s12392_s29, 512 }
  0xf2   : > { %p10638_p5 = scmp.ne.s32.totalorder %s12392_s29, %s10637_s0  ;;  %p10643_p12 = scmp.lt.u32.totalorder %s10637_s0, %s12392_s29 }
  0xf4   : > { %p10639_p6 = pnand %p10638_p5, %p9876_p10 }
  0xf6   : > { %p10640_p11 = pneg %p10639_p6 }
  0xf8   : > { %p10645_p13 = pnand %p10643_p12, %p10640_p11 }
  0xfa   : > { %10648 = shalt.err (!%p10645_p13)
}
  0xfb   : > { %s10649_s1 = scalar_lea.vmem %s12772_s18, 512  ;;  %p10656_p3 = scmp.lt.s32.totalorder %s12772_s18, %s12772_s18 }
  0xfc   : > { %p10650_p0 = scmp.ne.s32.totalorder %s12772_s18, %s10649_s1  ;;  %p10657_p4 = scmp.lt.s32.totalorder %s10649_s1, %s10649_s1 }
  0xfe   : > { %p10651_p1 = pnand %p10650_p0, %p9876_p10  ;;  %p10658_p7 = por %p10657_p4, %p10656_p3 }
 0x100   : > { %p10652_p2 = pneg %p10651_p1 }
 0x102   : > { %p10659_p8 = pnand %p10658_p7, %p10652_p2 }
 0x104   : > { %10662 = shalt.err (!%p10659_p8)
}
 0x105   : > { %9657 = dma.hbm_to_vmem [thread:$0]  (%p9876_p10), %s12392_s29, 512, %s12772_s18, [#allocation12], %s14170_s10, %s14170_s10, %s14172_s16  }
 0x106   : > { %s12294_s2 = smov [#allocation14]   ;;  %s12295_s23 = smov [#allocation17]  }
 0x107   : > { %s1744_s11 = sshll.u32 %s12294_s2, 4  ;;  %s1770_s15 = sshll.u32 %s12295_s23, 4  ;;  %s1745_s11 = int_to_ptr.vmem [resolvable:$true] %s1744_s11  ;;  %s12805_s15 = int_to_ptr.vmem [resolvable:$true] %s1770_s15 }
 0x108   : > { %s10663_s0 = scalar_lea.hbm %s14290_s8, 128 }
 0x109   : > { %p10664_p5 = scmp.ne.s32.totalorder %s14290_s8, %s10663_s0  ;;  %p10669_p12 = scmp.lt.u32.totalorder %s10663_s0, %s14290_s8 }
 0x10b   : > { %p10665_p6 = pnand %p10664_p5, %p9876_p10 }
 0x10d   : > { %p10666_p11 = pneg %p10665_p6 }
 0x10f   : > { %p10671_p13 = pnand %p10669_p12, %p10666_p11 }
 0x111   : > { %10674 = shalt.err (!%p10671_p13)
}
 0x112   : > { %s10675_s1 = scalar_lea.vmem %s1745_s11, 128  ;;  %p10682_p3 = scmp.lt.s32.totalorder %s1745_s11, %s1745_s11 }
 0x113   : > { %p10676_p0 = scmp.ne.s32.totalorder %s1745_s11, %s10675_s1  ;;  %p10683_p4 = scmp.lt.s32.totalorder %s10675_s1, %s10675_s1 }
 0x115   : > { %p10677_p1 = pnand %p10676_p0, %p9876_p10  ;;  %p10684_p7 = por %p10683_p4, %p10682_p3 }
 0x117   : > { %p10678_p2 = pneg %p10677_p1 }
 0x119   : > { %p10685_p8 = pnand %p10684_p7, %p10678_p2 }
 0x11b   : > { %10688 = shalt.err (!%p10685_p8)
}
 0x11c   : > { %s14174_s18 = smov 64   ;;  %s14176_s2 = smov 4  }
 0x11d   : > { %9661 = dma.hbm_to_vmem [thread:$0]  (%p9876_p10), %s14290_s8, 128, %s1745_s11, [#allocation15], %s14174_s18, %s14174_s18, %s14176_s2  }
 0x11e   : > { %s10689_s23 = scalar_lea.hbm %s12412_s19, 128 }
 0x11f   : > { %p10690_p5 = scmp.ne.s32.totalorder %s12412_s19, %s10689_s23  ;;  %p10695_p12 = scmp.lt.u32.totalorder %s10689_s23, %s12412_s19 }
 0x121   : > { %p10691_p6 = pnand %p10690_p5, %p9876_p10 }
 0x123   : > { %p10692_p11 = pneg %p10691_p6 }
 0x125   : > { %p10697_p13 = pnand %p10695_p12, %p10692_p11 }
 0x127   : > { %10700 = shalt.err (!%p10697_p13)
}
 0x128   : > { %s10701_s0 = scalar_lea.vmem %s12805_s15, 128  ;;  %p10708_p3 = scmp.lt.s32.totalorder %s12805_s15, %s12805_s15 }
 0x129   : > { %p10702_p0 = scmp.ne.s32.totalorder %s12805_s15, %s10701_s0  ;;  %p10709_p4 = scmp.lt.s32.totalorder %s10701_s0, %s10701_s0 }
 0x12b   : > { %p10703_p1 = pnand %p10702_p0, %p9876_p10  ;;  %p10710_p7 = por %p10709_p4, %p10708_p3 }
 0x12d   : > { %p10704_p2 = pneg %p10703_p1 }
 0x12f   : > { %p10711_p8 = pnand %p10710_p7, %p10704_p2 }
 0x131   : > { %10714 = shalt.err (!%p10711_p8)
}
 0x132   : > { %9665 = dma.hbm_to_vmem [thread:$0]  (%p9876_p10), %s12412_s19, 128, %s12805_s15, [#allocation18], %s14174_s18, %s14174_s18, %s14176_s2  }
 0x133   : > { %s12298_s11 = smov [#allocation20]   ;;  %s12299_s23 = smov [#allocation23]  }
 0x134   : > { %s1796_s1 = sshll.u32 %s12298_s11, 4  ;;  %s1823_s10 = sshll.u32 %s12299_s23, 4  ;;  %s1797_s1 = int_to_ptr.vmem [resolvable:$true] %s1796_s1  ;;  %s12838_s10 = int_to_ptr.vmem [resolvable:$true] %s1823_s10 }
 0x135   : > { %s10715_s0 = scalar_lea.hbm %s12422_s30, 128 }
 0x136   : > { %p10716_p5 = scmp.ne.s32.totalorder %s12422_s30, %s10715_s0  ;;  %p10721_p12 = scmp.lt.u32.totalorder %s10715_s0, %s12422_s30 }
 0x138   : > { %p10717_p6 = pnand %p10716_p5, %p9876_p10 }
 0x13a   : > { %p10718_p11 = pneg %p10717_p6 }
 0x13c   : > { %p10723_p13 = pnand %p10721_p12, %p10718_p11 }
 0x13e   : > { %10726 = shalt.err (!%p10723_p13)
}
 0x13f   : > { %s10727_s16 = scalar_lea.vmem %s1797_s1, 128  ;;  %p10734_p3 = scmp.lt.s32.totalorder %s1797_s1, %s1797_s1 }
 0x140   : > { %p10728_p0 = scmp.ne.s32.totalorder %s1797_s1, %s10727_s16  ;;  %p10735_p4 = scmp.lt.s32.totalorder %s10727_s16, %s10727_s16 }
 0x142   : > { %p10729_p1 = pnand %p10728_p0, %p9876_p10  ;;  %p10736_p7 = por %p10735_p4, %p10734_p3 }
 0x144   : > { %p10730_p2 = pneg %p10729_p1 }
 0x146   : > { %p10737_p8 = pnand %p10736_p7, %p10730_p2 }
 0x148   : > { %10740 = shalt.err (!%p10737_p8)
}
 0x149   : > { %9669 = dma.hbm_to_vmem [thread:$0]  (%p9876_p10), %s12422_s30, 128, %s1797_s1, [#allocation21], %s14174_s18, %s14174_s18, %s14176_s2  }
 0x14a   : > { %s10741_s15 = scalar_lea.hbm %s14289_s12, 16 }
 0x14b   : > { %p10742_p5 = scmp.ne.s32.totalorder %s14289_s12, %s10741_s15  ;;  %p10747_p12 = scmp.lt.u32.totalorder %s10741_s15, %s14289_s12 }
 0x14d   : > { %p10743_p6 = pnand %p10742_p5, %p9876_p10 }
 0x14f   : > { %p10744_p11 = pneg %p10743_p6 }
 0x151   : > { %p10749_p13 = pnand %p10747_p12, %p10744_p11 }
 0x153   : > { %10752 = shalt.err (!%p10749_p13)
}
 0x154   : > { %s10753_s16 = scalar_lea.vmem %s12838_s10, 16  ;;  %s10759_s11 = scalar_lea.vmem %s12838_s10, 32 }
 0x155   : > { %p10754_p0 = scmp.ne.s32.totalorder %s12838_s10, %s10753_s16  ;;  %p10760_p3 = scmp.lt.s32.totalorder %s12838_s10, %s12838_s10 }
 0x156   : > { %p10761_p4 = scmp.lt.s32.totalorder %s10759_s11, %s10753_s16 }
 0x157   : > { %p10755_p1 = pnand %p10754_p0, %p9876_p10 }
 0x158   : > { %p10762_p7 = por %p10761_p4, %p10760_p3 }
 0x159   : > { %p10756_p2 = pneg %p10755_p1 }
 0x15b   : > { %p10763_p8 = pnand %p10762_p7, %p10756_p2 }
 0x15d   : > { %10766 = shalt.err (!%p10763_p8)
}
 0x15e   : > { %9673 = dma.hbm_to_vmem [thread:$0]  (%p9876_p10), %s14289_s12, 16, %s12838_s10, [#allocation24]  }
 0x15f   : > { %s12300_s1 = smov [#allocation26]   ;;  %s12301_s0 = smov [#allocation29]  }
 0x160   : > { %s1846_s23 = sshll.u32 %s12300_s1, 4  ;;  %s1872_s15 = sshll.u32 %s12301_s0, 4  ;;  %s1847_s23 = int_to_ptr.vmem [resolvable:$true] %s1846_s23  ;;  %s12869_s15 = int_to_ptr.vmem [resolvable:$true] %s1872_s15 }
 0x161   : > { %s10767_s16 = scalar_lea.hbm %s12442_s27, 1792 }
 0x162   : > { %p10768_p5 = scmp.ne.s32.totalorder %s12442_s27, %s10767_s16  ;;  %p10773_p12 = scmp.lt.u32.totalorder %s10767_s16, %s12442_s27 }
 0x164   : > { %p10769_p6 = pnand %p10768_p5, %p9876_p10 }
 0x166   : > { %p10770_p11 = pneg %p10769_p6 }
 0x168   : > { %p10775_p13 = pnand %p10773_p12, %p10770_p11 }
 0x16a   : > { %10778 = shalt.err (!%p10775_p13)
}
 0x16b   : > { %s10779_s11 = scalar_lea.vmem %s1847_s23, 1792  ;;  %p10786_p3 = scmp.lt.s32.totalorder %s1847_s23, %s1847_s23 }
 0x16c   : > { %p10780_p0 = scmp.ne.s32.totalorder %s1847_s23, %s10779_s11  ;;  %p10787_p4 = scmp.lt.s32.totalorder %s10779_s11, %s10779_s11 }
 0x16e   : > { %p10781_p1 = pnand %p10780_p0, %p9876_p10  ;;  %p10788_p7 = por %p10787_p4, %p10786_p3 }
 0x170   : > { %p10782_p2 = pneg %p10781_p1 }
 0x172   : > { %p10789_p8 = pnand %p10788_p7, %p10782_p2 }
 0x174   : > { %10792 = shalt.err (!%p10789_p8)
}
 0x175   : > { %s14303_s10 = smov 8   ;;  %s14304_s1 = smov 128  }
 0x176   : > { %9677 = dma.hbm_to_vmem [thread:$0]  (%p9876_p10), %s12442_s27, 1792, %s1847_s23, [#allocation27], %s14304_s1, %s14304_s1, %s14303_s10  }
 0x177   : > { %s10793_s0 = scalar_lea.hbm %s14292_s5, 1792 }
 0x178   : > { %p10794_p5 = scmp.ne.s32.totalorder %s14292_s5, %s10793_s0  ;;  %p10799_p12 = scmp.lt.u32.totalorder %s10793_s0, %s14292_s5 }
 0x17a   : > { %p10795_p6 = pnand %p10794_p5, %p9876_p10 }
 0x17c   : > { %p10796_p11 = pneg %p10795_p6 }
 0x17e   : > { %p10801_p13 = pnand %p10799_p12, %p10796_p11 }
 0x180   : > { %10804 = shalt.err (!%p10801_p13)
}
 0x181   : > { %s10805_s16 = scalar_lea.vmem %s12869_s15, 1792  ;;  %p10812_p3 = scmp.lt.s32.totalorder %s12869_s15, %s12869_s15 }
 0x182   : > { %p10806_p0 = scmp.ne.s32.totalorder %s12869_s15, %s10805_s16  ;;  %p10813_p4 = scmp.lt.s32.totalorder %s10805_s16, %s10805_s16 }
 0x184   : > { %p10807_p1 = pnand %p10806_p0, %p9876_p10  ;;  %p10814_p7 = por %p10813_p4, %p10812_p3 }
 0x186   : > { %p10808_p2 = pneg %p10807_p1 }
 0x188   : > { %p10815_p8 = pnand %p10814_p7, %p10808_p2 }
 0x18a   : > { %10818 = shalt.err (!%p10815_p8)
}
 0x18b   : > { %9681 = dma.hbm_to_vmem [thread:$0]  (%p9876_p10), %s14292_s5, 1792, %s12869_s15, [#allocation30], %s14304_s1, %s14304_s1, %s14303_s10  }
 0x18c   : > { %s12302_s23 = smov [#allocation32]   ;;  %s12303_s0 = smov [#allocation35]  }
 0x18d   : > { %s1898_s11 = sshll.u32 %s12302_s23, 4  ;;  %s1923_s18 = sshll.u32 %s12303_s0, 4  ;;  %s1899_s11 = int_to_ptr.vmem [resolvable:$true] %s1898_s11  ;;  %s12902_s18 = int_to_ptr.vmem [resolvable:$true] %s1923_s18 }
 0x18e   : > { %s10819_s16 = scalar_lea.hbm %s14291_s6, 1792 }
 0x18f   : > { %p10820_p5 = scmp.ne.s32.totalorder %s14291_s6, %s10819_s16  ;;  %p10825_p12 = scmp.lt.u32.totalorder %s10819_s16, %s14291_s6 }
 0x191   : > { %p10821_p6 = pnand %p10820_p5, %p9876_p10 }
 0x193   : > { %p10822_p11 = pneg %p10821_p6 }
 0x195   : > { %p10827_p13 = pnand %p10825_p12, %p10822_p11 }
 0x197   : > { %10830 = shalt.err (!%p10827_p13)
}
 0x198   : > { %s10831_s2 = scalar_lea.vmem %s1899_s11, 1792  ;;  %p10838_p3 = scmp.lt.s32.totalorder %s1899_s11, %s1899_s11 }
 0x199   : > { %p10832_p0 = scmp.ne.s32.totalorder %s1899_s11, %s10831_s2  ;;  %p10839_p4 = scmp.lt.s32.totalorder %s10831_s2, %s10831_s2 }
 0x19b   : > { %p10833_p1 = pnand %p10832_p0, %p9876_p10  ;;  %p10840_p7 = por %p10839_p4, %p10838_p3 }
 0x19d   : > { %p10834_p2 = pneg %p10833_p1 }
 0x19f   : > { %p10841_p8 = pnand %p10840_p7, %p10834_p2 }
 0x1a1   : > { %10844 = shalt.err (!%p10841_p8)
}
 0x1a2   : > { %9685 = dma.hbm_to_vmem [thread:$0]  (%p9876_p10), %s14291_s6, 1792, %s1899_s11, [#allocation33], %s14304_s1, %s14304_s1, %s14303_s10  }
 0x1a3   : > { %s10845_s15 = scalar_lea.hbm %s12472_s24, 64 }
 0x1a4   : > { %p10846_p5 = scmp.ne.s32.totalorder %s12472_s24, %s10845_s15  ;;  %p10851_p12 = scmp.lt.u32.totalorder %s10845_s15, %s12472_s24 }
 0x1a6   : > { %p10847_p6 = pnand %p10846_p5, %p9876_p10 }
 0x1a8   : > { %p10848_p11 = pneg %p10847_p6 }
 0x1aa   : > { %p10853_p13 = pnand %p10851_p12, %p10848_p11 }
 0x1ac   : > { %10856 = shalt.err (!%p10853_p13)
}
 0x1ad   : > { %s10857_s2 = scalar_lea.vmem %s12902_s18, 64  ;;  %p10864_p3 = scmp.lt.s32.totalorder %s12902_s18, %s12902_s18 }
 0x1ae   : > { %p10858_p0 = scmp.ne.s32.totalorder %s12902_s18, %s10857_s2  ;;  %p10865_p4 = scmp.lt.s32.totalorder %s10857_s2, %s10857_s2 }
 0x1b0   : > { %p10859_p1 = pnand %p10858_p0, %p9876_p10  ;;  %p10866_p7 = por %p10865_p4, %p10864_p3 }
 0x1b2   : > { %p10860_p2 = pneg %p10859_p1 }
 0x1b4   : > { %p10867_p8 = pnand %p10866_p7, %p10860_p2 }
 0x1b6   : > { %10870 = shalt.err (!%p10867_p8)
}
 0x1b7   : > { %9689 = dma.hbm_to_vmem [thread:$0]  (%p9876_p10), %s12472_s24, 64, %s12902_s18, [#allocation36]  }
 0x1b8   : > { %s12304_s23 = smov [#allocation38]   ;;  %s12305_s0 = smov [#allocation41]  }
 0x1b9   : > { %s1947_s11 = sshll.u32 %s12304_s23, 4  ;;  %s1971_s16 = sshll.u32 %s12305_s0, 4  ;;  %s1948_s11 = int_to_ptr.vmem [resolvable:$true] %s1947_s11  ;;  %s12932_s16 = int_to_ptr.vmem [resolvable:$true] %s1971_s16 }
 0x1ba   : > { %s10871_s15 = scalar_lea.hbm %s14287_s14, 64 }
 0x1bb   : > { %p10872_p5 = scmp.ne.s32.totalorder %s14287_s14, %s10871_s15  ;;  %p10877_p12 = scmp.lt.u32.totalorder %s10871_s15, %s14287_s14 }
 0x1bd   : > { %p10873_p6 = pnand %p10872_p5, %p9876_p10 }
 0x1bf   : > { %p10874_p11 = pneg %p10873_p6 }
 0x1c1   : > { %p10879_p13 = pnand %p10877_p12, %p10874_p11 }
 0x1c3   : > { %10882 = shalt.err (!%p10879_p13)
}
 0x1c4   : > { %s10883_s2 = scalar_lea.vmem %s1948_s11, 64  ;;  %p10890_p3 = scmp.lt.s32.totalorder %s1948_s11, %s1948_s11 }
 0x1c5   : > { %p10884_p0 = scmp.ne.s32.totalorder %s1948_s11, %s10883_s2  ;;  %p10891_p4 = scmp.lt.s32.totalorder %s10883_s2, %s10883_s2 }
 0x1c7   : > { %p10885_p1 = pnand %p10884_p0, %p9876_p10  ;;  %p10892_p7 = por %p10891_p4, %p10890_p3 }
 0x1c9   : > { %p10886_p2 = pneg %p10885_p1 }
 0x1cb   : > { %p10893_p8 = pnand %p10892_p7, %p10886_p2 }
 0x1cd   : > { %10896 = shalt.err (!%p10893_p8)
}
 0x1ce   : > { %9693 = dma.hbm_to_vmem [thread:$0]  (%p9876_p10), %s14287_s14, 64, %s1948_s11, [#allocation39]  }
 0x1cf   : > { %s10897_s18 = scalar_lea.hbm %s14293_s3, 64 }
 0x1d0   : > { %p10898_p5 = scmp.ne.s32.totalorder %s14293_s3, %s10897_s18  ;;  %p10903_p12 = scmp.lt.u32.totalorder %s10897_s18, %s14293_s3 }
 0x1d2   : > { %p10899_p6 = pnand %p10898_p5, %p9876_p10 }
 0x1d4   : > { %p10900_p11 = pneg %p10899_p6 }
 0x1d6   : > { %p10905_p13 = pnand %p10903_p12, %p10900_p11 }
 0x1d8   : > { %10908 = shalt.err (!%p10905_p13)
}
 0x1d9   : > { %s10909_s23 = scalar_lea.vmem %s12932_s16, 64  ;;  %p10916_p3 = scmp.lt.s32.totalorder %s12932_s16, %s12932_s16 }
 0x1da   : > { %p10910_p0 = scmp.ne.s32.totalorder %s12932_s16, %s10909_s23  ;;  %p10917_p4 = scmp.lt.s32.totalorder %s10909_s23, %s10909_s23 }
 0x1dc   : > { %p10911_p1 = pnand %p10910_p0, %p9876_p10  ;;  %p10918_p7 = por %p10917_p4, %p10916_p3 }
 0x1de   : > { %p10912_p2 = pneg %p10911_p1 }
 0x1e0   : > { %p10919_p8 = pnand %p10918_p7, %p10912_p2 }
 0x1e2   : > { %10922 = shalt.err (!%p10919_p8)
}
 0x1e3   : > { %9697 = dma.hbm_to_vmem [thread:$0]  (%p9876_p10), %s14293_s3, 64, %s12932_s16, [#allocation42]  }
 0x1e4   : > { %s12306_s11 = smov [#allocation44]   ;;  %s12307_s15 = smov [#allocation47]  }
 0x1e5   : > { %s1995_s0 = sshll.u32 %s12306_s11, 4  ;;  %s2016_s2 = sshll.u32 %s12307_s15, 4  ;;  %s1996_s0 = int_to_ptr.vmem [resolvable:$true] %s1995_s0  ;;  %s12959_s2 = int_to_ptr.vmem [resolvable:$true] %s2016_s2 }
 0x1e6   : > { %s10923_s18 = scalar_lea.hbm %s12502_s25, 16 }
 0x1e7   : > { %p10924_p5 = scmp.ne.s32.totalorder %s12502_s25, %s10923_s18  ;;  %p10929_p12 = scmp.lt.u32.totalorder %s10923_s18, %s12502_s25 }
 0x1e9   : > { %p10925_p6 = pnand %p10924_p5, %p9876_p10 }
 0x1eb   : > { %p10926_p11 = pneg %p10925_p6 }
 0x1ed   : > { %p10931_p13 = pnand %p10929_p12, %p10926_p11 }
 0x1ef   : > { %10934 = shalt.err (!%p10931_p13)
}
 0x1f0   : > { %s10935_s23 = scalar_lea.vmem %s1996_s0, 16  ;;  %s10941_s16 = scalar_lea.vmem %s1996_s0, 32 }
 0x1f1   : > { %p10936_p0 = scmp.ne.s32.totalorder %s1996_s0, %s10935_s23  ;;  %p10942_p3 = scmp.lt.s32.totalorder %s1996_s0, %s1996_s0 }
 0x1f2   : > { %p10943_p4 = scmp.lt.s32.totalorder %s10941_s16, %s10935_s23 }
 0x1f3   : > { %p10937_p1 = pnand %p10936_p0, %p9876_p10 }
 0x1f4   : > { %p10944_p7 = por %p10943_p4, %p10942_p3 }
 0x1f5   : > { %p10938_p2 = pneg %p10937_p1 }
 0x1f7   : > { %p10945_p8 = pnand %p10944_p7, %p10938_p2 }
 0x1f9   : > { %10948 = shalt.err (!%p10945_p8)
}
 0x1fa   : > { %s14305_s11 = sld [smem:[#allocation142_spill]] }
 0x1fb   : > { %9701 = dma.hbm_to_vmem [thread:$0]  (%p9876_p10), %s12502_s25, 16, %s1996_s0, [#allocation45]  }
 0x200   : > { %s10949_s15 = scalar_lea.hbm %s14305_s11, 1792 }
 0x201   : > { %p10950_p5 = scmp.ne.s32.totalorder %s14305_s11, %s10949_s15  ;;  %p10955_p12 = scmp.lt.u32.totalorder %s10949_s15, %s14305_s11 }
 0x203   : > { %p10951_p6 = pnand %p10950_p5, %p9876_p10 }
 0x205   : > { %p10952_p11 = pneg %p10951_p6 }
 0x207   : > { %p10957_p13 = pnand %p10955_p12, %p10952_p11 }
 0x209   : > { %10960 = shalt.err (!%p10957_p13)
}
 0x20a   : > { %s10961_s18 = scalar_lea.vmem %s12959_s2, 1792  ;;  %p10968_p3 = scmp.lt.s32.totalorder %s12959_s2, %s12959_s2 }
 0x20b   : > { %p10962_p0 = scmp.ne.s32.totalorder %s12959_s2, %s10961_s18  ;;  %p10969_p4 = scmp.lt.s32.totalorder %s10961_s18, %s10961_s18 }
 0x20d   : > { %p10963_p1 = pnand %p10962_p0, %p9876_p10  ;;  %p10970_p7 = por %p10969_p4, %p10968_p3 }
 0x20f   : > { %p10964_p2 = pneg %p10963_p1 }
 0x211   : > { %p10971_p8 = pnand %p10970_p7, %p10964_p2 }
 0x213   : > { %10974 = shalt.err (!%p10971_p8)
}
 0x214   : > { %s14306_s0 = sld [smem:[#allocation144_spill]]  ;;  %s12308_s16 = smov [#allocation50]  }
 0x215   : > { %9705 = dma.hbm_to_vmem [thread:$0]  (%p9876_p10), %s14305_s11, 1792, %s12959_s2, [#allocation48], %s14304_s1, %s14304_s1, %s14303_s10  }
 0x216   : > { %s2040_s15 = sshll.u32 %s12308_s16, 4  ;;  %s12309_s3 = smov [#allocation53]   ;;  %s2041_s15 = int_to_ptr.vmem [resolvable:$true] %s2040_s15 }
 0x217   : > { %s2064_s5 = sshll.u32 %s12309_s3, 4  ;;  %s12989_s5 = int_to_ptr.vmem [resolvable:$true] %s2064_s5 }
 0x21a   : > { %s14307_s23 = smov %s14306_s0  ;;  %s10975_s18 = scalar_lea.hbm %s14306_s0, 1792 }
 0x21b   : > { %p10976_p5 = scmp.ne.s32.totalorder %s14307_s23, %s10975_s18  ;;  %p10981_p12 = scmp.lt.u32.totalorder %s10975_s18, %s14307_s23 }
 0x21d   : > { %p10977_p6 = pnand %p10976_p5, %p9876_p10 }
 0x21f   : > { %p10978_p11 = pneg %p10977_p6 }
 0x221   : > { %p10983_p13 = pnand %p10981_p12, %p10978_p11 }
 0x223   : > { %10986 = shalt.err (!%p10983_p13)
}
 0x224   : > { %s10987_s6 = scalar_lea.vmem %s2041_s15, 1792  ;;  %p10994_p3 = scmp.lt.s32.totalorder %s2041_s15, %s2041_s15 }
 0x225   : > { %p10988_p0 = scmp.ne.s32.totalorder %s2041_s15, %s10987_s6  ;;  %p10995_p4 = scmp.lt.s32.totalorder %s10987_s6, %s10987_s6 }
 0x227   : > { %p10989_p1 = pnand %p10988_p0, %p9876_p10  ;;  %p10996_p7 = por %p10995_p4, %p10994_p3 }
 0x229   : > { %p10990_p2 = pneg %p10989_p1 }
 0x22b   : > { %p10997_p8 = pnand %p10996_p7, %p10990_p2 }
 0x22d   : > { %11000 = shalt.err (!%p10997_p8)
}
 0x22e   : > { %s14308_s3 = sld [smem:[#allocation146_spill]] }
 0x22f   : > { %9709 = dma.hbm_to_vmem [thread:$0]  (%p9876_p10), %s14307_s23, 1792, %s2041_s15, [#allocation51], %s14304_s1, %s14304_s1, %s14303_s10  }
 0x234   : > { %s11001_s2 = scalar_lea.hbm %s14308_s3, 1792 }
 0x235   : > { %p11002_p5 = scmp.ne.s32.totalorder %s14308_s3, %s11001_s2  ;;  %p11007_p12 = scmp.lt.u32.totalorder %s11001_s2, %s14308_s3 }
 0x237   : > { %p11003_p6 = pnand %p11002_p5, %p9876_p10 }
 0x239   : > { %p11004_p11 = pneg %p11003_p6 }
 0x23b   : > { %p11009_p13 = pnand %p11007_p12, %p11004_p11 }
 0x23d   : > { %11012 = shalt.err (!%p11009_p13)
}
 0x23e   : > { %s11013_s6 = scalar_lea.vmem %s12989_s5, 1792  ;;  %p11020_p3 = scmp.lt.s32.totalorder %s12989_s5, %s12989_s5 }
 0x23f   : > { %p11014_p0 = scmp.ne.s32.totalorder %s12989_s5, %s11013_s6  ;;  %p11021_p4 = scmp.lt.s32.totalorder %s11013_s6, %s11013_s6 }
 0x241   : > { %p11015_p1 = pnand %p11014_p0, %p9876_p10  ;;  %p11022_p7 = por %p11021_p4, %p11020_p3 }
 0x243   : > { %p11016_p2 = pneg %p11015_p1 }
 0x245   : > { %p11023_p8 = pnand %p11022_p7, %p11016_p2 }
 0x247   : > { %11026 = shalt.err (!%p11023_p8)
}
 0x248   : > { %s14309_s0 = sld [smem:[#allocation149_spill]]  ;;  %s12310_s15 = smov [#allocation56]  }
 0x249   : > { %9713 = dma.hbm_to_vmem [thread:$0]  (%p9876_p10), %s14308_s3, 1792, %s12989_s5, [#allocation54], %s14304_s1, %s14304_s1, %s14303_s10  }
 0x24a   : > { %s2091_s18 = sshll.u32 %s12310_s15, 4  ;;  %s12311_s2 = smov [#allocation59]   ;;  %s2092_s18 = int_to_ptr.vmem [resolvable:$true] %s2091_s18 }
 0x24b   : > { %s2115_s8 = sshll.u32 %s12311_s2, 4  ;;  %s13022_s8 = int_to_ptr.vmem [resolvable:$true] %s2115_s8 }
 0x24e   : > { %s14310_s16 = smov %s14309_s0  ;;  %s11027_s6 = scalar_lea.hbm %s14309_s0, 1792 }
 0x24f   : > { %p11028_p5 = scmp.ne.s32.totalorder %s14310_s16, %s11027_s6  ;;  %p11033_p12 = scmp.lt.u32.totalorder %s11027_s6, %s14310_s16 }
 0x251   : > { %p11029_p6 = pnand %p11028_p5, %p9876_p10 }
 0x253   : > { %p11030_p11 = pneg %p11029_p6 }
 0x255   : > { %p11035_p13 = pnand %p11033_p12, %p11030_p11 }
 0x257   : > { %11038 = shalt.err (!%p11035_p13)
}
 0x258   : > { %s11039_s11 = scalar_lea.vmem %s2092_s18, 1792  ;;  %p11046_p3 = scmp.lt.s32.totalorder %s2092_s18, %s2092_s18 }
 0x259   : > { %p11040_p0 = scmp.ne.s32.totalorder %s2092_s18, %s11039_s11  ;;  %p11047_p4 = scmp.lt.s32.totalorder %s11039_s11, %s11039_s11 }
 0x25b   : > { %p11041_p1 = pnand %p11040_p0, %p9876_p10  ;;  %p11048_p7 = por %p11047_p4, %p11046_p3 }
 0x25d   : > { %p11042_p2 = pneg %p11041_p1 }
 0x25f   : > { %p11049_p8 = pnand %p11048_p7, %p11042_p2 }
 0x261   : > { %11052 = shalt.err (!%p11049_p8)
}
 0x262   : > { %s14311_s5 = smov 4   ;;  %s14312_s10 = smov 64  }
 0x263   : > { %s14313_s1 = sld [smem:[#allocation151_spill]] }
 0x264   : > { %9717 = dma.hbm_to_vmem [thread:$0]  (%p9876_p10), %s14310_s16, 1792, %s2092_s18, [#allocation57], %s14312_s10, %s14312_s10, %s14311_s5  }
 0x269   : > { %s14314_s15 = smov %s14313_s1  ;;  %s11053_s0 = scalar_lea.hbm %s14313_s1, 1792 }
 0x26a   : > { %p11054_p5 = scmp.ne.s32.totalorder %s14314_s15, %s11053_s0  ;;  %p11059_p12 = scmp.lt.u32.totalorder %s11053_s0, %s14314_s15 }
 0x26c   : > { %p11055_p6 = pnand %p11054_p5, %p9876_p10 }
 0x26e   : > { %p11056_p11 = pneg %p11055_p6 }
 0x270   : > { %p11061_p13 = pnand %p11059_p12, %p11056_p11 }
 0x272   : > { %11064 = shalt.err (!%p11061_p13)
}
 0x273   : > { %s11065_s11 = scalar_lea.vmem %s13022_s8, 1792  ;;  %p11072_p3 = scmp.lt.s32.totalorder %s13022_s8, %s13022_s8 }
 0x274   : > { %p11066_p0 = scmp.ne.s32.totalorder %s13022_s8, %s11065_s11  ;;  %p11073_p4 = scmp.lt.s32.totalorder %s11065_s11, %s11065_s11 }
 0x276   : > { %p11067_p1 = pnand %p11066_p0, %p9876_p10  ;;  %p11074_p7 = por %p11073_p4, %p11072_p3 }
 0x278   : > { %p11068_p2 = pneg %p11067_p1 }
 0x27a   : > { %p11075_p8 = pnand %p11074_p7, %p11068_p2 }
 0x27c   : > { %11078 = shalt.err (!%p11075_p8)
}
 0x27d   : > { %s14315_s18 = sld [smem:[#allocation153_spill]]  ;;  %s12312_s2 = smov [#allocation62]  }
 0x27e   : > { %9721 = dma.hbm_to_vmem [thread:$0]  (%p9876_p10), %s14314_s15, 1792, %s13022_s8, [#allocation60], %s14312_s10, %s14312_s10, %s14311_s5  }
 0x27f   : > { %s2139_s6 = sshll.u32 %s12312_s2, 4  ;;  %s12313_s1 = smov [#allocation65]   ;;  %s2140_s6 = int_to_ptr.vmem [resolvable:$true] %s2139_s6 }
 0x280   : > { %s2164_s0 = sshll.u32 %s12313_s1, 4  ;;  %s13055_s0 = int_to_ptr.vmem [resolvable:$true] %s2164_s0 }
 0x283   : > { %s11079_s11 = scalar_lea.hbm %s14315_s18, 1792 }
 0x284   : > { %p11080_p5 = scmp.ne.s32.totalorder %s14315_s18, %s11079_s11  ;;  %p11085_p12 = scmp.lt.u32.totalorder %s11079_s11, %s14315_s18 }
 0x286   : > { %p11081_p6 = pnand %p11080_p5, %p9876_p10 }
 0x288   : > { %p11082_p11 = pneg %p11081_p6 }
 0x28a   : > { %p11087_p13 = pnand %p11085_p12, %p11082_p11 }
 0x28c   : > { %11090 = shalt.err (!%p11087_p13)
}
 0x28d   : > { %s11091_s3 = scalar_lea.vmem %s2140_s6, 1792  ;;  %p11098_p3 = scmp.lt.s32.totalorder %s2140_s6, %s2140_s6 }
 0x28e   : > { %p11092_p0 = scmp.ne.s32.totalorder %s2140_s6, %s11091_s3  ;;  %p11099_p4 = scmp.lt.s32.totalorder %s11091_s3, %s11091_s3 }
 0x290   : > { %p11093_p1 = pnand %p11092_p0, %p9876_p10  ;;  %p11100_p7 = por %p11099_p4, %p11098_p3 }
 0x292   : > { %p11094_p2 = pneg %p11093_p1 }
 0x294   : > { %p11101_p8 = pnand %p11100_p7, %p11094_p2 }
 0x296   : > { %11104 = shalt.err (!%p11101_p8)
}
 0x297   : > { %s14316_s8 = sld [smem:[#allocation155_spill]] }
 0x298   : > { %9725 = dma.hbm_to_vmem [thread:$0]  (%p9876_p10), %s14315_s18, 1792, %s2140_s6, [#allocation63], %s14312_s10, %s14312_s10, %s14311_s5  }
 0x29d   : > { %s11105_s2 = scalar_lea.hbm %s14316_s8, 32 }
 0x29e   : > { %p11106_p5 = scmp.ne.s32.totalorder %s14316_s8, %s11105_s2  ;;  %p11111_p12 = scmp.lt.u32.totalorder %s11105_s2, %s14316_s8 }
 0x2a0   : > { %p11107_p6 = pnand %p11106_p5, %p9876_p10 }
 0x2a2   : > { %p11108_p11 = pneg %p11107_p6 }
 0x2a4   : > { %p11113_p13 = pnand %p11111_p12, %p11108_p11 }
 0x2a6   : > { %11116 = shalt.err (!%p11113_p13)
}
 0x2a7   : > { %s11117_s3 = scalar_lea.vmem %s13055_s0, 32  ;;  %p11124_p3 = scmp.lt.s32.totalorder %s13055_s0, %s13055_s0 }
 0x2a8   : > { %p11118_p0 = scmp.ne.s32.totalorder %s13055_s0, %s11117_s3  ;;  %p11125_p4 = scmp.lt.s32.totalorder %s11117_s3, %s11117_s3 }
 0x2aa   : > { %p11119_p1 = pnand %p11118_p0, %p9876_p10  ;;  %p11126_p7 = por %p11125_p4, %p11124_p3 }
 0x2ac   : > { %p11120_p2 = pneg %p11119_p1 }
 0x2ae   : > { %p11127_p8 = pnand %p11126_p7, %p11120_p2 }
 0x2b0   : > { %11130 = shalt.err (!%p11127_p8)
}
 0x2b1   : > { %s14317_s6 = sld [smem:[#allocation159_spill]]  ;;  %s12314_s1 = smov [#allocation68]  }
 0x2b2   : > { %9729 = dma.hbm_to_vmem [thread:$0]  (%p9876_p10), %s14316_s8, 32, %s13055_s0, [#allocation66]  }
 0x2b3   : > { %s2192_s11 = sshll.u32 %s12314_s1, 4  ;;  %s12315_s2 = smov [#allocation71]   ;;  %s2193_s11 = int_to_ptr.vmem [resolvable:$true] %s2192_s11 }
 0x2b4   : > { %s2217_s12 = sshll.u32 %s12315_s2, 4  ;;  %s13085_s12 = int_to_ptr.vmem [resolvable:$true] %s2217_s12 }
 0x2b7   : > { %s11131_s3 = scalar_lea.hbm %s14317_s6, 32 }
 0x2b8   : > { %p11132_p5 = scmp.ne.s32.totalorder %s14317_s6, %s11131_s3  ;;  %p11137_p12 = scmp.lt.u32.totalorder %s11131_s3, %s14317_s6 }
 0x2ba   : > { %p11133_p6 = pnand %p11132_p5, %p9876_p10 }
 0x2bc   : > { %p11134_p11 = pneg %p11133_p6 }
 0x2be   : > { %p11139_p13 = pnand %p11137_p12, %p11134_p11 }
 0x2c0   : > { %11142 = shalt.err (!%p11139_p13)
}
 0x2c1   : > { %s11143_s13 = scalar_lea.vmem %s2193_s11, 32  ;;  %p11150_p3 = scmp.lt.s32.totalorder %s2193_s11, %s2193_s11 }
 0x2c2   : > { %p11144_p0 = scmp.ne.s32.totalorder %s2193_s11, %s11143_s13  ;;  %p11151_p4 = scmp.lt.s32.totalorder %s11143_s13, %s11143_s13 }
 0x2c4   : > { %p11145_p1 = pnand %p11144_p0, %p9876_p10  ;;  %p11152_p7 = por %p11151_p4, %p11150_p3 }
 0x2c6   : > { %p11146_p2 = pneg %p11145_p1 }
 0x2c8   : > { %p11153_p8 = pnand %p11152_p7, %p11146_p2 }
 0x2ca   : > { %11156 = shalt.err (!%p11153_p8)
}
 0x2cb   : > { %s14318_s0 = sld [smem:[#allocation162_spill]] }
 0x2cc   : > { %9733 = dma.hbm_to_vmem [thread:$0]  (%p9876_p10), %s14317_s6, 32, %s2193_s11, [#allocation69]  }
 0x2d1   : > { %s14319_s8 = smov %s14318_s0  ;;  %s11157_s1 = scalar_lea.hbm %s14318_s0, 16 }
 0x2d2   : > { %p11158_p5 = scmp.ne.s32.totalorder %s14319_s8, %s11157_s1  ;;  %p11163_p12 = scmp.lt.u32.totalorder %s11157_s1, %s14319_s8 }
 0x2d4   : > { %p11159_p6 = pnand %p11158_p5, %p9876_p10 }
 0x2d6   : > { %p11160_p11 = pneg %p11159_p6 }
 0x2d8   : > { %p11165_p13 = pnand %p11163_p12, %p11160_p11 }
 0x2da   : > { %11168 = shalt.err (!%p11165_p13)
}
 0x2db   : > { %s11169_s13 = scalar_lea.vmem %s13085_s12, 16  ;;  %s11175_s2 = scalar_lea.vmem %s13085_s12, 32 }
 0x2dc   : > { %p11170_p0 = scmp.ne.s32.totalorder %s13085_s12, %s11169_s13  ;;  %p11176_p3 = scmp.lt.s32.totalorder %s13085_s12, %s13085_s12 }
 0x2dd   : > { %p11177_p4 = scmp.lt.s32.totalorder %s11175_s2, %s11169_s13 }
 0x2de   : > { %p11171_p1 = pnand %p11170_p0, %p9876_p10 }
 0x2df   : > { %p11178_p7 = por %p11177_p4, %p11176_p3 }
 0x2e0   : > { %p11172_p2 = pneg %p11171_p1 }
 0x2e2   : > { %p11179_p8 = pnand %p11178_p7, %p11172_p2 }
 0x2e4   : > { %11182 = shalt.err (!%p11179_p8)
}
 0x2e5   : > { %s14320_s11 = sld [smem:[#allocation165_spill]]  ;;  %s12316_s3 = smov [#allocation74]  }
 0x2e6   : > { %9737 = dma.hbm_to_vmem [thread:$0]  (%p9876_p10), %s14319_s8, 16, %s13085_s12, [#allocation72]  }
 0x2e7   : > { %s2241_s0 = sshll.u32 %s12316_s3, 4  ;;  %s12317_s1 = smov [#allocation77]   ;;  %s2242_s0 = int_to_ptr.vmem [resolvable:$true] %s2241_s0 }
 0x2e8   : > { %s2265_s6 = sshll.u32 %s12317_s1, 4  ;;  %s13113_s6 = int_to_ptr.vmem [resolvable:$true] %s2265_s6 }
 0x2eb   : > { %s11183_s13 = scalar_lea.hbm %s14320_s11, 2048 }
 0x2ec   : > { %p11184_p5 = scmp.ne.s32.totalorder %s14320_s11, %s11183_s13  ;;  %p11189_p12 = scmp.lt.u32.totalorder %s11183_s13, %s14320_s11 }
 0x2ee   : > { %p11185_p6 = pnand %p11184_p5, %p9876_p10 }
 0x2f0   : > { %p11186_p11 = pneg %p11185_p6 }
 0x2f2   : > { %p11191_p13 = pnand %p11189_p12, %p11186_p11 }
 0x2f4   : > { %11194 = shalt.err (!%p11191_p13)
}
 0x2f5   : > { %s11195_s2 = scalar_lea.vmem %s2242_s0, 2048  ;;  %p11202_p3 = scmp.lt.s32.totalorder %s2242_s0, %s2242_s0 }
 0x2f6   : > { %p11196_p0 = scmp.ne.s32.totalorder %s2242_s0, %s11195_s2  ;;  %p11203_p4 = scmp.lt.s32.totalorder %s11195_s2, %s11195_s2 }
 0x2f8   : > { %p11197_p1 = pnand %p11196_p0, %p9876_p10  ;;  %p11204_p7 = por %p11203_p4, %p11202_p3 }
 0x2fa   : > { %p11198_p2 = pneg %p11197_p1 }
 0x2fc   : > { %p11205_p8 = pnand %p11204_p7, %p11198_p2 }
 0x2fe   : > { %11208 = shalt.err (!%p11205_p8)
}
 0x2ff   : > { %s14321_s12 = sld [smem:[#allocation167_spill]] }
 0x300   : > { %9741 = dma.hbm_to_vmem [thread:$0]  (%p9876_p10), %s14320_s11, 2048, %s2242_s0, [#allocation75], %s14312_s10, %s14312_s10, %s14311_s5  }
 0x305   : > { %s11209_s3 = scalar_lea.hbm %s14321_s12, 2048 }
 0x306   : > { %p11210_p5 = scmp.ne.s32.totalorder %s14321_s12, %s11209_s3  ;;  %p11215_p12 = scmp.lt.u32.totalorder %s11209_s3, %s14321_s12 }
 0x308   : > { %p11211_p6 = pnand %p11210_p5, %p9876_p10 }
 0x30a   : > { %p11212_p11 = pneg %p11211_p6 }
 0x30c   : > { %p11217_p13 = pnand %p11215_p12, %p11212_p11 }
 0x30e   : > { %11220 = shalt.err (!%p11217_p13)
}
 0x30f   : > { %s11221_s1 = scalar_lea.vmem %s13113_s6, 2048  ;;  %p11228_p3 = scmp.lt.s32.totalorder %s13113_s6, %s13113_s6 }
 0x310   : > { %p11222_p0 = scmp.ne.s32.totalorder %s13113_s6, %s11221_s1  ;;  %p11229_p4 = scmp.lt.s32.totalorder %s11221_s1, %s11221_s1 }
 0x312   : > { %p11223_p1 = pnand %p11222_p0, %p9876_p10  ;;  %p11230_p7 = por %p11229_p4, %p11228_p3 }
 0x314   : > { %p11224_p2 = pneg %p11223_p1 }
 0x316   : > { %p11231_p8 = pnand %p11230_p7, %p11224_p2 }
 0x318   : > { %11234 = shalt.err (!%p11231_p8)
}
 0x319   : > { %s14322_s0 = sld [smem:[#allocation169_spill]]  ;;  %s12318_s2 = smov [#allocation80]  }
 0x31a   : > { %9745 = dma.hbm_to_vmem [thread:$0]  (%p9876_p10), %s14321_s12, 2048, %s13113_s6, [#allocation78], %s14312_s10, %s14312_s10, %s14311_s5  }
 0x31b   : > { %s2290_s3 = sshll.u32 %s12318_s2, 4  ;;  %s12319_s8 = smov [#allocation83]   ;;  %s2291_s3 = int_to_ptr.vmem [resolvable:$true] %s2290_s3 }
 0x31c   : > { %s2314_s11 = sshll.u32 %s12319_s8, 4  ;;  %s13146_s11 = int_to_ptr.vmem [resolvable:$true] %s2314_s11 }
 0x31f   : > { %s14323_s13 = smov %s14322_s0  ;;  %s11235_s1 = scalar_lea.hbm %s14322_s0, 16 }
 0x320   : > { %p11236_p5 = scmp.ne.s32.totalorder %s14323_s13, %s11235_s1  ;;  %p11241_p12 = scmp.lt.u32.totalorder %s11235_s1, %s14323_s13 }
 0x322   : > { %p11237_p6 = pnand %p11236_p5, %p9876_p10 }
 0x324   : > { %p11238_p11 = pneg %p11237_p6 }
 0x326   : > { %p11243_p13 = pnand %p11241_p12, %p11238_p11 }
 0x328   : > { %11246 = shalt.err (!%p11243_p13)
}
 0x329   : > { %s11247_s14 = scalar_lea.vmem %s2291_s3, 16  ;;  %s11253_s6 = scalar_lea.vmem %s2291_s3, 32 }
 0x32a   : > { %p11248_p0 = scmp.ne.s32.totalorder %s2291_s3, %s11247_s14  ;;  %p11254_p3 = scmp.lt.s32.totalorder %s2291_s3, %s2291_s3 }
 0x32b   : > { %p11255_p4 = scmp.lt.s32.totalorder %s11253_s6, %s11247_s14 }
 0x32c   : > { %p11249_p1 = pnand %p11248_p0, %p9876_p10 }
 0x32d   : > { %p11256_p7 = por %p11255_p4, %p11254_p3 }
 0x32e   : > { %p11250_p2 = pneg %p11249_p1 }
 0x330   : > { %p11257_p8 = pnand %p11256_p7, %p11250_p2 }
 0x332   : > { %11260 = shalt.err (!%p11257_p8)
}
 0x333   : > { %s14324_s8 = sld [smem:[#allocation172_spill]] }
 0x334   : > { %9749 = dma.hbm_to_vmem [thread:$0]  (%p9876_p10), %s14323_s13, 16, %s2291_s3, [#allocation81]  }
 0x339   : > { %s11261_s0 = scalar_lea.hbm %s14324_s8, 1024 }
 0x33a   : > { %p11262_p5 = scmp.ne.s32.totalorder %s14324_s8, %s11261_s0  ;;  %p11267_p12 = scmp.lt.u32.totalorder %s11261_s0, %s14324_s8 }
 0x33c   : > { %p11263_p6 = pnand %p11262_p5, %p9876_p10 }
 0x33e   : > { %p11264_p11 = pneg %p11263_p6 }
 0x340   : > { %p11269_p13 = pnand %p11267_p12, %p11264_p11 }
 0x342   : > { %11272 = shalt.err (!%p11269_p13)
}
 0x343   : > { %s11273_s14 = scalar_lea.vmem %s13146_s11, 1024  ;;  %p11280_p3 = scmp.lt.s32.totalorder %s13146_s11, %s13146_s11 }
 0x344   : > { %p11274_p0 = scmp.ne.s32.totalorder %s13146_s11, %s11273_s14  ;;  %p11281_p4 = scmp.lt.s32.totalorder %s11273_s14, %s11273_s14 }
 0x346   : > { %p11275_p1 = pnand %p11274_p0, %p9876_p10  ;;  %p11282_p7 = por %p11281_p4, %p11280_p3 }
 0x348   : > { %p11276_p2 = pneg %p11275_p1 }
 0x34a   : > { %p11283_p8 = pnand %p11282_p7, %p11276_p2 }
 0x34c   : > { %11286 = shalt.err (!%p11283_p8)
}
 0x34d   : > { %s14325_s2 = sld [smem:[#allocation120_spill]]  ;;  %s12320_s1 = smov [#allocation2]  }
 0x34e   : > { %9753 = dma.hbm_to_vmem [thread:$0]  (%p9876_p10), %s14324_s8, 1024, %s13146_s11, [#allocation84], %s14312_s10, %s14312_s10, %s14311_s5  }
 0x34f   : > { %s1655_s6 = sshll.u32 %s12320_s1, 4  ;;  %s12321_s0 = smov [#allocation7]   ;;  %s1656_s6 = int_to_ptr.vmem [resolvable:$true] %s1655_s6 }
 0x350   : > { %s1681_s14 = sshll.u32 %s12321_s0, 4  ;;  %s1682_s14 = int_to_ptr.vmem [resolvable:$true] %s1681_s14 }
 0x353   : > { %s14326_s3 = smov %s14325_s2  ;;  %s11287_s12 = scalar_lea.hbm %s14325_s2, 256 }
 0x354   : > { %p11288_p5 = scmp.ne.s32.totalorder %s14326_s3, %s11287_s12  ;;  %p11293_p12 = scmp.lt.u32.totalorder %s11287_s12, %s14326_s3 }
 0x356   : > { %p11289_p6 = pnand %p11288_p5, %p9876_p10 }
 0x358   : > { %p11290_p11 = pneg %p11289_p6 }
 0x35a   : > { %p11295_p13 = pnand %p11293_p12, %p11290_p11 }
 0x35c   : > { %11298 = shalt.err (!%p11295_p13)
}
 0x35d   : > { %s11299_s13 = scalar_lea.vmem %s1656_s6, 256  ;;  %p11306_p3 = scmp.lt.s32.totalorder %s1656_s6, %s1656_s6 }
 0x35e   : > { %p11300_p0 = scmp.ne.s32.totalorder %s1656_s6, %s11299_s13  ;;  %p11307_p4 = scmp.lt.s32.totalorder %s11299_s13, %s11299_s13 }
 0x360   : > { %p11301_p1 = pnand %p11300_p0, %p9876_p10  ;;  %p11308_p7 = por %p11307_p4, %p11306_p3 }
 0x362   : > { %p11302_p2 = pneg %p11301_p1 }
 0x364   : > { %p11309_p8 = pnand %p11308_p7, %p11302_p2 }
 0x366   : > { %11312 = shalt.err (!%p11309_p8)
}
 0x367   : > { %s14327_s11 = sld [smem:[#allocation122_spill]] }
 0x368   : > { %9647 = dma.hbm_to_vmem [thread:$0]  (%p9876_p10), %s14326_s3, 256, %s1656_s6, [#allocation3], %s14312_s10, %s14312_s10, %s14311_s5  }
 0x36d   : > { %s11313_s12 = scalar_lea.hbm %s14327_s11, 256 }
 0x36e   : > { %p11314_p5 = scmp.ne.s32.totalorder %s14327_s11, %s11313_s12  ;;  %p11319_p12 = scmp.lt.u32.totalorder %s11313_s12, %s14327_s11 }
 0x370   : > { %p11315_p6 = pnand %p11314_p5, %p9876_p10 }
 0x372   : > { %p11316_p11 = pneg %p11315_p6 }
 0x374   : > { %p11321_p13 = pnand %p11319_p12, %p11316_p11 }
 0x376   : > { %11324 = shalt.err (!%p11321_p13)
}
 0x377   : > { %s11325_s13 = scalar_lea.vmem %s1682_s14, 256  ;;  %p11332_p3 = scmp.lt.s32.totalorder %s1682_s14, %s1682_s14 }
 0x378   : > { %p11326_p0 = scmp.ne.s32.totalorder %s1682_s14, %s11325_s13  ;;  %p11333_p4 = scmp.lt.s32.totalorder %s11325_s13, %s11325_s13 }
 0x37a   : > { %p11327_p1 = pnand %p11326_p0, %p9876_p10  ;;  %p11334_p7 = por %p11333_p4, %p11332_p3 }
 0x37c   : > { %p11328_p2 = pneg %p11327_p1 }
 0x37e   : > { %p11335_p8 = pnand %p11334_p7, %p11328_p2 }
 0x380   : > { %11338 = shalt.err (!%p11335_p8)
}
 0x381   : > { %s14328_s2 = sld [smem:[#allocation123_spill]]  ;;  %s12322_s1 = smov [#allocation10]  }
 0x382   : > { %9651 = dma.hbm_to_vmem [thread:$0]  (%p9876_p10), %s14327_s11, 256, %s1682_s14, [#allocation6], %s14312_s10, %s14312_s10, %s14311_s5  }
 0x383   : > { %s1707_s0 = sshll.u32 %s12322_s1, 4  ;;  %s12323_s12 = smov [#allocation13]   ;;  %s1708_s0 = int_to_ptr.vmem [resolvable:$true] %s1707_s0 }
 0x384   : > { %s1734_s3 = sshll.u32 %s12323_s12, 4  ;;  %s1735_s3 = int_to_ptr.vmem [resolvable:$true] %s1734_s3 }
 0x387   : > { %s14329_s6 = smov %s14328_s2  ;;  %s11339_s13 = scalar_lea.hbm %s14328_s2, 256 }
 0x388   : > { %p11340_p5 = scmp.ne.s32.totalorder %s14329_s6, %s11339_s13  ;;  %p11345_p12 = scmp.lt.u32.totalorder %s11339_s13, %s14329_s6 }
 0x38a   : > { %p11341_p6 = pnand %p11340_p5, %p9876_p10 }
 0x38c   : > { %p11342_p11 = pneg %p11341_p6 }
 0x38e   : > { %p11347_p13 = pnand %p11345_p12, %p11342_p11 }
 0x390   : > { %11350 = shalt.err (!%p11347_p13)
}
 0x391   : > { %s11351_s8 = scalar_lea.vmem %s1708_s0, 256  ;;  %p11358_p3 = scmp.lt.s32.totalorder %s1708_s0, %s1708_s0 }
 0x392   : > { %p11352_p0 = scmp.ne.s32.totalorder %s1708_s0, %s11351_s8  ;;  %p11359_p4 = scmp.lt.s32.totalorder %s11351_s8, %s11351_s8 }
 0x394   : > { %p11353_p1 = pnand %p11352_p0, %p9876_p10  ;;  %p11360_p7 = por %p11359_p4, %p11358_p3 }
 0x396   : > { %p11354_p2 = pneg %p11353_p1 }
 0x398   : > { %p11361_p8 = pnand %p11360_p7, %p11354_p2 }
 0x39a   : > { %11364 = shalt.err (!%p11361_p8)
}
 0x39b   : > { %s14330_s14 = sld [smem:[#allocation124_spill]] }
 0x39c   : > { %9655 = dma.hbm_to_vmem [thread:$0]  (%p9876_p10), %s14329_s6, 256, %s1708_s0, [#allocation9], %s14312_s10, %s14312_s10, %s14311_s5  }
 0x3a1   : > { %s11365_s2 = scalar_lea.hbm %s14330_s14, 32 }
 0x3a2   : > { %p11366_p5 = scmp.ne.s32.totalorder %s14330_s14, %s11365_s2  ;;  %p11371_p12 = scmp.lt.u32.totalorder %s11365_s2, %s14330_s14 }
 0x3a4   : > { %p11367_p6 = pnand %p11366_p5, %p9876_p10 }
 0x3a6   : > { %p11368_p11 = pneg %p11367_p6 }
 0x3a8   : > { %p11373_p13 = pnand %p11371_p12, %p11368_p11 }
 0x3aa   : > { %11376 = shalt.err (!%p11373_p13)
}
 0x3ab   : > { %s11377_s8 = scalar_lea.vmem %s1735_s3, 32  ;;  %p11384_p3 = scmp.lt.s32.totalorder %s1735_s3, %s1735_s3 }
 0x3ac   : > { %p11378_p0 = scmp.ne.s32.totalorder %s1735_s3, %s11377_s8  ;;  %p11385_p4 = scmp.lt.s32.totalorder %s11377_s8, %s11377_s8 }
 0x3ae   : > { %p11379_p1 = pnand %p11378_p0, %p9876_p10  ;;  %p11386_p7 = por %p11385_p4, %p11384_p3 }
 0x3b0   : > { %p11380_p2 = pneg %p11379_p1 }
 0x3b2   : > { %p11387_p8 = pnand %p11386_p7, %p11380_p2 }
 0x3b4   : > { %11390 = shalt.err (!%p11387_p8)
}
 0x3b5   : > { %s14331_s1 = sld [smem:[#allocation126_spill]]  ;;  %s12324_s0 = smov [#allocation16]  }
 0x3b6   : > { %9659 = dma.hbm_to_vmem [thread:$0]  (%p9876_p10), %s14330_s14, 32, %s1735_s3, [#allocation12]  }
 0x3b7   : > { %s1757_s13 = sshll.u32 %s12324_s0, 4  ;;  %s12325_s2 = smov [#allocation19]   ;;  %s1758_s13 = int_to_ptr.vmem [resolvable:$true] %s1757_s13 }
 0x3b8   : > { %s1783_s6 = sshll.u32 %s12325_s2, 4  ;;  %s1784_s6 = int_to_ptr.vmem [resolvable:$true] %s1783_s6 }
 0x3bb   : > { %s14332_s12 = smov %s14331_s1  ;;  %s11391_s11 = scalar_lea.hbm %s14331_s1, 1792 }
 0x3bc   : > { %p11392_p5 = scmp.ne.s32.totalorder %s14332_s12, %s11391_s11  ;;  %p11397_p12 = scmp.lt.u32.totalorder %s11391_s11, %s14332_s12 }
 0x3be   : > { %p11393_p6 = pnand %p11392_p5, %p9876_p10 }
 0x3c0   : > { %p11394_p11 = pneg %p11393_p6 }
 0x3c2   : > { %p11399_p13 = pnand %p11397_p12, %p11394_p11 }
 0x3c4   : > { %11402 = shalt.err (!%p11399_p13)
}
 0x3c5   : > { %s11403_s8 = scalar_lea.vmem %s1758_s13, 1792  ;;  %p11410_p3 = scmp.lt.s32.totalorder %s1758_s13, %s1758_s13 }
 0x3c6   : > { %p11404_p0 = scmp.ne.s32.totalorder %s1758_s13, %s11403_s8  ;;  %p11411_p4 = scmp.lt.s32.totalorder %s11403_s8, %s11403_s8 }
 0x3c8   : > { %p11405_p1 = pnand %p11404_p0, %p9876_p10  ;;  %p11412_p7 = por %p11411_p4, %p11410_p3 }
 0x3ca   : > { %p11406_p2 = pneg %p11405_p1 }
 0x3cc   : > { %p11413_p8 = pnand %p11412_p7, %p11406_p2 }
 0x3ce   : > { %11416 = shalt.err (!%p11413_p8)
}
 0x3cf   : > { %s14333_s3 = sld [smem:[#allocation127_spill]] }
 0x3d0   : > { %9663 = dma.hbm_to_vmem [thread:$0]  (%p9876_p10), %s14332_s12, 1792, %s1758_s13, [#allocation15], %s14312_s10, %s14312_s10, %s14311_s5  }
 0x3d5   : > { %s11417_s11 = scalar_lea.hbm %s14333_s3, 1792 }
 0x3d6   : > { %p11418_p5 = scmp.ne.s32.totalorder %s14333_s3, %s11417_s11  ;;  %p11423_p12 = scmp.lt.u32.totalorder %s11417_s11, %s14333_s3 }
 0x3d8   : > { %p11419_p6 = pnand %p11418_p5, %p9876_p10 }
 0x3da   : > { %p11420_p11 = pneg %p11419_p6 }
 0x3dc   : > { %p11425_p13 = pnand %p11423_p12, %p11420_p11 }
 0x3de   : > { %11428 = shalt.err (!%p11425_p13)
}
 0x3df   : > { %s11429_s1 = scalar_lea.vmem %s1784_s6, 1792  ;;  %p11436_p3 = scmp.lt.s32.totalorder %s1784_s6, %s1784_s6 }
 0x3e0   : > { %p11430_p0 = scmp.ne.s32.totalorder %s1784_s6, %s11429_s1  ;;  %p11437_p4 = scmp.lt.s32.totalorder %s11429_s1, %s11429_s1 }
 0x3e2   : > { %p11431_p1 = pnand %p11430_p0, %p9876_p10  ;;  %p11438_p7 = por %p11437_p4, %p11436_p3 }
 0x3e4   : > { %p11432_p2 = pneg %p11431_p1 }
 0x3e6   : > { %p11439_p8 = pnand %p11438_p7, %p11432_p2 }
 0x3e8   : > { %11442 = shalt.err (!%p11439_p8)
}
 0x3e9   : > { %s14334_s0 = sld [smem:[#allocation128_spill]]  ;;  %s12326_s2 = smov [#allocation22]  }
 0x3ea   : > { %9667 = dma.hbm_to_vmem [thread:$0]  (%p9876_p10), %s14333_s3, 1792, %s1784_s6, [#allocation18], %s14312_s10, %s14312_s10, %s14311_s5  }
 0x3eb   : > { %s1809_s8 = sshll.u32 %s12326_s2, 4  ;;  %s12327_s11 = smov [#allocation25]   ;;  %s1810_s8 = int_to_ptr.vmem [resolvable:$true] %s1809_s8 }
 0x3ec   : > { %s1833_s12 = sshll.u32 %s12327_s11, 4  ;;  %s1834_s12 = int_to_ptr.vmem [resolvable:$true] %s1833_s12 }
 0x3ef   : > { %s14335_s13 = smov %s14334_s0  ;;  %s11443_s1 = scalar_lea.hbm %s14334_s0, 1792 }
 0x3f0   : > { %p11444_p5 = scmp.ne.s32.totalorder %s14335_s13, %s11443_s1  ;;  %p11449_p12 = scmp.lt.u32.totalorder %s11443_s1, %s14335_s13 }
 0x3f2   : > { %p11445_p6 = pnand %p11444_p5, %p9876_p10 }
 0x3f4   : > { %p11446_p11 = pneg %p11445_p6 }
 0x3f6   : > { %p11451_p13 = pnand %p11449_p12, %p11446_p11 }
 0x3f8   : > { %11454 = shalt.err (!%p11451_p13)
}
 0x3f9   : > { %s11455_s14 = scalar_lea.vmem %s1810_s8, 1792  ;;  %p11462_p3 = scmp.lt.s32.totalorder %s1810_s8, %s1810_s8 }
 0x3fa   : > { %p11456_p0 = scmp.ne.s32.totalorder %s1810_s8, %s11455_s14  ;;  %p11463_p4 = scmp.lt.s32.totalorder %s11455_s14, %s11455_s14 }
 0x3fc   : > { %p11457_p1 = pnand %p11456_p0, %p9876_p10  ;;  %p11464_p7 = por %p11463_p4, %p11462_p3 }
 0x3fe   : > { %p11458_p2 = pneg %p11457_p1 }
 0x400   : > { %p11465_p8 = pnand %p11464_p7, %p11458_p2 }
 0x402   : > { %11468 = shalt.err (!%p11465_p8)
}
 0x403   : > { %s14336_s6 = sld [smem:[#allocation130_spill]] }
 0x404   : > { %9671 = dma.hbm_to_vmem [thread:$0]  (%p9876_p10), %s14335_s13, 1792, %s1810_s8, [#allocation21], %s14312_s10, %s14312_s10, %s14311_s5  }
 0x409   : > { %s11469_s0 = scalar_lea.hbm %s14336_s6, 128 }
 0x40a   : > { %p11470_p5 = scmp.ne.s32.totalorder %s14336_s6, %s11469_s0  ;;  %p11475_p12 = scmp.lt.u32.totalorder %s11469_s0, %s14336_s6 }
 0x40c   : > { %p11471_p6 = pnand %p11470_p5, %p9876_p10 }
 0x40e   : > { %p11472_p11 = pneg %p11471_p6 }
 0x410   : > { %p11477_p13 = pnand %p11475_p12, %p11472_p11 }
 0x412   : > { %11480 = shalt.err (!%p11477_p13)
}
 0x413   : > { %s11481_s14 = scalar_lea.vmem %s1834_s12, 128  ;;  %p11488_p3 = scmp.lt.s32.totalorder %s1834_s12, %s1834_s12 }
 0x414   : > { %p11482_p0 = scmp.ne.s32.totalorder %s1834_s12, %s11481_s14  ;;  %p11489_p4 = scmp.lt.s32.totalorder %s11481_s14, %s11481_s14 }
 0x416   : > { %p11483_p1 = pnand %p11482_p0, %p9876_p10  ;;  %p11490_p7 = por %p11489_p4, %p11488_p3 }
 0x418   : > { %p11484_p2 = pneg %p11483_p1 }
 0x41a   : > { %p11491_p8 = pnand %p11490_p7, %p11484_p2 }
 0x41c   : > { %11494 = shalt.err (!%p11491_p8)
}
 0x41d   : > { %s14337_s2 = sld [smem:[#allocation131_spill]]  ;;  %s12328_s11 = smov [#allocation28]  }
 0x41e   : > { %9675 = dma.hbm_to_vmem [thread:$0]  (%p9876_p10), %s14336_s6, 128, %s1834_s12, [#allocation24], %s14312_s10, %s14312_s10, %s14311_s5  }
 0x41f   : > { %s1859_s1 = sshll.u32 %s12328_s11, 4  ;;  %s12329_s0 = smov [#allocation31]   ;;  %s1860_s1 = int_to_ptr.vmem [resolvable:$true] %s1859_s1 }
 0x420   : > { %s1885_s3 = sshll.u32 %s12329_s0, 4  ;;  %s1886_s3 = int_to_ptr.vmem [resolvable:$true] %s1885_s3 }
 0x423   : > { %s14338_s8 = smov %s14337_s2  ;;  %s11495_s14 = scalar_lea.hbm %s14337_s2, 128 }
 0x424   : > { %p11496_p5 = scmp.ne.s32.totalorder %s14338_s8, %s11495_s14  ;;  %p11501_p12 = scmp.lt.u32.totalorder %s11495_s14, %s14338_s8 }
 0x426   : > { %p11497_p6 = pnand %p11496_p5, %p9876_p10 }
 0x428   : > { %p11498_p11 = pneg %p11497_p6 }
 0x42a   : > { %p11503_p13 = pnand %p11501_p12, %p11498_p11 }
 0x42c   : > { %11506 = shalt.err (!%p11503_p13)
}
 0x42d   : > { %s11507_s13 = scalar_lea.vmem %s1860_s1, 128  ;;  %p11514_p3 = scmp.lt.s32.totalorder %s1860_s1, %s1860_s1 }
 0x42e   : > { %p11508_p0 = scmp.ne.s32.totalorder %s1860_s1, %s11507_s13  ;;  %p11515_p4 = scmp.lt.s32.totalorder %s11507_s13, %s11507_s13 }
 0x430   : > { %p11509_p1 = pnand %p11508_p0, %p9876_p10  ;;  %p11516_p7 = por %p11515_p4, %p11514_p3 }
 0x432   : > { %p11510_p2 = pneg %p11509_p1 }
 0x434   : > { %p11517_p8 = pnand %p11516_p7, %p11510_p2 }
 0x436   : > { %11520 = shalt.err (!%p11517_p8)
}
 0x437   : > { %s14339_s12 = sld [smem:[#allocation133_spill]] }
 0x438   : > { %9679 = dma.hbm_to_vmem [thread:$0]  (%p9876_p10), %s14338_s8, 128, %s1860_s1, [#allocation27], %s14312_s10, %s14312_s10, %s14311_s5  }
 0x43d   : > { %s11521_s2 = scalar_lea.hbm %s14339_s12, 128 }
 0x43e   : > { %p11522_p5 = scmp.ne.s32.totalorder %s14339_s12, %s11521_s2  ;;  %p11527_p12 = scmp.lt.u32.totalorder %s11521_s2, %s14339_s12 }
 0x440   : > { %p11523_p6 = pnand %p11522_p5, %p9876_p10 }
 0x442   : > { %p11524_p11 = pneg %p11523_p6 }
 0x444   : > { %p11529_p13 = pnand %p11527_p12, %p11524_p11 }
 0x446   : > { %11532 = shalt.err (!%p11529_p13)
}
 0x447   : > { %s11533_s13 = scalar_lea.vmem %s1886_s3, 128  ;;  %p11540_p3 = scmp.lt.s32.totalorder %s1886_s3, %s1886_s3 }
 0x448   : > { %p11534_p0 = scmp.ne.s32.totalorder %s1886_s3, %s11533_s13  ;;  %p11541_p4 = scmp.lt.s32.totalorder %s11533_s13, %s11533_s13 }
 0x44a   : > { %p11535_p1 = pnand %p11534_p0, %p9876_p10  ;;  %p11542_p7 = por %p11541_p4, %p11540_p3 }
 0x44c   : > { %p11536_p2 = pneg %p11535_p1 }
 0x44e   : > { %p11543_p8 = pnand %p11542_p7, %p11536_p2 }
 0x450   : > { %11546 = shalt.err (!%p11543_p8)
}
 0x451   : > { %s14340_s11 = sld [smem:[#allocation135_spill]]  ;;  %s12330_s1 = smov [#allocation34]  }
 0x452   : > { %9683 = dma.hbm_to_vmem [thread:$0]  (%p9876_p10), %s14339_s12, 128, %s1886_s3, [#allocation30], %s14312_s10, %s14312_s10, %s14311_s5  }
 0x453   : > { %s1912_s0 = sshll.u32 %s12330_s1, 4  ;;  %s12331_s14 = smov [#allocation37]   ;;  %s1913_s0 = int_to_ptr.vmem [resolvable:$true] %s1912_s0 }
 0x454   : > { %s1933_s2 = sshll.u32 %s12331_s14, 4  ;;  %s1934_s2 = int_to_ptr.vmem [resolvable:$true] %s1933_s2 }
 0x457   : > { %s11547_s13 = scalar_lea.hbm %s14340_s11, 32 }
 0x458   : > { %p11548_p5 = scmp.ne.s32.totalorder %s14340_s11, %s11547_s13  ;;  %p11553_p12 = scmp.lt.u32.totalorder %s11547_s13, %s14340_s11 }
 0x45a   : > { %p11549_p6 = pnand %p11548_p5, %p9876_p10 }
 0x45c   : > { %p11550_p11 = pneg %p11549_p6 }
 0x45e   : > { %p11555_p13 = pnand %p11553_p12, %p11550_p11 }
 0x460   : > { %11558 = shalt.err (!%p11555_p13)
}
 0x461   : > { %s11559_s6 = scalar_lea.vmem %s1913_s0, 32  ;;  %p11566_p3 = scmp.lt.s32.totalorder %s1913_s0, %s1913_s0 }
 0x462   : > { %p11560_p0 = scmp.ne.s32.totalorder %s1913_s0, %s11559_s6  ;;  %p11567_p4 = scmp.lt.s32.totalorder %s11559_s6, %s11559_s6 }
 0x464   : > { %p11561_p1 = pnand %p11560_p0, %p9876_p10  ;;  %p11568_p7 = por %p11567_p4, %p11566_p3 }
 0x466   : > { %p11562_p2 = pneg %p11561_p1 }
 0x468   : > { %p11569_p8 = pnand %p11568_p7, %p11562_p2 }
 0x46a   : > { %11572 = shalt.err (!%p11569_p8)
}
 0x46b   : > { %s14341_s3 = sld [smem:[#allocation136_spill]] }
 0x46c   : > { %9687 = dma.hbm_to_vmem [thread:$0]  (%p9876_p10), %s14340_s11, 32, %s1913_s0, [#allocation33]  }
 0x471   : > { %s11573_s1 = scalar_lea.hbm %s14341_s3, 1792 }
 0x472   : > { %p11574_p5 = scmp.ne.s32.totalorder %s14341_s3, %s11573_s1  ;;  %p11579_p12 = scmp.lt.u32.totalorder %s11573_s1, %s14341_s3 }
 0x474   : > { %p11575_p6 = pnand %p11574_p5, %p9876_p10 }
 0x476   : > { %p11576_p11 = pneg %p11575_p6 }
 0x478   : > { %p11581_p13 = pnand %p11579_p12, %p11576_p11 }
 0x47a   : > { %11584 = shalt.err (!%p11581_p13)
}
 0x47b   : > { %s11585_s6 = scalar_lea.vmem %s1934_s2, 1792  ;;  %p11592_p3 = scmp.lt.s32.totalorder %s1934_s2, %s1934_s2 }
 0x47c   : > { %p11586_p0 = scmp.ne.s32.totalorder %s1934_s2, %s11585_s6  ;;  %p11593_p4 = scmp.lt.s32.totalorder %s11585_s6, %s11585_s6 }
 0x47e   : > { %p11587_p1 = pnand %p11586_p0, %p9876_p10  ;;  %p11594_p7 = por %p11593_p4, %p11592_p3 }
 0x480   : > { %p11588_p2 = pneg %p11587_p1 }
 0x482   : > { %p11595_p8 = pnand %p11594_p7, %p11588_p2 }
 0x484   : > { %11598 = shalt.err (!%p11595_p8)
}
 0x485   : > { %s14342_s0 = sld [smem:[#allocation138_spill]]  ;;  %s12332_s13 = smov [#allocation40]  }
 0x486   : > { %9691 = dma.hbm_to_vmem [thread:$0]  (%p9876_p10), %s14341_s3, 1792, %s1934_s2, [#allocation36], %s14312_s10, %s14312_s10, %s14311_s5  }
 0x487   : > { %s1957_s1 = sshll.u32 %s12332_s13, 4  ;;  %s12333_s8 = smov [#allocation43]   ;;  %s1958_s1 = int_to_ptr.vmem [resolvable:$true] %s1957_s1 }
 0x488   : > { %s1981_s11 = sshll.u32 %s12333_s8, 4  ;;  %s1982_s11 = int_to_ptr.vmem [resolvable:$true] %s1981_s11 }
 0x48b   : > { %s14343_s14 = smov %s14342_s0  ;;  %s11599_s6 = scalar_lea.hbm %s14342_s0, 1792 }
 0x48c   : > { %p11600_p5 = scmp.ne.s32.totalorder %s14343_s14, %s11599_s6  ;;  %p11605_p12 = scmp.lt.u32.totalorder %s11599_s6, %s14343_s14 }
 0x48e   : > { %p11601_p6 = pnand %p11600_p5, %p9876_p10 }
 0x490   : > { %p11602_p11 = pneg %p11601_p6 }
 0x492   : > { %p11607_p13 = pnand %p11605_p12, %p11602_p11 }
 0x494   : > { %11610 = shalt.err (!%p11607_p13)
}
 0x495   : > { %s11611_s12 = scalar_lea.vmem %s1958_s1, 1792  ;;  %p11618_p3 = scmp.lt.s32.totalorder %s1958_s1, %s1958_s1 }
 0x496   : > { %p11612_p0 = scmp.ne.s32.totalorder %s1958_s1, %s11611_s12  ;;  %p11619_p4 = scmp.lt.s32.totalorder %s11611_s12, %s11611_s12 }
 0x498   : > { %p11613_p1 = pnand %p11612_p0, %p9876_p10  ;;  %p11620_p7 = por %p11619_p4, %p11618_p3 }
 0x49a   : > { %p11614_p2 = pneg %p11613_p1 }
 0x49c   : > { %p11621_p8 = pnand %p11620_p7, %p11614_p2 }
 0x49e   : > { %11624 = shalt.err (!%p11621_p8)
}
 0x49f   : > { %s14344_s8 = sld [smem:[#allocation140_spill]] }
 0x4a0   : > { %9695 = dma.hbm_to_vmem [thread:$0]  (%p9876_p10), %s14343_s14, 1792, %s1958_s1, [#allocation39], %s14312_s10, %s14312_s10, %s14311_s5  }
 0x4a5   : > { %s11625_s2 = scalar_lea.hbm %s14344_s8, 1792 }
 0x4a6   : > { %p11626_p5 = scmp.ne.s32.totalorder %s14344_s8, %s11625_s2  ;;  %p11631_p12 = scmp.lt.u32.totalorder %s11625_s2, %s14344_s8 }
 0x4a8   : > { %p11627_p6 = pnand %p11626_p5, %p9876_p10 }
 0x4aa   : > { %p11628_p11 = pneg %p11627_p6 }
 0x4ac   : > { %p11633_p13 = pnand %p11631_p12, %p11628_p11 }
 0x4ae   : > { %11636 = shalt.err (!%p11633_p13)
}
 0x4af   : > { %s11637_s12 = scalar_lea.vmem %s1982_s11, 1792  ;;  %p11644_p3 = scmp.lt.s32.totalorder %s1982_s11, %s1982_s11 }
 0x4b0   : > { %p11638_p0 = scmp.ne.s32.totalorder %s1982_s11, %s11637_s12  ;;  %p11645_p4 = scmp.lt.s32.totalorder %s11637_s12, %s11637_s12 }
 0x4b2   : > { %p11639_p1 = pnand %p11638_p0, %p9876_p10  ;;  %p11646_p7 = por %p11645_p4, %p11644_p3 }
 0x4b4   : > { %p11640_p2 = pneg %p11639_p1 }
 0x4b6   : > { %p11647_p8 = pnand %p11646_p7, %p11640_p2 }
 0x4b8   : > { %11650 = shalt.err (!%p11647_p8)
}
 0x4b9   : > { %s14345_s0 = sld [smem:[#allocation141_spill]]  ;;  %s12334_s1 = smov [#allocation46]  }
 0x4ba   : > { %9699 = dma.hbm_to_vmem [thread:$0]  (%p9876_p10), %s14344_s8, 1792, %s1982_s11, [#allocation42], %s14312_s10, %s14312_s10, %s14311_s5  }
 0x4bb   : > { %s2006_s6 = sshll.u32 %s12334_s1, 4  ;;  %s12335_s2 = smov [#allocation49]   ;;  %s2007_s6 = int_to_ptr.vmem [resolvable:$true] %s2006_s6 }
 0x4bc   : > { %s2030_s3 = sshll.u32 %s12335_s2, 4  ;;  %s2031_s3 = int_to_ptr.vmem [resolvable:$true] %s2030_s3 }
 0x4bf   : > { %s14346_s13 = smov %s14345_s0  ;;  %s11651_s12 = scalar_lea.hbm %s14345_s0, 64 }
 0x4c0   : > { %p11652_p5 = scmp.ne.s32.totalorder %s14346_s13, %s11651_s12  ;;  %p11657_p12 = scmp.lt.u32.totalorder %s11651_s12, %s14346_s13 }
 0x4c2   : > { %p11653_p6 = pnand %p11652_p5, %p9876_p10 }
 0x4c4   : > { %p11654_p11 = pneg %p11653_p6 }
 0x4c6   : > { %p11659_p13 = pnand %p11657_p12, %p11654_p11 }
 0x4c8   : > { %11662 = shalt.err (!%p11659_p13)
}
 0x4c9   : > { %s11663_s14 = scalar_lea.vmem %s2007_s6, 64  ;;  %p11670_p3 = scmp.lt.s32.totalorder %s2007_s6, %s2007_s6 }
 0x4ca   : > { %p11664_p0 = scmp.ne.s32.totalorder %s2007_s6, %s11663_s14  ;;  %p11671_p4 = scmp.lt.s32.totalorder %s11663_s14, %s11663_s14 }
 0x4cc   : > { %p11665_p1 = pnand %p11664_p0, %p9876_p10  ;;  %p11672_p7 = por %p11671_p4, %p11670_p3 }
 0x4ce   : > { %p11666_p2 = pneg %p11665_p1 }
 0x4d0   : > { %p11673_p8 = pnand %p11672_p7, %p11666_p2 }
 0x4d2   : > { %11676 = shalt.err (!%p11673_p8)
}
 0x4d3   : > { %s14347_s5 = sld [smem:[#allocation143_spill]] }
 0x4d4   : > { %9703 = dma.hbm_to_vmem [thread:$0]  (%p9876_p10), %s14346_s13, 64, %s2007_s6, [#allocation45]  }
 0x4d9   : > { %s11677_s10 = scalar_lea.hbm %s14347_s5, 64 }
 0x4da   : > { %p11678_p5 = scmp.ne.s32.totalorder %s14347_s5, %s11677_s10  ;;  %p11683_p12 = scmp.lt.u32.totalorder %s11677_s10, %s14347_s5 }
 0x4dc   : > { %p11679_p6 = pnand %p11678_p5, %p9876_p10 }
 0x4de   : > { %p11680_p11 = pneg %p11679_p6 }
 0x4e0   : > { %p11685_p13 = pnand %p11683_p12, %p11680_p11 }
 0x4e2   : > { %11688 = shalt.err (!%p11685_p13)
}
 0x4e3   : > { %s11689_s11 = scalar_lea.vmem %s2031_s3, 64  ;;  %p11696_p3 = scmp.lt.s32.totalorder %s2031_s3, %s2031_s3 }
 0x4e4   : > { %p11690_p0 = scmp.ne.s32.totalorder %s2031_s3, %s11689_s11  ;;  %p11697_p4 = scmp.lt.s32.totalorder %s11689_s11, %s11689_s11 }
 0x4e6   : > { %p11691_p1 = pnand %p11690_p0, %p9876_p10  ;;  %p11698_p7 = por %p11697_p4, %p11696_p3 }
 0x4e8   : > { %p11692_p2 = pneg %p11691_p1 }
 0x4ea   : > { %p11699_p8 = pnand %p11698_p7, %p11692_p2 }
 0x4ec   : > { %11702 = shalt.err (!%p11699_p8)
}
 0x4ed   : > { %s14348_s14 = sld [smem:[#allocation145_spill]]  ;;  %s12336_s0 = smov [#allocation52]  }
 0x4ee   : > { %9707 = dma.hbm_to_vmem [thread:$0]  (%p9876_p10), %s14347_s5, 64, %s2031_s3, [#allocation48]  }
 0x4ef   : > { %s2054_s1 = sshll.u32 %s12336_s0, 4  ;;  %s12337_s6 = smov [#allocation55]   ;;  %s2055_s1 = int_to_ptr.vmem [resolvable:$true] %s2054_s1 }
 0x4f0   : > { %s2081_s2 = sshll.u32 %s12337_s6, 4  ;;  %s2082_s2 = int_to_ptr.vmem [resolvable:$true] %s2081_s2 }
 0x4f3   : > { %s11703_s12 = scalar_lea.hbm %s14348_s14, 64 }
 0x4f4   : > { %p11704_p5 = scmp.ne.s32.totalorder %s14348_s14, %s11703_s12  ;;  %p11709_p12 = scmp.lt.u32.totalorder %s11703_s12, %s14348_s14 }
 0x4f6   : > { %p11705_p6 = pnand %p11704_p5, %p9876_p10 }
 0x4f8   : > { %p11706_p11 = pneg %p11705_p6 }
 0x4fa   : > { %p11711_p13 = pnand %p11709_p12, %p11706_p11 }
 0x4fc   : > { %11714 = shalt.err (!%p11711_p13)
}
 0x4fd   : > { %s11715_s10 = scalar_lea.vmem %s2055_s1, 64  ;;  %p11722_p3 = scmp.lt.s32.totalorder %s2055_s1, %s2055_s1 }
 0x4fe   : > { %p11716_p0 = scmp.ne.s32.totalorder %s2055_s1, %s11715_s10  ;;  %p11723_p4 = scmp.lt.s32.totalorder %s11715_s10, %s11715_s10 }
 0x500   : > { %p11717_p1 = pnand %p11716_p0, %p9876_p10  ;;  %p11724_p7 = por %p11723_p4, %p11722_p3 }
 0x502   : > { %p11718_p2 = pneg %p11717_p1 }
 0x504   : > { %p11725_p8 = pnand %p11724_p7, %p11718_p2 }
 0x506   : > { %11728 = shalt.err (!%p11725_p8)
}
 0x507   : > { %s14349_s3 = sld [smem:[#allocation148_spill]] }
 0x508   : > { %9711 = dma.hbm_to_vmem [thread:$0]  (%p9876_p10), %s14348_s14, 64, %s2055_s1, [#allocation51]  }
 0x50d   : > { %s11729_s11 = scalar_lea.hbm %s14349_s3, 32 }
 0x50e   : > { %p11730_p5 = scmp.ne.s32.totalorder %s14349_s3, %s11729_s11  ;;  %p11735_p12 = scmp.lt.u32.totalorder %s11729_s11, %s14349_s3 }
 0x510   : > { %p11731_p6 = pnand %p11730_p5, %p9876_p10 }
 0x512   : > { %p11732_p11 = pneg %p11731_p6 }
 0x514   : > { %p11737_p13 = pnand %p11735_p12, %p11732_p11 }
 0x516   : > { %11740 = shalt.err (!%p11737_p13)
}
 0x517   : > { %s11741_s0 = scalar_lea.vmem %s2082_s2, 32  ;;  %p11748_p3 = scmp.lt.s32.totalorder %s2082_s2, %s2082_s2 }
 0x518   : > { %p11742_p0 = scmp.ne.s32.totalorder %s2082_s2, %s11741_s0  ;;  %p11749_p4 = scmp.lt.s32.totalorder %s11741_s0, %s11741_s0 }
 0x51a   : > { %p11743_p1 = pnand %p11742_p0, %p9876_p10  ;;  %p11750_p7 = por %p11749_p4, %p11748_p3 }
 0x51c   : > { %p11744_p2 = pneg %p11743_p1 }
 0x51e   : > { %p11751_p8 = pnand %p11750_p7, %p11744_p2 }
 0x520   : > { %11754 = shalt.err (!%p11751_p8)
}
 0x521   : > { %s14350_s1 = sld [smem:[#allocation150_spill]]  ;;  %s12338_s12 = smov [#allocation58]  }
 0x522   : > { %9715 = dma.hbm_to_vmem [thread:$0]  (%p9876_p10), %s14349_s3, 32, %s2082_s2, [#allocation54]  }
 0x523   : > { %s2105_s10 = sshll.u32 %s12338_s12, 4  ;;  %s12339_s11 = smov [#allocation61]   ;;  %s2106_s10 = int_to_ptr.vmem [resolvable:$true] %s2105_s10 }
 0x524   : > { %s2129_s5 = sshll.u32 %s12339_s11, 4  ;;  %s2130_s5 = int_to_ptr.vmem [resolvable:$true] %s2129_s5 }
 0x527   : > { %s14351_s6 = smov %s14350_s1  ;;  %s11755_s8 = scalar_lea.hbm %s14350_s1, 32 }
 0x528   : > { %p11756_p5 = scmp.ne.s32.totalorder %s14351_s6, %s11755_s8  ;;  %p11761_p12 = scmp.lt.u32.totalorder %s11755_s8, %s14351_s6 }
 0x52a   : > { %p11757_p6 = pnand %p11756_p5, %p9876_p10 }
 0x52c   : > { %p11758_p11 = pneg %p11757_p6 }
 0x52e   : > { %p11763_p13 = pnand %p11761_p12, %p11758_p11 }
 0x530   : > { %11766 = shalt.err (!%p11763_p13)
}
 0x531   : > { %s11767_s0 = scalar_lea.vmem %s2106_s10, 32  ;;  %p11774_p3 = scmp.lt.s32.totalorder %s2106_s10, %s2106_s10 }
 0x532   : > { %p11768_p0 = scmp.ne.s32.totalorder %s2106_s10, %s11767_s0  ;;  %p11775_p4 = scmp.lt.s32.totalorder %s11767_s0, %s11767_s0 }
 0x534   : > { %p11769_p1 = pnand %p11768_p0, %p9876_p10  ;;  %p11776_p7 = por %p11775_p4, %p11774_p3 }
 0x536   : > { %p11770_p2 = pneg %p11769_p1 }
 0x538   : > { %p11777_p8 = pnand %p11776_p7, %p11770_p2 }
 0x53a   : > { %11780 = shalt.err (!%p11777_p8)
}
 0x53b   : > { %s14352_s2 = sld [smem:[#allocation152_spill]] }
 0x53c   : > { %9719 = dma.hbm_to_vmem [thread:$0]  (%p9876_p10), %s14351_s6, 32, %s2106_s10, [#allocation57]  }
 0x541   : > { %s14353_s12 = smov %s14352_s2  ;;  %s11781_s8 = scalar_lea.hbm %s14352_s2, 32 }
 0x542   : > { %p11782_p5 = scmp.ne.s32.totalorder %s14353_s12, %s11781_s8  ;;  %p11787_p12 = scmp.lt.u32.totalorder %s11781_s8, %s14353_s12 }
 0x544   : > { %p11783_p6 = pnand %p11782_p5, %p9876_p10 }
 0x546   : > { %p11784_p11 = pneg %p11783_p6 }
 0x548   : > { %p11789_p13 = pnand %p11787_p12, %p11784_p11 }
 0x54a   : > { %11792 = shalt.err (!%p11789_p13)
}
 0x54b   : > { %s11793_s1 = scalar_lea.vmem %s2130_s5, 32  ;;  %p11800_p3 = scmp.lt.s32.totalorder %s2130_s5, %s2130_s5 }
 0x54c   : > { %p11794_p0 = scmp.ne.s32.totalorder %s2130_s5, %s11793_s1  ;;  %p11801_p4 = scmp.lt.s32.totalorder %s11793_s1, %s11793_s1 }
 0x54e   : > { %p11795_p1 = pnand %p11794_p0, %p9876_p10  ;;  %p11802_p7 = por %p11801_p4, %p11800_p3 }
 0x550   : > { %p11796_p2 = pneg %p11795_p1 }
 0x552   : > { %p11803_p8 = pnand %p11802_p7, %p11796_p2 }
 0x554   : > { %11806 = shalt.err (!%p11803_p8)
}
 0x555   : > { %s14354_s10 = sld [smem:[#allocation154_spill]]  ;;  %s12340_s11 = smov [#allocation64]  }
 0x556   : > { %9723 = dma.hbm_to_vmem [thread:$0]  (%p9876_p10), %s14353_s12, 32, %s2130_s5, [#allocation60]  }
 0x557   : > { %s2153_s0 = sshll.u32 %s12340_s11, 4  ;;  %s12341_s2 = smov [#allocation67]   ;;  %s2154_s0 = int_to_ptr.vmem [resolvable:$true] %s2153_s0 }
 0x558   : > { %s2178_s8 = sshll.u32 %s12341_s2, 4  ;;  %s2179_s8 = int_to_ptr.vmem [resolvable:$true] %s2178_s8 }
 0x55b   : > { %s11807_s3 = scalar_lea.hbm %s14354_s10, 16 }
 0x55c   : > { %p11808_p5 = scmp.ne.s32.totalorder %s14354_s10, %s11807_s3  ;;  %p11813_p12 = scmp.lt.u32.totalorder %s11807_s3, %s14354_s10 }
 0x55e   : > { %p11809_p6 = pnand %p11808_p5, %p9876_p10 }
 0x560   : > { %p11810_p11 = pneg %p11809_p6 }
 0x562   : > { %p11815_p13 = pnand %p11813_p12, %p11810_p11 }
 0x564   : > { %11818 = shalt.err (!%p11815_p13)
}
 0x565   : > { %s11819_s1 = scalar_lea.vmem %s2154_s0, 16  ;;  %s11825_s5 = scalar_lea.vmem %s2154_s0, 32 }
 0x566   : > { %p11820_p0 = scmp.ne.s32.totalorder %s2154_s0, %s11819_s1  ;;  %p11826_p3 = scmp.lt.s32.totalorder %s2154_s0, %s2154_s0 }
 0x567   : > { %p11827_p4 = scmp.lt.s32.totalorder %s11825_s5, %s11819_s1 }
 0x568   : > { %p11821_p1 = pnand %p11820_p0, %p9876_p10 }
 0x569   : > { %p11828_p7 = por %p11827_p4, %p11826_p3 }
 0x56a   : > { %p11822_p2 = pneg %p11821_p1 }
 0x56c   : > { %p11829_p8 = pnand %p11828_p7, %p11822_p2 }
 0x56e   : > { %11832 = shalt.err (!%p11829_p8)
}
 0x56f   : > { %s14355_s11 = sld [smem:[#allocation157_spill]] }
 0x570   : > { %9727 = dma.hbm_to_vmem [thread:$0]  (%p9876_p10), %s14354_s10, 16, %s2154_s0, [#allocation63]  }
 0x575   : > { %s11833_s3 = scalar_lea.hbm %s14355_s11, 32 }
 0x576   : > { %p11834_p5 = scmp.ne.s32.totalorder %s14355_s11, %s11833_s3  ;;  %p11839_p12 = scmp.lt.u32.totalorder %s11833_s3, %s14355_s11 }
 0x578   : > { %p11835_p6 = pnand %p11834_p5, %p9876_p10 }
 0x57a   : > { %p11836_p11 = pneg %p11835_p6 }
 0x57c   : > { %p11841_p13 = pnand %p11839_p12, %p11836_p11 }
 0x57e   : > { %11844 = shalt.err (!%p11841_p13)
}
 0x57f   : > { %s11845_s2 = scalar_lea.vmem %s2179_s8, 32  ;;  %p11852_p3 = scmp.lt.s32.totalorder %s2179_s8, %s2179_s8 }
 0x580   : > { %p11846_p0 = scmp.ne.s32.totalorder %s2179_s8, %s11845_s2  ;;  %p11853_p4 = scmp.lt.s32.totalorder %s11845_s2, %s11845_s2 }
 0x582   : > { %p11847_p1 = pnand %p11846_p0, %p9876_p10  ;;  %p11854_p7 = por %p11853_p4, %p11852_p3 }
 0x584   : > { %p11848_p2 = pneg %p11847_p1 }
 0x586   : > { %p11855_p8 = pnand %p11854_p7, %p11848_p2 }
 0x588   : > { %11858 = shalt.err (!%p11855_p8)
}
 0x589   : > { %s14356_s0 = sld [smem:[#allocation161_spill]]  ;;  %s12342_s1 = smov [#allocation70]  }
 0x58a   : > { %9731 = dma.hbm_to_vmem [thread:$0]  (%p9876_p10), %s14355_s11, 32, %s2179_s8, [#allocation66]  }
 0x58b   : > { %s2206_s3 = sshll.u32 %s12342_s1, 4  ;;  %s12343_s6 = smov [#allocation73]   ;;  %s2207_s3 = int_to_ptr.vmem [resolvable:$true] %s2206_s3 }
 0x58c   : > { %s2231_s10 = sshll.u32 %s12343_s6, 4  ;;  %s2232_s10 = int_to_ptr.vmem [resolvable:$true] %s2231_s10 }
 0x58f   : > { %s14357_s5 = smov %s14356_s0  ;;  %s11859_s12 = scalar_lea.hbm %s14356_s0, 32 }
 0x590   : > { %p11860_p5 = scmp.ne.s32.totalorder %s14357_s5, %s11859_s12  ;;  %p11865_p12 = scmp.lt.u32.totalorder %s11859_s12, %s14357_s5 }
 0x592   : > { %p11861_p6 = pnand %p11860_p5, %p9876_p10 }
 0x594   : > { %p11862_p11 = pneg %p11861_p6 }
 0x596   : > { %p11867_p13 = pnand %p11865_p12, %p11862_p11 }
 0x598   : > { %11870 = shalt.err (!%p11867_p13)
}
 0x599   : > { %s11871_s2 = scalar_lea.vmem %s2207_s3, 32  ;;  %p11878_p3 = scmp.lt.s32.totalorder %s2207_s3, %s2207_s3 }
 0x59a   : > { %p11872_p0 = scmp.ne.s32.totalorder %s2207_s3, %s11871_s2  ;;  %p11879_p4 = scmp.lt.s32.totalorder %s11871_s2, %s11871_s2 }
 0x59c   : > { %p11873_p1 = pnand %p11872_p0, %p9876_p10  ;;  %p11880_p7 = por %p11879_p4, %p11878_p3 }
 0x59e   : > { %p11874_p2 = pneg %p11873_p1 }
 0x5a0   : > { %p11881_p8 = pnand %p11880_p7, %p11874_p2 }
 0x5a2   : > { %11884 = shalt.err (!%p11881_p8)
}
 0x5a3   : > { %s14358_s6 = sld [smem:[#allocation164_spill]] }
 0x5a4   : > { %9735 = dma.hbm_to_vmem [thread:$0]  (%p9876_p10), %s14357_s5, 32, %s2207_s3, [#allocation69]  }
 0x5a9   : > { %s11885_s12 = scalar_lea.hbm %s14358_s6, 16 }
 0x5aa   : > { %p11886_p5 = scmp.ne.s32.totalorder %s14358_s6, %s11885_s12  ;;  %p11891_p12 = scmp.lt.u32.totalorder %s11885_s12, %s14358_s6 }
 0x5ac   : > { %p11887_p6 = pnand %p11886_p5, %p9876_p10 }
 0x5ae   : > { %p11888_p11 = pneg %p11887_p6 }
 0x5b0   : > { %p11893_p13 = pnand %p11891_p12, %p11888_p11 }
 0x5b2   : > { %11896 = shalt.err (!%p11893_p13)
}
 0x5b3   : > { %s11897_s8 = scalar_lea.vmem %s2232_s10, 16  ;;  %s11903_s0 = scalar_lea.vmem %s2232_s10, 32 }
 0x5b4   : > { %p11898_p0 = scmp.ne.s32.totalorder %s2232_s10, %s11897_s8  ;;  %p11904_p3 = scmp.lt.s32.totalorder %s2232_s10, %s2232_s10 }
 0x5b5   : > { %p11905_p4 = scmp.lt.s32.totalorder %s11903_s0, %s11897_s8 }
 0x5b6   : > { %p11899_p1 = pnand %p11898_p0, %p9876_p10 }
 0x5b7   : > { %p11906_p7 = por %p11905_p4, %p11904_p3 }
 0x5b8   : > { %p11900_p2 = pneg %p11899_p1 }
 0x5ba   : > { %p11907_p8 = pnand %p11906_p7, %p11900_p2 }
 0x5bc   : > { %11910 = shalt.err (!%p11907_p8)
}
 0x5bd   : > { %s14359_s1 = sld [smem:[#allocation166_spill]]  ;;  %s12344_s2 = smov [#allocation76]  }
 0x5be   : > { %9739 = dma.hbm_to_vmem [thread:$0]  (%p9876_p10), %s14358_s6, 16, %s2232_s10, [#allocation72]  }
 0x5bf   : > { %s2255_s12 = sshll.u32 %s12344_s2, 4  ;;  %s12345_s5 = smov [#allocation79]   ;;  %s2256_s12 = int_to_ptr.vmem [resolvable:$true] %s2255_s12 }
 0x5c0   : > { %s2279_s11 = sshll.u32 %s12345_s5, 4  ;;  %s2280_s11 = int_to_ptr.vmem [resolvable:$true] %s2279_s11 }
 0x5c3   : > { %s14360_s3 = smov %s14359_s1  ;;  %s11911_s13 = scalar_lea.hbm %s14359_s1, 16 }
 0x5c4   : > { %p11912_p5 = scmp.ne.s32.totalorder %s14360_s3, %s11911_s13  ;;  %p11917_p12 = scmp.lt.u32.totalorder %s11911_s13, %s14360_s3 }
 0x5c6   : > { %p11913_p6 = pnand %p11912_p5, %p9876_p10 }
 0x5c8   : > { %p11914_p11 = pneg %p11913_p6 }
 0x5ca   : > { %p11919_p13 = pnand %p11917_p12, %p11914_p11 }
 0x5cc   : > { %11922 = shalt.err (!%p11919_p13)
}
 0x5cd   : > { %s11923_s8 = scalar_lea.vmem %s2256_s12, 16  ;;  %s11929_s10 = scalar_lea.vmem %s2256_s12, 32 }
 0x5ce   : > { %p11924_p0 = scmp.ne.s32.totalorder %s2256_s12, %s11923_s8  ;;  %p11930_p3 = scmp.lt.s32.totalorder %s2256_s12, %s2256_s12 }
 0x5cf   : > { %p11931_p4 = scmp.lt.s32.totalorder %s11929_s10, %s11923_s8 }
 0x5d0   : > { %p11925_p1 = pnand %p11924_p0, %p9876_p10 }
 0x5d1   : > { %p11932_p7 = por %p11931_p4, %p11930_p3 }
 0x5d2   : > { %p11926_p2 = pneg %p11925_p1 }
 0x5d4   : > { %p11933_p8 = pnand %p11932_p7, %p11926_p2 }
 0x5d6   : > { %11936 = shalt.err (!%p11933_p8)
}
 0x5d7   : > { %s14361_s5 = sld [smem:[#allocation168_spill]] }
 0x5d8   : > { %9743 = dma.hbm_to_vmem [thread:$0]  (%p9876_p10), %s14360_s3, 16, %s2256_s12, [#allocation75]  }
 0x5dd   : > { %s11937_s13 = scalar_lea.hbm %s14361_s5, 16 }
 0x5de   : > { %p11938_p5 = scmp.ne.s32.totalorder %s14361_s5, %s11937_s13  ;;  %p11943_p12 = scmp.lt.u32.totalorder %s11937_s13, %s14361_s5 }
 0x5e0   : > { %p11939_p6 = pnand %p11938_p5, %p9876_p10 }
 0x5e2   : > { %p11940_p11 = pneg %p11939_p6 }
 0x5e4   : > { %p11945_p13 = pnand %p11943_p12, %p11940_p11 }
 0x5e6   : > { %11948 = shalt.err (!%p11945_p13)
}
 0x5e7   : > { %s11949_s0 = scalar_lea.vmem %s2280_s11, 16  ;;  %s11955_s1 = scalar_lea.vmem %s2280_s11, 32 }
 0x5e8   : > { %p11950_p0 = scmp.ne.s32.totalorder %s2280_s11, %s11949_s0  ;;  %p11956_p3 = scmp.lt.s32.totalorder %s2280_s11, %s2280_s11 }
 0x5e9   : > { %p11957_p4 = scmp.lt.s32.totalorder %s11955_s1, %s11949_s0 }
 0x5ea   : > { %p11951_p1 = pnand %p11950_p0, %p9876_p10 }
 0x5eb   : > { %p11958_p7 = por %p11957_p4, %p11956_p3 }
 0x5ec   : > { %p11952_p2 = pneg %p11951_p1 }
 0x5ee   : > { %p11959_p8 = pnand %p11958_p7, %p11952_p2 }
 0x5f0   : > { %11962 = shalt.err (!%p11959_p8)
}
 0x5f1   : > { %s14362_s2 = sld [smem:[#allocation171_spill]]  ;;  %s12346_s8 = smov [#allocation82]  }
 0x5f2   : > { %9747 = dma.hbm_to_vmem [thread:$0]  (%p9876_p10), %s14361_s5, 16, %s2280_s11, [#allocation78]  }
 0x5f3   : > { %s2304_s10 = sshll.u32 %s12346_s8, 4  ;;  %s12347_s13 = smov [#allocation85]   ;;  %s2305_s10 = int_to_ptr.vmem [resolvable:$true] %s2304_s10 }
 0x5f4   : > { %s2328_s3 = sshll.u32 %s12347_s13, 4  ;;  %s2329_s3 = int_to_ptr.vmem [resolvable:$true] %s2328_s3 }
 0x5f7   : > { %s14363_s12 = smov %s14362_s2  ;;  %s11963_s6 = scalar_lea.hbm %s14362_s2, 16 }
 0x5f8   : > { %p11964_p5 = scmp.ne.s32.totalorder %s14363_s12, %s11963_s6  ;;  %p11969_p12 = scmp.lt.u32.totalorder %s11963_s6, %s14363_s12 }
 0x5fa   : > { %p11965_p6 = pnand %p11964_p5, %p9876_p10 }
 0x5fc   : > { %p11966_p11 = pneg %p11965_p6 }
 0x5fe   : > { %p11971_p13 = pnand %p11969_p12, %p11966_p11 }
 0x600   : > { %11974 = shalt.err (!%p11971_p13)
}
 0x601   : > { %s11975_s0 = scalar_lea.vmem %s2305_s10, 16  ;;  %s11981_s11 = scalar_lea.vmem %s2305_s10, 32 }
 0x602   : > { %p11976_p0 = scmp.ne.s32.totalorder %s2305_s10, %s11975_s0  ;;  %p11982_p3 = scmp.lt.s32.totalorder %s2305_s10, %s2305_s10 }
 0x603   : > { %p11983_p4 = scmp.lt.s32.totalorder %s11981_s11, %s11975_s0 }
 0x604   : > { %p11977_p1 = pnand %p11976_p0, %p9876_p10 }
 0x605   : > { %p11984_p7 = por %p11983_p4, %p11982_p3 }
 0x606   : > { %p11978_p2 = pneg %p11977_p1 }
 0x608   : > { %p11985_p8 = pnand %p11984_p7, %p11978_p2 }
 0x60a   : > { %11988 = shalt.err (!%p11985_p8)
}
 0x60b   : > { %s14364_s1 = sld [smem:[#allocation173_spill]] }
 0x60c   : > { %9751 = dma.hbm_to_vmem [thread:$0]  (%p9876_p10), %s14363_s12, 16, %s2305_s10, [#allocation81]  }
 0x611   : > { %s14365_s8 = smov %s14364_s1  ;;  %s11989_s6 = scalar_lea.hbm %s14364_s1, 16 }
 0x612   : > { %p11990_p5 = scmp.ne.s32.totalorder %s14365_s8, %s11989_s6  ;;  %p11995_p12 = scmp.lt.u32.totalorder %s11989_s6, %s14365_s8 }
 0x614   : > { %p11991_p6 = pnand %p11990_p5, %p9876_p10 }
 0x616   : > { %p11992_p11 = pneg %p11991_p6 }
 0x618   : > { %p11997_p13 = pnand %p11995_p12, %p11992_p11 }
 0x61a   : > { %12000 = shalt.err (!%p11997_p13)
}
 0x61b   : > { %s12001_s2 = scalar_lea.vmem %s2329_s3, 16  ;;  %s12007_s13 = scalar_lea.vmem %s2329_s3, 32 }
 0x61c   : > { %p12002_p0 = scmp.ne.s32.totalorder %s2329_s3, %s12001_s2  ;;  %p12008_p3 = scmp.lt.s32.totalorder %s2329_s3, %s2329_s3 }
 0x61d   : > { %p12009_p4 = scmp.lt.s32.totalorder %s12007_s13, %s12001_s2 }
 0x61e   : > { %p12003_p1 = pnand %p12002_p0, %p9876_p10 }
 0x61f   : > { %p12010_p7 = por %p12009_p4, %p12008_p3 }
 0x620   : > { %p12004_p2 = pneg %p12003_p1 }
 0x622   : > { %p12011_p8 = pnand %p12010_p7, %p12004_p2 }
 0x624   : > { %12014 = shalt.err (!%p12011_p8)
}
 0x625   : > { %s14366_s10 = sld [smem:[#allocation175_spill]]  ;;  %s12348_s0 = smov [#allocation86]  }
 0x626   : > { %9755 = dma.hbm_to_vmem [thread:$0]  (%p9876_p10), %s14365_s8, 16, %s2329_s3, [#allocation84]  }
 0x627   : > { %s2342_s11 = sshll.u32 %s12348_s0, 4  ;;  %s2343_s11 = int_to_ptr.vmem [resolvable:$true] %s2342_s11 }
 0x62b   : > { %s12015_s1 = scalar_lea.hbm %s14366_s10, 16 }
 0x62c   : > { %p12016_p5 = scmp.ne.s32.totalorder %s14366_s10, %s12015_s1  ;;  %p12021_p12 = scmp.lt.u32.totalorder %s12015_s1, %s14366_s10 }
 0x62e   : > { %p12017_p6 = pnand %p12016_p5, %p9876_p10 }
 0x630   : > { %p12018_p11 = pneg %p12017_p6 }
 0x632   : > { %p12023_p13 = pnand %p12021_p12, %p12018_p11 }
 0x634   : > { %12026 = shalt.err (!%p12023_p13)
}
 0x635   : > { %s12027_s6 = scalar_lea.vmem %s2343_s11, 16  ;;  %s12033_s2 = scalar_lea.vmem %s2343_s11, 32 }
 0x636   : > { %p12028_p0 = scmp.ne.s32.totalorder %s2343_s11, %s12027_s6  ;;  %p12034_p3 = scmp.lt.s32.totalorder %s2343_s11, %s2343_s11 }
 0x637   : > { %p12035_p4 = scmp.lt.s32.totalorder %s12033_s2, %s12027_s6 }
 0x638   : > { %p12029_p1 = pnand %p12028_p0, %p9876_p10 }
 0x639   : > { %p12036_p7 = por %p12035_p4, %p12034_p3 }
 0x63a   : > { %p12030_p2 = pneg %p12029_p1 }
 0x63c   : > { %p12037_p8 = pnand %p12036_p7, %p12030_p2 }
 0x63e   : > { %12040 = shalt.err (!%p12037_p8)
}
 0x63f   : > { %9757 = dma.hbm_to_vmem [thread:$0]  (%p9876_p10), %s14366_s10, 16, %s2343_s11, [#allocation87]  }
 0x640 PF: > { %2375 = sbr.rel (%p12752_p9) target bundleno = 7625 (0x1dc9), region = 292  ;;  %p9932_p5 = scmp.eq.s32.totalorder (!%p12752_p9), %s12725_s7, 0 }
 0x647   : > { %12086 = dma.done.wait (%p9932_p5), [#allocation3], 256  }
 0x648   : > { %12088 = vsyncadd (%p9932_p5), [#allocation3], 4294967040 }
 0x649   : > { %12090 = dma.done.wait (%p9932_p5), [#allocation6], 768  }
 0x64a   : > { %12092 = vsyncadd (%p9932_p5), [#allocation6], 4294966528 }
 0x64b   : > { %12094 = dma.done.wait (%p9932_p5), [#allocation9], 768  }
 0x64c   : > { %12096 = vsyncadd (%p9932_p5), [#allocation9], 4294966528 }
 0x64d   : > { %12098 = dma.done.wait (%p9932_p5), [#allocation12], 544  }
 0x64e   : > { %12100 = vsyncadd (%p9932_p5), [#allocation12], 4294966752 }
 0x64f   : > { %12102 = dma.done.wait (%p9932_p5), [#allocation15], 1920  }
 0x650   : > { %12104 = vsyncadd (%p9932_p5), [#allocation15], 4294965376 }
 0x651   : > { %12106 = dma.done.wait (%p9932_p5), [#allocation18], 1920  }
 0x652   : > { %12108 = vsyncadd (%p9932_p5), [#allocation18], 4294965376 }
 0x653   : > { %12110 = dma.done.wait (%p9932_p5), [#allocation21], 1920  }
 0x654   : > { %12112 = vsyncadd (%p9932_p5), [#allocation21], 4294965376 }
 0x655   : > { %12114 = dma.done.wait (%p9932_p5), [#allocation24], 144  }
 0x656   : > { %12116 = vsyncadd (%p9932_p5), [#allocation24], 4294967152 }
 0x657   : > { %12118 = dma.done.wait (%p9932_p5), [#allocation27], 1920  }
 0x658   : > { %12120 = vsyncadd (%p9932_p5), [#allocation27], 4294965376 }
 0x659   : > { %12122 = dma.done.wait (%p9932_p5), [#allocation30], 1920  }
 0x65a   : > { %12124 = vsyncadd (%p9932_p5), [#allocation30], 4294965376 }
 0x65b   : > { %12126 = dma.done.wait (%p9932_p5), [#allocation33], 1824  }
 0x65c   : > { %12128 = vsyncadd (%p9932_p5), [#allocation33], 4294965472 }
 0x65d   : > { %12130 = dma.done.wait (%p9932_p5), [#allocation36], 1856  }
 0x65e   : > { %12132 = vsyncadd (%p9932_p5), [#allocation36], 4294965440 }
 0x65f   : > { %12134 = dma.done.wait (%p9932_p5), [#allocation39], 1856  }
 0x660   : > { %12136 = vsyncadd (%p9932_p5), [#allocation39], 4294965440 }
 0x661   : > { %12138 = dma.done.wait (%p9932_p5), [#allocation42], 1856  }
 0x662   : > { %12140 = vsyncadd (%p9932_p5), [#allocation42], 4294965440 }
 0x663   : > { %12142 = dma.done.wait (%p9932_p5), [#allocation45], 80  }
 0x664   : > { %12144 = vsyncadd (%p9932_p5), [#allocation45], 4294967216 }
 0x665   : > { %12146 = dma.done.wait (%p9932_p5), [#allocation48], 1856  }
 0x666   : > { %12148 = vsyncadd (%p9932_p5), [#allocation48], 4294965440 }
 0x667   : > { %12150 = dma.done.wait (%p9932_p5), [#allocation51], 1856  }
 0x668   : > { %12152 = vsyncadd (%p9932_p5), [#allocation51], 4294965440 }
 0x669   : > { %12154 = dma.done.wait (%p9932_p5), [#allocation54], 1824  }
 0x66a   : > { %12156 = vsyncadd (%p9932_p5), [#allocation54], 4294965472 }
 0x66b   : > { %12158 = dma.done.wait (%p9932_p5), [#allocation57], 1824  }
 0x66c   : > { %12160 = vsyncadd (%p9932_p5), [#allocation57], 4294965472 }
 0x66d   : > { %12162 = dma.done.wait (%p9932_p5), [#allocation60], 1824  }
 0x66e   : > { %12164 = vsyncadd (%p9932_p5), [#allocation60], 4294965472 }
 0x66f   : > { %12166 = dma.done.wait (%p9932_p5), [#allocation63], 1808  }
 0x670   : > { %12168 = vsyncadd (%p9932_p5), [#allocation63], 4294965488 }
 0x671   : > { %12170 = dma.done.wait (%p9932_p5), [#allocation66], 64  }
 0x672   : > { %12172 = vsyncadd (%p9932_p5), [#allocation66], 4294967232 }
 0x673   : > { %12174 = dma.done.wait (%p9932_p5), [#allocation69], 64  }
 0x674   : > { %12176 = vsyncadd (%p9932_p5), [#allocation69], 4294967232 }
 0x675   : > { %12178 = dma.done.wait (%p9932_p5), [#allocation72], 32  }
 0x676   : > { %12180 = vsyncadd (%p9932_p5), [#allocation72], 4294967264 }
 0x677   : > { %12182 = dma.done.wait (%p9932_p5), [#allocation75], 2064  }
 0x678   : > { %12184 = vsyncadd (%p9932_p5), [#allocation75], 4294965232 }
 0x679   : > { %12186 = dma.done.wait (%p9932_p5), [#allocation78], 2064  }
 0x67a   : > { %12188 = vsyncadd (%p9932_p5), [#allocation78], 4294965232 }
 0x67b   : > { %12190 = dma.done.wait (%p9932_p5), [#allocation81], 32  }
 0x67c   : > { %12192 = vsyncadd (%p9932_p5), [#allocation81], 4294967264 }
 0x67d   : > { %12194 = dma.done.wait (%p9932_p5), [#allocation84], 1040  }
 0x67e   : > { %12196 = vsyncadd (%p9932_p5), [#allocation84], 4294966256 }
 0x67f   : > { %12198 = dma.done.wait (%p9932_p5), [#allocation87], 16  }
 0x680   : > { %12200 = vsyncadd (%p9932_p5), [#allocation87], 4294967280  ;;  %s14367_s26 = sld [smem:[#allocation119_spill]]  ;;  %p2748_p9 = scmp.lt.s32.totalorder %s12725_s7, 1  ;;  %vm2778_vm0 = vcmask 228352   ;;  %vm2785_vm1 = vcmask 1045504   ;;  %v3249_v55 = vlaneseq }
 0x681   : > { %v10153_v6 = vld [vmem:[#allocation7] sm:$0xff]   ;;  %v10155_v7 = vld [vmem:[#allocation2] sm:$0xff]   ;;  %v10154_v9 = vld [vmem:[#allocation7 + $0x8] sm:$0x3f]   ;;  %v12349_v18 = vmov 0   ;;  %vm3535_vm2 = vcmask 785408  }
 0x682   : > { %s2749_s3 = scalar_select %p2748_p9, %s12725_s7, 1  ;;  %9461 = vmatprep.mubr.msk.bf16.mxu1 %vm2778_vm0, %v10153_v6  ;;  %9453 = vmatprep.mubr.msk.bf16.mxu0 %vm2778_vm0, %v10155_v7  ;;  %v10156_v10 = vld [vmem:[#allocation2 + $0x8] sm:$0x3f]   ;;  %v10157_v11 = vld [vmem:[#allocation10] sm:$0xff]   ;;  %v10167_v19 = vld [vmem:[#allocation5 + $0x4] ss:$8 sps:$4 sm:$0xff]  }
 0x683   : > { %v10159_v12 = vld [vmem:[#allocation8] ss:$8 sps:$4 sm:$0xff]   ;;  %v10161_v13 = vld [vmem:[#allocation8 + $0x4] ss:$8 sps:$4 sm:$0xff]   ;;  %v10165_v24 = vld [vmem:[#allocation5] ss:$8 sps:$4 sm:$0xff]  }
 0x684   : > { %s9313_s13 = sshll.u32 %s2749_s3, 5  ;;  %v10158_v14 = vld [vmem:[#allocation10 + $0x8] sm:$0x3f]   ;;  %v10162_v15 = vld [vmem:[#allocation8 + $0x14] ss:$8 sps:$4 sm:$0x3f]  }
 0x685   : > { %v10164_v16 = vld [vmem:[#allocation8 + $0x10] ss:$8 sps:$4 sm:$0x3f]   ;;  %v10168_v29 = vld [vmem:[#allocation5 + $0x14] ss:$8 sps:$4 sm:$0x3f]  }
 0x686   : > { %s2752_s0 = scalar_lea.vmem %s14367_s26, %s9313_s13  ;;  %v2940_v17 = vsel %vm2785_vm1, %v10164_v16, 0  ;;  %v10170_v33 = vld [vmem:[#allocation5 + $0x10] ss:$8 sps:$4 sm:$0x3f]   ;;  %v10173_v36 = vld [vmem:[#allocation11 + $0x4] ss:$8 sps:$4 sm:$0xff]  }
 0x687   : > { %v2754_v0 = vld [vmem:[%s2752_s0] sm:$0xff]  ;;  %v2755_v1 = vld [vmem:[%s2752_s0 + $0x8] sm:$0xff]  ;;  %v2756_v2 = vld [vmem:[%s2752_s0 + $0x10] sm:$0xff]  ;;  %v3023_v35 = vsel %vm2785_vm1, %v10170_v33, 0  ;;  %v3250_v57 = vshrl.u32 %v3249_v55, 7  ;;  %vm12351_vm3 = vmmov 0  }
 0x688   : > { %v2758_v3 = vpack.c.bf16 %v2755_v1, %v2754_v0  ;;  %v2757_v4 = vld [vmem:[%s2752_s0 + $0x18] sm:$0xf]  ;;  %v10174_v44 = vld [vmem:[#allocation11 + $0x14] ss:$8 sps:$4 sm:$0x3f]   ;;  %vm3958_vm4 = vcmask 1046528  }
 0x689   : > { %v2759_v5 = vpack.c.bf16 %v2757_v4, %v2756_v2  ;;  %v10171_v43 = vld [vmem:[#allocation11] ss:$8 sps:$4 sm:$0xff]   ;;  %v10176_v45 = vld [vmem:[#allocation11 + $0x10] ss:$8 sps:$4 sm:$0x3f]   ;;  %v13663_v59 = vsub.s32 0, %v3250_v57 }
 0x68a   : > { %9457 = vmatprep.subr.bf16.mxu1 %v2758_v3  ;;  %9449 = vmatprep.subr.bf16.mxu0 %v2758_v3  ;;  %v3181_v46 = vsel %vm2785_vm1, %v10176_v45, 0  ;;  %v10193_v47 = vld [vmem:[#allocation16] sm:$0xff]   ;;  %v10194_v48 = vld [vmem:[#allocation16 + $0x8] sm:$0xff]   ;;  %v10195_v49 = vld [vmem:[#allocation16 + $0x10] sm:$0xff]   ;;  %v13665_v61 = vsub.s32 1, %v3250_v57  ;;  %vm3954_vm5 = vcmask 113664  }
 0x68b   : > { %9458 = vmatpush3.bf16.msra.mxu1 %v2758_v3  ;;  %v2787_v8 = vsel %vm2785_vm1, %v2759_v5, 0  ;;  %9450 = vmatpush3.bf16.msra.mxu0 %v2758_v3  ;;  %v10196_v50 = vld [vmem:[#allocation16 + $0x18] sm:$0xff]   ;;  %v10197_v51 = vld [vmem:[#allocation16 + $0x20] sm:$0xff]   ;;  %v10198_v52 = vld [vmem:[#allocation16 + $0x28] sm:$0xff]   ;;  %vm4140_vm6 = vcmask 916480   ;;  %vm5153_vm7 = vcmask 1042432  }
 0x68c   : > { %9644 = vmatprep.subr.msk.bf16.mxu1 %vm2785_vm1, %v2759_v5  ;;  %9643 = vmatprep.subr.msk.bf16.mxu0 %vm2785_vm1, %v2759_v5  ;;  %v10199_v53 = vld [vmem:[#allocation16 + $0x30] sm:$0xff]   ;;  %v10200_v54 = vld [vmem:[#allocation16 + $0x38] sm:$0xff]   ;;  %v10201_v56 = vld [vmem:[#allocation16 + $0x40] sm:$0xff]   ;;  %vm5154_vm8 = vcmask 1043456   ;;  %vm5149_vm9 = vcmask 56320   ;;  %s14368_s11 = sld [smem:[#allocation147_spill]] }
 0x68d   : > { %v10202_v58 = vld [vmem:[#allocation16 + $0x48] sm:$0xff]   ;;  %v3247_v60 = vld [vmem:[#allocation13] sm:$0x3]  ;;  %v10204_v1 = vld [vmem:[#allocation16 + $0x58] sm:$0xff]   ;;  %s14369_s1 = sld [smem:[#allocation158_spill]]  ;;  %vm6325_vm10 = vcmask 1041408  }
 0x68e   : > { %v10203_v62 = vld [vmem:[#allocation16 + $0x50] sm:$0xff]   ;;  %v3252_v63 = vrot.slane %v3247_v60, %v13663_v59  ;;  %v3256_v0 = vrot.slane %v3247_v60, %v13665_v61  ;;  %vm6321_vm11 = vcmask 31744   ;;  %s14371_s2 = sld [smem:[#allocation160_spill]]  ;;  %s14373_s3 = sld [smem:[#allocation156_spill]]  ;;  %vm7558_vm12 = vcmask 1040384  }
 0x68f   : > { %9460 = vmatpush3.bf16.msra.mxu1 %v2787_v8  ;;  %9452 = vmatpush3.bf16.msra.mxu0 %v2787_v8  ;;  %v10178_v33 = vld [vmem:[#allocation17] sm:$0x7f]   ;;  %s14374_s13 = sld [smem:[#allocation163_spill]]  ;;  %s14375_s0 = sld [smem:[#allocation170_spill]]  ;;  %vm7554_vm13 = vcmask 15360   ;;  %vm7984_vm14 = vcmask 523264  }
 0x690   : > { %9465 = vmatprep.subr.bf16.mxu1 %v2758_v3  ;;  %2945 = vmatprep.subr.bf16.mxu0 %v10161_v13  ;;  %v10190_v45 = vld [vmem:[#allocation19 + $0x58] sm:$0xff]   ;;  %s14381_s4 = sld [smem:[#allocation177_spill]]  ;;  %vm8047_vm15 = vcmask 261120   ;;  %p14382_p6 = scmp.ne.s32.totalorder %s14299_s22, 0 }
 0x692   : > { %9462 = vmatmul.mubr.msk.bf16.vlgmr.msra.gmra.mrb[0].mxu1 %vm2778_vm0, %v10154_v9  ;;  %9454 = vmatmul.mubr.msk.bf16.vlgmr.msra.gmra.mrb[0].mxu0 %vm2778_vm0, %v10156_v10 }
 0x693   : > { %9466 = vmatpush3.bf16.msra.mxu1 %v2758_v3  ;;  %9469 = vmatprep.mubr.msk.bf16.mxu1 %vm2778_vm0, %v10157_v11  ;;  %s14370_s6 = smov %s14369_s1 }
 0x694   : > { %9645 = vmatprep.subr.msk.bf16.mxu1 %vm2785_vm1, %v2759_v5  ;;  %2946 = vmatpush1.bf16.msra.mxu0 %v10159_v12  ;;  %s14372_s26 = smov %s14371_s2 }
 0x695   : > { %8894 = vmatprep.subr.msk.bf16.mxu0 %vm2785_vm1, %v10162_v15  ;;  %2977 = vmatprep.mubr.bf16.mxu0 %v12349_v18 }
 0x697   : > { %9468 = vmatpush3.bf16.msra.mxu1 %v2787_v8 }
 0x698   : > { %2948 = vmatpush1.bf16.msra.mxu0 %v2940_v17 }
 0x699   : > { %3028 = vmatprep.subr.bf16.mxu0 %v10167_v19 }
 0x69a   : > { %9470 = vmatmul.mubr.msk.bf16.vlgmr.msra.gmra.mrb[4].mxu1 %vm2778_vm0, %v10158_v14 }
 0x69b   : > { %3355 = vmatprep.mubr.bf16.mxu1 %v12349_v18 }
 0x765   : > { %v9463_v20 = vpop.f32.mrb[0].mxu1  ;;  %v9455_v22 = vpop.f32.mrb[0].mxu0 }
 0x766   : > { %v2898_v21 = vpop.f32.mrb[1].mxu1  ;;  %v2823_v25 = vpop.f32.mrb[1].mxu0 }
 0x767   : > { %v9464_v23 = vpop.f32.mrb[2].mxu1  ;;  %v9456_v28 = vpop.f32.mrb[2].mxu0 }
 0x768   : > { %v2914_v26 = vpack.c.bf16 %v9464_v23, %v9463_v20  ;;  %v2901_v27 = vpop.f32.mrb[3].mxu1  ;;  %v2839_v31 = vpack.c.bf16 %v9456_v28, %v9455_v22  ;;  %v2826_v32 = vpop.f32.mrb[3].mxu0 }
 0x769   : > { %v2913_v30 = vpack.c.bf16 %v2901_v27, %v2898_v21  ;;  %v2838_v34 = vpack.c.bf16 %v2826_v32, %v2823_v25  ;;  %v10177_v32 = vld [vmem:[#allocation14] sm:$0x7f]  }
 0x76b   : > { %8895 = vmatmul.mubr.msk.bf16.vlgmr.msra.gmra.mrb[4].mxu0 %vm2778_vm0, %v2913_v30 }
 0x76c   : > { %3029 = vmatpush1.bf16.msra.mxu0 %v10165_v24  ;;  %2987 = vmatprep.mubr.bf16.mxu0 %v12349_v18 }
 0x76d   : > { %8901 = vmatprep.subr.msk.bf16.mxu0 %vm2785_vm1, %v10168_v29  ;;  %v9471_v37 = vpop.f32.mrb[4].mxu1 }
 0x76e   : > { %v3139_v38 = vpop.f32.mrb[5].mxu1 }
 0x76f   : > { %v9472_v39 = vpop.f32.mrb[6].mxu1 }
 0x770   : > { %3031 = vmatpush1.bf16.msra.mxu0 %v3023_v35  ;;  %v3155_v40 = vpack.c.bf16 %v9472_v39, %v9471_v37  ;;  %v3142_v41 = vpop.f32.mrb[7].mxu1  ;;  %v10180_v35 = vld [vmem:[#allocation19 + $0x8] sm:$0xff]   ;;  %v10182_v37 = vld [vmem:[#allocation19 + $0x18] sm:$0xff]  }
 0x771   : > { %3186 = vmatprep.subr.bf16.mxu0 %v10173_v36  ;;  %v3154_v42 = vpack.c.bf16 %v3142_v41, %v3139_v38  ;;  %v10181_v36 = vld [vmem:[#allocation19 + $0x10] sm:$0xff]   ;;  %v10183_v38 = vld [vmem:[#allocation19 + $0x20] sm:$0xff]   ;;  %v10184_v39 = vld [vmem:[#allocation19 + $0x28] sm:$0xff]  }
 0x772   : > { %v10186_v41 = vld [vmem:[#allocation19 + $0x38] sm:$0xff]  }
 0x773   : > { %8896 = vmatmul.mubr.msk.bf16.gmra.mrb[8].mxu0 %vm2778_vm0, %v2914_v26 }
 0x774   : > { %3060 = vmatprep.mubr.bf16.mxu0 %v12349_v18 }
 0x77b   : > { %8902 = vmatmul.mubr.msk.bf16.vlgmr.msra.gmra.mrb[4].mxu0 %vm2778_vm0, %v2838_v34  ;;  %v10179_v34 = vld [vmem:[#allocation19] sm:$0xff]  }
 0x77c   : > { %3187 = vmatpush1.bf16.msra.mxu0 %v10171_v43  ;;  %3070 = vmatprep.mubr.bf16.mxu0 %v12349_v18  ;;  %v10188_v43 = vld [vmem:[#allocation19 + $0x48] sm:$0xff]  }
 0x77d   : > { %8912 = vmatprep.subr.msk.bf16.mxu0 %vm2785_vm1, %v10174_v44  ;;  %v10189_v44 = vld [vmem:[#allocation19 + $0x50] sm:$0xff]  }
 0x780   : > { %3189 = vmatpush1.bf16.msra.mxu0 %v3181_v46  ;;  %v10191_v46 = vld [vmem:[#allocation19 + $0x60] sm:$0xff]  }
 0x781   : > { %3667 = vmatprep.subr.bf16.mxu0 %v12349_v18 }
 0x783   : > { %8903 = vmatmul.mubr.msk.bf16.gmra.mrb[8].mxu0 %vm2778_vm0, %v2839_v31 }
 0x784   : > { %3218 = vmatprep.mubr.bf16.mxu0 %v12349_v18 }
 0x78b   : > { %8913 = vmatmul.mubr.msk.bf16.vlgmr.msra.gmra.mrb[4].mxu0 %vm2778_vm0, %v3154_v42  ;;  %v10187_v42 = vld [vmem:[#allocation19 + $0x40] sm:$0xff]  }
 0x78c   : > { %3228 = vmatprep.mubr.bf16.mxu0 %v12349_v18  ;;  %3668 = vmatpush1.bf16.msra.mxu0 %v10193_v47  ;;  %v10192_v47 = vld [vmem:[#allocation19 + $0x68] sm:$0xff]  }
 0x78d   : > { %3669 = vmatprep.subr.bf16.mxu0 %v12349_v18 }
 0x790   : > { %3670 = vmatpush1.bf16.msra.mxu0 %v10194_v48  ;;  %v10205_v48 = vld [vmem:[#allocation16 + $0x60] sm:$0xff]  }
 0x791   : > { %3671 = vmatprep.subr.bf16.mxu0 %v12349_v18 }
 0x793   : > { %8914 = vmatmul.mubr.msk.bf16.gmra.mrb[8].mxu0 %vm2778_vm0, %v3155_v40  ;;  %v10185_v40 = vld [vmem:[#allocation19 + $0x30] sm:$0xff]  }
 0x794   : > { %3672 = vmatpush1.bf16.msra.mxu0 %v10195_v49  ;;  %v10206_v49 = vld [vmem:[#allocation16 + $0x68] sm:$0xff]  }
 0x795   : > { %3673 = vmatprep.subr.bf16.mxu0 %v12349_v18 }
 0x798   : > { %3674 = vmatpush1.bf16.msra.mxu0 %v10196_v50 }
 0x799   : > { %3675 = vmatprep.subr.bf16.mxu0 %v12349_v18 }
 0x79c   : > { %3676 = vmatpush1.bf16.msra.mxu0 %v10197_v51 }
 0x79d   : > { %3677 = vmatprep.subr.bf16.mxu0 %v12349_v18 }
 0x7a0   : > { %3678 = vmatpush1.bf16.msra.mxu0 %v10198_v52 }
 0x7a1   : > { %3679 = vmatprep.subr.bf16.mxu0 %v12349_v18 }
 0x7a4   : > { %3680 = vmatpush1.bf16.msra.mxu0 %v10199_v53 }
 0x7a5   : > { %3681 = vmatprep.subr.bf16.mxu0 %v12349_v18 }
 0x7a8   : > { %3682 = vmatpush1.bf16.msra.mxu0 %v10200_v54 }
 0x7a9   : > { %3683 = vmatprep.subr.bf16.mxu0 %v12349_v18 }
 0x7ac   : > { %3684 = vmatpush1.bf16.msra.mxu0 %v10201_v56 }
 0x7ad   : > { %3685 = vmatprep.subr.bf16.mxu0 %v12349_v18 }
 0x7b0   : > { %3686 = vmatpush1.bf16.msra.mxu0 %v10202_v58 }
 0x7b1   : > { %3687 = vmatprep.subr.bf16.mxu0 %v12349_v18 }
 0x7b4   : > { %3688 = vmatpush1.bf16.msra.mxu0 %v10203_v62 }
 0x7b5   : > { %3689 = vmatprep.subr.bf16.mxu0 %v12349_v18 }
 0x7b8   : > { %3690 = vmatpush1.bf16.msra.mxu0 %v10204_v1  ;;  %v10208_v1 = vld [vmem:[#allocation22] sm:$0xff]  }
 0x7b9   : > { %3691 = vmatprep.subr.bf16.mxu0 %v12349_v18 }
 0x7bc   : > { %3692 = vmatpush1.bf16.msra.mxu0 %v10205_v48  ;;  %v10227_v48 = vld [vmem:[#allocation29 + $0x4] ss:$8 sps:$4 sm:$0xff]  }
 0x7bd   : > { %3693 = vmatprep.subr.bf16.mxu0 %v12349_v18 }
 0x7c0   : > { %3694 = vmatpush1.bf16.msra.mxu0 %v10206_v49  ;;  %v10223_v49 = vld [vmem:[#allocation28] sm:$0x7f]  }
 0x85e   : > { %v3220_v2 = vpop.f32.mrb[4].mxu0 }
 0x85f   : > { %v3259_v3 = vadd.f32 %v3252_v63, %v3220_v2  ;;  %v3222_v4 = vpop.f32.mrb[5].mxu0  ;;  %v10209_v2 = vld [vmem:[#allocation22 + $0x8] sm:$0xff]  }
 0x860   : > { %v3260_v5 = vadd.f32 %v3256_v0, %v3222_v4  ;;  %v3224_v6 = vpop.f32.mrb[6].mxu0  ;;  %v10211_v4 = vld [vmem:[#allocation22 + $0x18] sm:$0xff]  }
 0x861   : > { %v3261_v7 = vadd.f32 %v3252_v63, %v3224_v6  ;;  %v3226_v8 = vpop.f32.mrb[7].mxu0  ;;  %v3267_v10 = vmax.f32 %v3259_v3, 0.0  ;;  %v10210_v3 = vld [vmem:[#allocation22 + $0x10] sm:$0xff]   ;;  %v10213_v6 = vld [vmem:[#allocation22 + $0x28] sm:$0xff]  }
 0x862   : > { %v3262_v9 = vadd.f32 %v3256_v0, %v3226_v8  ;;  %v3268_v12 = vmax.f32 %v3260_v5, 0.0  ;;  %v10212_v5 = vld [vmem:[#allocation22 + $0x20] sm:$0xff]   ;;  %v10215_v8 = vld [vmem:[#allocation22 + $0x38] sm:$0xff]  }
 0x863   : > { %v3269_v11 = vmax.f32 %v3261_v7, 0.0  ;;  %v10214_v7 = vld [vmem:[#allocation22 + $0x30] sm:$0xff]  }
 0x864   : > { %v3270_v13 = vmax.f32 %v3262_v9, 0.0  ;;  %v10216_v9 = vld [vmem:[#allocation22 + $0x40] sm:$0xff]  }
 0x865   : > { %v13672_v14 = vpack.c.bf16 %v3269_v11, %v3267_v10  ;;  %v10217_v10 = vld [vmem:[#allocation22 + $0x48] sm:$0xff]   ;;  %v10218_v11 = vld [vmem:[#allocation22 + $0x50] sm:$0xff]  }
 0x866   : > { %v13674_v15 = vpack.c.bf16 %v3270_v13, %v3268_v12  ;;  %v3230_v16 = vpop.f32.mrb[8].mxu0  ;;  %v10219_v12 = vld [vmem:[#allocation22 + $0x58] sm:$0xff]   ;;  %v10220_v13 = vld [vmem:[#allocation22 + $0x60] sm:$0xff]  }
 0x867   : > { %v3263_v17 = vadd.f32 %v3252_v63, %v3230_v16  ;;  %v3232_v19 = vpop.f32.mrb[9].mxu0 }
 0x868   : > { %v3264_v20 = vadd.f32 %v3256_v0, %v3232_v19  ;;  %v3234_v21 = vpop.f32.mrb[10].mxu0  ;;  %3323 = vmatprep.subr.bf16.mxu1 %v13674_v15 }
 0x869   : > { %v3265_v22 = vadd.f32 %v3252_v63, %v3234_v21  ;;  %v3236_v23 = vpop.f32.mrb[11].mxu0  ;;  %3324 = vmatpush1.bf16.msra.mxu1 %v13672_v14  ;;  %v3271_v25 = vmax.f32 %v3263_v17, 0.0 }
 0x86a   : > { %v3266_v24 = vadd.f32 %v3256_v0, %v3236_v23  ;;  %v3272_v27 = vmax.f32 %v3264_v20, 0.0  ;;  %v10207_v0 = vld [vmem:[#allocation20] sm:$0x7f]  }
 0x86b   : > { %v3273_v26 = vmax.f32 %v3265_v22, 0.0 }
 0x86c   : > { %v3274_v28 = vmax.f32 %v3266_v24, 0.0 }
 0x86d   : > { %v3277_v29 = vpack.c.bf16 %v3273_v26, %v3271_v25 }
 0x86e   : > { %v13678_v30 = vpack.c.bf16 %v3274_v28, %v3272_v27 }
 0x86f   : > { %v13681_v31 = vsel %vm2785_vm1, %v3277_v29, 0 }
 0x870   : > { %8916 = vmatprep.subr.msk.bf16.mxu1 %vm2785_vm1, %v13678_v30 }
 0x871   : > { %3326 = vmatpush1.bf16.msra.mxu1 %v13681_v31 }
 0x872   : > { %3406 = vmatprep.subr.bf16.mxu1 %v13674_v15 }
 0x874   : > { %8917 = vmatmul.mubr.msk.bf16.vlgmr.msra.gmra.mrb[8].mxu1 %vm2778_vm0, %v10177_v32  ;;  %v12350_v32 = vmov 0.0  }
 0x875   : > { %3407 = vmatpush1.bf16.msra.mxu1 %v13672_v14  ;;  %3438 = vmatprep.mubr.bf16.mxu1 %v12349_v18 }
 0x876   : > { %8919 = vmatprep.subr.msk.bf16.mxu1 %vm2785_vm1, %v13678_v30  ;;  %9473 = vmatprep.subr.bf16.mxu0 %v12350_v32 }
 0x879   : > { %3409 = vmatpush1.bf16.msra.mxu1 %v13681_v31 }
 0x87a   : > { %3539 = vmatprep.subr.bf16.mxu1 %v12349_v18 }
 0x87c   : > { %8920 = vmatmul.mubr.msk.bf16.vlgmr.msra.gmra.mrb[12].mxu1 %vm2778_vm0, %v10178_v33 }
 0x87d   : > { %3540 = vmatpush1.bf16.msra.mxu1 %v10179_v34  ;;  %v8969_v34 = vld [vmem:[#allocation23] ss:$0 sm:$0xff] }
 0x87e   : > { %3541 = vmatprep.subr.bf16.mxu1 %v12349_v18 }
 0x881   : > { %3542 = vmatpush1.bf16.msra.mxu1 %v10180_v35 }
 0x882   : > { %3543 = vmatprep.subr.bf16.mxu1 %v12349_v18 }
 0x885   : > { %3544 = vmatpush1.bf16.msra.mxu1 %v10181_v36 }
 0x886   : > { %3545 = vmatprep.subr.bf16.mxu1 %v12349_v18 }
 0x889   : > { %3546 = vmatpush1.bf16.msra.mxu1 %v10182_v37 }
 0x88a   : > { %3547 = vmatprep.subr.bf16.mxu1 %v12349_v18 }
 0x88d   : > { %3548 = vmatpush1.bf16.msra.mxu1 %v10183_v38 }
 0x88e   : > { %3549 = vmatprep.subr.bf16.mxu1 %v12349_v18 }
 0x891   : > { %3550 = vmatpush1.bf16.msra.mxu1 %v10184_v39 }
 0x892   : > { %3551 = vmatprep.subr.bf16.mxu1 %v12349_v18 }
 0x895   : > { %3552 = vmatpush1.bf16.msra.mxu1 %v10185_v40 }
 0x896   : > { %3553 = vmatprep.subr.bf16.mxu1 %v12349_v18 }
 0x899   : > { %3554 = vmatpush1.bf16.msra.mxu1 %v10186_v41 }
 0x89a   : > { %3555 = vmatprep.subr.bf16.mxu1 %v12349_v18 }
 0x89d   : > { %3556 = vmatpush1.bf16.msra.mxu1 %v10187_v42 }
 0x89e   : > { %3557 = vmatprep.subr.bf16.mxu1 %v12349_v18 }
 0x8a1   : > { %3558 = vmatpush1.bf16.msra.mxu1 %v10188_v43 }
 0x8a2   : > { %3559 = vmatprep.subr.bf16.mxu1 %v12349_v18 }
 0x8a5   : > { %3560 = vmatpush1.bf16.msra.mxu1 %v10189_v44 }
 0x8a6   : > { %3561 = vmatprep.subr.bf16.mxu1 %v12349_v18 }
 0x8a9   : > { %3562 = vmatpush1.bf16.msra.mxu1 %v10190_v45 }
 0x8aa   : > { %3563 = vmatprep.subr.bf16.mxu1 %v12349_v18 }
 0x8ad   : > { %3564 = vmatpush1.bf16.msra.mxu1 %v10191_v46  ;;  %v10222_v46 = vld [vmem:[#allocation25] sm:$0x7f]  }
 0x8ae   : > { %3565 = vmatprep.subr.bf16.mxu1 %v12349_v18 }
 0x8b1   : > { %3566 = vmatpush1.bf16.msra.mxu1 %v10192_v47  ;;  %v10224_v47 = vld [vmem:[#allocation31] sm:$0x7f]  }
 0x8b2   : > { %3746 = vmatprep.subr.bf16.mxu1 %v13674_v15 }
 0x947   : > { %v3357_v50 = vpop.f32.mrb[8].mxu1 }
 0x948   : > { %v3359_v51 = vpop.f32.mrb[9].mxu1 }
 0x949   : > { %v3361_v52 = vpop.f32.mrb[10].mxu1 }
 0x94a   : > { %v3366_v53 = vpack.c.bf16 %v3361_v52, %v3357_v50  ;;  %v3363_v54 = vpop.f32.mrb[11].mxu1  ;;  %v10225_v50 = vld [vmem:[#allocation29] ss:$8 sps:$4 sm:$0xff]   ;;  %v10228_v52 = vld [vmem:[#allocation29 + $0x10] ss:$8 sps:$4 sm:$0xff]  }
 0x94b   : > { %v3367_v55 = vpack.c.bf16 %v3363_v54, %v3359_v51  ;;  %v10230_v51 = vld [vmem:[#allocation29 + $0x14] ss:$8 sps:$4 sm:$0xff]   ;;  %v10231_v54 = vld [vmem:[#allocation29 + $0x20] ss:$8 sps:$4 sm:$0xff]  }
 0x94d   : > { %8950 = vmatprep.mubr.msk.bf16.mxu0 %vm3535_vm2, %v3367_v55  ;;  %v10236_v55 = vld [vmem:[#allocation29 + $0x34] ss:$8 sps:$4 sm:$0xff]  }
 0x94e   : > { %3700 = vmatmul.mubr.bf16.vlgmr.msra.gmra.mrb[12].mxu0 %v3366_v53  ;;  %v10233_v53 = vld [vmem:[#allocation29 + $0x24] ss:$8 sps:$4 sm:$0xff]  }
 0x94f   : > { %v3440_v56 = vpop.f32.mrb[12].mxu1  ;;  %9475 = vmatprep.mubr.msk.bf16.mxu0 %vm12351_vm3, %v12350_v32 }
 0x950   : > { %v3442_v57 = vpop.f32.mrb[13].mxu1 }
 0x951   : > { %v3444_v58 = vpop.f32.mrb[14].mxu1 }
 0x952   : > { %v3449_v60 = vpack.c.bf16 %v3444_v58, %v3440_v56  ;;  %v3446_v62 = vpop.f32.mrb[15].mxu1  ;;  %v10234_v56 = vld [vmem:[#allocation29 + $0x30] ss:$8 sps:$4 sm:$0xff]   ;;  %v10237_v58 = vld [vmem:[#allocation29 + $0x40] ss:$8 sps:$4 sm:$0xff]  }
 0x953   : > { %v3450_v63 = vpack.c.bf16 %v3446_v62, %v3442_v57  ;;  %v10239_v57 = vld [vmem:[#allocation29 + $0x44] ss:$8 sps:$4 sm:$0xff]   ;;  %v10242_v62 = vld [vmem:[#allocation29 + $0x54] ss:$8 sps:$4 sm:$0xff]  }
 0x955   : > { %8935 = vmatprep.mubr.msk.bf16.mxu1 %vm3535_vm2, %v3450_v63  ;;  %v10245_v63 = vld [vmem:[#allocation29 + $0x64] ss:$8 sps:$4 sm:$0xff]  }
 0x956   : > { %3572 = vmatmul.mubr.bf16.vlgmr.msra.gmra.mrb[16].mxu1 %v3449_v60  ;;  %v10240_v60 = vld [vmem:[#allocation29 + $0x50] ss:$8 sps:$4 sm:$0xff]  }
 0x957   : > { %3747 = vmatpush1.bf16.msra.mxu1 %v13672_v14  ;;  %3778 = vmatprep.mubr.bf16.mxu1 %v12349_v18  ;;  %v10221_v14 = vld [vmem:[#allocation22 + $0x68] sm:$0xff]  }
 0x958   : > { %8952 = vmatprep.subr.msk.bf16.mxu1 %vm2785_vm1, %v13678_v30 }
 0x95b   : > { %3749 = vmatpush1.bf16.msra.mxu1 %v13681_v31 }
 0x95c   : > { %3878 = vmatprep.subr.bf16.mxu1 %v12349_v18 }
 0x95e   : > { %8953 = vmatmul.mubr.msk.bf16.vlgmr.msra.gmra.mrb[20].mxu1 %vm2778_vm0, %v10207_v0  ;;  %v10243_v0 = vld [vmem:[#allocation29 + $0x60] ss:$8 sps:$4 sm:$0xff]   ;;  %vm8091_vm0 = vcmask 73728  }
 0x95f   : > { %3879 = vmatpush1.bf16.msra.mxu1 %v10208_v1  ;;  %v10248_v1 = vld [vmem:[#allocation26 + $0x4] ss:$8 sps:$4 sm:$0xff]  }
 0x960   : > { %3880 = vmatprep.subr.bf16.mxu1 %v12349_v18 }
 0x963   : > { %3881 = vmatpush1.bf16.msra.mxu1 %v10209_v2 }
 0x964   : > { %3882 = vmatprep.subr.bf16.mxu1 %v12349_v18 }
 0x967   : > { %3883 = vmatpush1.bf16.msra.mxu1 %v10210_v3 }
 0x968   : > { %3884 = vmatprep.subr.bf16.mxu1 %v12349_v18 }
 0x96b   : > { %3885 = vmatpush1.bf16.msra.mxu1 %v10211_v4 }
 0x96c   : > { %3886 = vmatprep.subr.bf16.mxu1 %v12349_v18 }
 0x96f   : > { %3887 = vmatpush1.bf16.msra.mxu1 %v10212_v5 }
 0x970   : > { %3888 = vmatprep.subr.bf16.mxu1 %v12349_v18 }
 0x973   : > { %3889 = vmatpush1.bf16.msra.mxu1 %v10213_v6 }
 0x974   : > { %3890 = vmatprep.subr.bf16.mxu1 %v12349_v18 }
 0x977   : > { %3891 = vmatpush1.bf16.msra.mxu1 %v10214_v7 }
 0x978   : > { %3892 = vmatprep.subr.bf16.mxu1 %v12349_v18 }
 0x97b   : > { %3893 = vmatpush1.bf16.msra.mxu1 %v10215_v8 }
 0x97c   : > { %3894 = vmatprep.subr.bf16.mxu1 %v12349_v18 }
 0x97f   : > { %3895 = vmatpush1.bf16.msra.mxu1 %v10216_v9 }
 0x980   : > { %3896 = vmatprep.subr.bf16.mxu1 %v12349_v18 }
 0x983   : > { %3897 = vmatpush1.bf16.msra.mxu1 %v10217_v10 }
 0x984   : > { %3898 = vmatprep.subr.bf16.mxu1 %v12349_v18 }
 0x987   : > { %3899 = vmatpush1.bf16.msra.mxu1 %v10218_v11 }
 0x988   : > { %3900 = vmatprep.subr.bf16.mxu1 %v12349_v18 }
 0x98b   : > { %3901 = vmatpush1.bf16.msra.mxu1 %v10219_v12 }
 0x98c   : > { %3902 = vmatprep.subr.bf16.mxu1 %v12349_v18 }
 0x98f   : > { %3903 = vmatpush1.bf16.msra.mxu1 %v10220_v13 }
 0x990   : > { %3904 = vmatprep.subr.bf16.mxu1 %v12349_v18 }
 0x993   : > { %3905 = vmatpush1.bf16.msra.mxu1 %v10221_v14 }
 0x994   : > { %9485 = vmatprep.subr.bf16.mxu1 %v12350_v32 }
 0xa21   : > { %v3701_v15 = vpop.f32.mrb[12].mxu0 }
 0xa22   : > { %v3703_v16 = vpop.f32.mrb[13].mxu0 }
 0xa23   : > { %v3704_v17 = vpop.f32.mrb[14].mxu0 }
 0xa24   : > { %v3706_v19 = vpop.f32.mrb[15].mxu0 }
 0xa25   : > { %v10251_v19 = vld [vmem:[#allocation26 + $0x14] ss:$8 sps:$4 sm:$0xff]  }
 0xa29   : > { %v3573_v20 = vpop.f32.mrb[16].mxu1 }
 0xa2a   : > { %v3702_v21 = vadd.f32 %v3701_v15, %v3573_v20  ;;  %v3575_v22 = vpop.f32.mrb[17].mxu1  ;;  %v10246_v15 = vld [vmem:[#allocation26] ss:$8 sps:$4 sm:$0xff]   ;;  %v10249_v20 = vld [vmem:[#allocation26 + $0x10] ss:$8 sps:$4 sm:$0xff]  }
 0xa2b   : > { %v3576_v23 = vpop.f32.mrb[18].mxu1  ;;  %v10252_v22 = vld [vmem:[#allocation26 + $0x20] ss:$8 sps:$4 sm:$0xff]  }
 0xa2c   : > { %v3705_v24 = vadd.f32 %v3704_v17, %v3576_v23  ;;  %v3578_v25 = vpop.f32.mrb[19].mxu1  ;;  %v10257_v23 = vld [vmem:[#allocation26 + $0x34] ss:$8 sps:$4 sm:$0xff]  }
 0xa2d   : > { %v10260_v25 = vld [vmem:[#allocation26 + $0x44] ss:$8 sps:$4 sm:$0xff]  }
 0xa31   : > { %v3780_v26 = vpop.f32.mrb[20].mxu1 }
 0xa32   : > { %v3782_v27 = vpop.f32.mrb[21].mxu1 }
 0xa33   : > { %v3784_v28 = vpop.f32.mrb[22].mxu1 }
 0xa34   : > { %v3789_v29 = vpack.c.bf16 %v3784_v28, %v3780_v26  ;;  %v3786_v30 = vpop.f32.mrb[23].mxu1  ;;  %v10258_v26 = vld [vmem:[#allocation26 + $0x40] ss:$8 sps:$4 sm:$0xff]   ;;  %v10261_v28 = vld [vmem:[#allocation26 + $0x50] ss:$8 sps:$4 sm:$0xff]  }
 0xa35   : > { %v3790_v31 = vpack.c.bf16 %v3786_v30, %v3782_v27  ;;  %v10263_v27 = vld [vmem:[#allocation26 + $0x54] ss:$8 sps:$4 sm:$0xff]   ;;  %v10264_v30 = vld [vmem:[#allocation26 + $0x60] ss:$8 sps:$4 sm:$0xff]  }
 0xa37   : > { %8968 = vmatprep.mubr.msk.bf16.mxu1 %vm3535_vm2, %v3790_v31  ;;  %v10269_v31 = vld [vmem:[#allocation32 + $0x4] ss:$8 sps:$4 sm:$0xff]  }
 0xa38   : > { %3911 = vmatmul.mubr.bf16.vlgmr.msra.gmra.mrb[24].mxu1 %v3789_v29  ;;  %v10266_v29 = vld [vmem:[#allocation26 + $0x64] ss:$8 sps:$4 sm:$0xff]  }
 0xa39   : > { %9487 = vmatprep.mubr.msk.bf16.mxu1 %vm12351_vm3, %v12350_v32 }
 0xb0b   : > { %v3912_v33 = vpop.f32.mrb[24].mxu1 }
 0xb0c   : > { %v3919_v35 = vadd.f32 %v3912_v33, %v3702_v21  ;;  %v3914_v36 = vpop.f32.mrb[25].mxu1  ;;  %v10254_v21 = vld [vmem:[#allocation26 + $0x24] ss:$8 sps:$4 sm:$0xff]   ;;  %v10267_v33 = vld [vmem:[#allocation32] ss:$8 sps:$4 sm:$0xff]  }
 0xb0d   : > { %v3915_v37 = vpop.f32.mrb[26].mxu1  ;;  %v10275_v36 = vld [vmem:[#allocation32 + $0x24] ss:$8 sps:$4 sm:$0xff]  }
 0xb0e   : > { %v3928_v38 = vadd.f32 %v8969_v34, %v3919_v35  ;;  %v3920_v39 = vadd.f32 %v3915_v37, %v3705_v24  ;;  %v3917_v40 = vpop.f32.mrb[27].mxu1  ;;  %v10255_v24 = vld [vmem:[#allocation26 + $0x30] ss:$8 sps:$4 sm:$0xff]   ;;  %v10270_v35 = vld [vmem:[#allocation32 + $0x10] ss:$8 sps:$4 sm:$0xff]  }
 0xb0f   : > { %v10273_v37 = vld [vmem:[#allocation32 + $0x20] ss:$8 sps:$4 sm:$0xff]   ;;  %v10281_v40 = vld [vmem:[#allocation32 + $0x44] ss:$8 sps:$4 sm:$0xff]  }
 0xb10   : > { %v3929_v41 = vadd.f32 %v8969_v34, %v3920_v39  ;;  %v3930_v42 = vmax.f32 %v3928_v38, 0.0  ;;  %v10272_v34 = vld [vmem:[#allocation32 + $0x14] ss:$8 sps:$4 sm:$0xff]   ;;  %v10276_v39 = vld [vmem:[#allocation32 + $0x30] ss:$8 sps:$4 sm:$0xff]  }
 0xb11   : > { %v10278_v38 = vld [vmem:[#allocation32 + $0x34] ss:$8 sps:$4 sm:$0xff]  }
 0xb12   : > { %v3931_v43 = vmax.f32 %v3929_v41, 0.0  ;;  %v10279_v41 = vld [vmem:[#allocation32 + $0x40] ss:$8 sps:$4 sm:$0xff]  }
 0xb14   : > { %v3932_v44 = vpack.c.bf16 %v3931_v43, %v3930_v42  ;;  %v10284_v42 = vld [vmem:[#allocation32 + $0x54] ss:$8 sps:$4 sm:$0xff]   ;;  %v10282_v43 = vld [vmem:[#allocation32 + $0x50] ss:$8 sps:$4 sm:$0xff]  }
 0xb16   : > { %v3960_v45 = vsel %vm3958_vm4, %v3932_v44, 0  ;;  %v10287_v44 = vld [vmem:[#allocation32 + $0x64] ss:$8 sps:$4 sm:$0xff]  }
 0xb17   : > { %9474 = vmatpush3.bf16.msra.mxu0 %v3960_v45  ;;  %9486 = vmatpush3.bf16.msra.mxu1 %v3960_v45 }
 0xb18   : > { %9479 = vmatprep.subr.bf16.mxu0 %v12350_v32 }
 0xb1a   : > { %9476 = vmatmul.mubr.msk.bf16.vlgmr.msra.gmra.mrb[16].mxu0 %vm3954_vm5, %v10222_v46  ;;  %9488 = vmatmul.mubr.msk.bf16.vlgmr.msra.gmra.mrb[28].mxu1 %vm3954_vm5, %v10224_v47  ;;  %v10302_v46 = vld [vmem:[#allocation37] sm:$0xff]   ;;  %v10303_v47 = vld [vmem:[#allocation37 + $0x8] sm:$0xff]  }
 0xb1b   : > { %9480 = vmatpush3.bf16.msra.mxu0 %v3960_v45  ;;  %9481 = vmatprep.mubr.msk.bf16.mxu0 %vm12351_vm3, %v12350_v32  ;;  %v10285_v45 = vld [vmem:[#allocation32 + $0x60] ss:$8 sps:$4 sm:$0xff]  }
 0xb1c   : > { %4144 = vmatprep.subr.bf16.mxu0 %v10227_v48  ;;  %4581 = vmatprep.mubr.bf16.mxu1 %v12349_v18  ;;  %v10304_v48 = vld [vmem:[#allocation37 + $0x10] sm:$0xff]  }
 0xb22   : > { %9482 = vmatmul.mubr.msk.bf16.vlgmr.msra.gmra.mrb[20].mxu0 %vm3954_vm5, %v10223_v49  ;;  %v10305_v49 = vld [vmem:[#allocation37 + $0x18] sm:$0xff]  }
 0xb23   : > { %4145 = vmatpush1.bf16.msra.mxu0 %v10225_v50  ;;  %4176 = vmatprep.mubr.bf16.mxu0 %v12349_v18  ;;  %v10306_v50 = vld [vmem:[#allocation37 + $0x20] sm:$0xff]  }
 0xb24   : > { %4146 = vmatprep.subr.bf16.mxu0 %v10230_v51  ;;  %v10307_v51 = vld [vmem:[#allocation37 + $0x28] sm:$0xff]  }
 0xb27   : > { %4147 = vmatpush1.bf16.msra.mxu0 %v10228_v52  ;;  %v10308_v52 = vld [vmem:[#allocation37 + $0x30] sm:$0xff]  }
 0xb28   : > { %4148 = vmatprep.subr.bf16.mxu0 %v10233_v53  ;;  %v10309_v53 = vld [vmem:[#allocation37 + $0x38] sm:$0xff]  }
 0xb2b   : > { %4149 = vmatpush1.bf16.msra.mxu0 %v10231_v54  ;;  %v10310_v54 = vld [vmem:[#allocation37 + $0x40] sm:$0xff]  }
 0xb2c   : > { %4150 = vmatprep.subr.bf16.mxu0 %v10236_v55  ;;  %v10311_v55 = vld [vmem:[#allocation37 + $0x48] sm:$0xff]  }
 0xb2f   : > { %4151 = vmatpush1.bf16.msra.mxu0 %v10234_v56  ;;  %v10312_v56 = vld [vmem:[#allocation37 + $0x50] sm:$0xff]  }
 0xb30   : > { %4152 = vmatprep.subr.bf16.mxu0 %v10239_v57  ;;  %v10313_v57 = vld [vmem:[#allocation37 + $0x58] sm:$0xff]  }
 0xb33   : > { %4153 = vmatpush1.bf16.msra.mxu0 %v10237_v58  ;;  %v4489_v58 = vld [vmem:[#allocation34] sm:$0x3] }
 0xb34   : > { %4154 = vmatprep.subr.bf16.mxu0 %v10242_v62  ;;  %v4494_v62 = vrot.slane %v4489_v58, %v13663_v59 }
 0xb37   : > { %4155 = vmatpush1.bf16.msra.mxu0 %v10240_v60  ;;  %v10314_v60 = vld [vmem:[#allocation37 + $0x60] sm:$0xff]  }
 0xb38   : > { %4156 = vmatprep.subr.bf16.mxu0 %v10245_v63  ;;  %v4498_v63 = vrot.slane %v4489_v58, %v13665_v61  ;;  %v10327_v58 = vld [vmem:[#allocation43 + $0x58] sm:$0xff]  }
 0xb3b   : > { %4157 = vmatpush1.bf16.msra.mxu0 %v10243_v0 }
 0xb3c   : > { %4260 = vmatprep.subr.bf16.mxu0 %v10248_v1 }
 0xbed   : > { %v3996_v2 = vpop.f32.mrb[16].mxu0  ;;  %v13748_v3 = vpop.f32.mrb[28].mxu1 }
 0xbee   : > { %v9477_v4 = vpop.f32.mrb[17].mxu0  ;;  %v9489_v5 = vpop.f32.mrb[29].mxu1 }
 0xbef   : > { %v3999_v6 = vpop.f32.mrb[18].mxu0  ;;  %v13750_v7 = vpop.f32.mrb[30].mxu1 }
 0xbf0   : > { %v4003_v8 = vpack.c.bf16 %v3999_v6, %v3996_v2  ;;  %v9478_v9 = vpop.f32.mrb[19].mxu0  ;;  %v4368_v10 = vpack.c.bf16 %v13750_v7, %v13748_v3  ;;  %v9490_v11 = vpop.f32.mrb[31].mxu1 }
 0xbf5   : > { %v4062_v12 = vpop.f32.mrb[20].mxu0 }
 0xbf6   : > { %v9483_v13 = vpop.f32.mrb[21].mxu0 }
 0xbf7   : > { %v4065_v14 = vpop.f32.mrb[22].mxu0 }
 0xbf8   : > { %v4069_v16 = vpack.c.bf16 %v4065_v14, %v4062_v12  ;;  %v9484_v17 = vpop.f32.mrb[23].mxu0 }
 0xbf9   : > { %v10288_v17 = vld [vmem:[#allocation40] sm:$0xff]  }
 0xbfa   : > { %8988 = vmatmul.mubr.msk.bf16.vlgmr.msra.gmra.mrb[24].mxu0 %vm4140_vm6, %v4069_v16  ;;  %v4592_v16 = vld [vmem:[#allocation38] sm:$0xf] }
 0xbfb   : > { %4261 = vmatpush1.bf16.msra.mxu0 %v10246_v15  ;;  %4292 = vmatprep.mubr.bf16.mxu0 %v12349_v18  ;;  %v4511_v15 = vld [vmem:[#allocation35] sm:$0xf] }
 0xbfc   : > { %4262 = vmatprep.subr.bf16.mxu0 %v10251_v19  ;;  %v10289_v19 = vld [vmem:[#allocation40 + $0x8] sm:$0xff]  }
 0xbff   : > { %4263 = vmatpush1.bf16.msra.mxu0 %v10249_v20  ;;  %v10290_v20 = vld [vmem:[#allocation40 + $0x10] sm:$0xff]  }
 0xc00   : > { %4264 = vmatprep.subr.bf16.mxu0 %v10254_v21  ;;  %v10291_v21 = vld [vmem:[#allocation40 + $0x18] sm:$0xff]  }
 0xc03   : > { %4265 = vmatpush1.bf16.msra.mxu0 %v10252_v22  ;;  %v10292_v22 = vld [vmem:[#allocation40 + $0x20] sm:$0xff]  }
 0xc04   : > { %4266 = vmatprep.subr.bf16.mxu0 %v10257_v23  ;;  %v10293_v23 = vld [vmem:[#allocation40 + $0x28] sm:$0xff]  }
 0xc07   : > { %4267 = vmatpush1.bf16.msra.mxu0 %v10255_v24  ;;  %v10294_v24 = vld [vmem:[#allocation40 + $0x30] sm:$0xff]  }
 0xc08   : > { %4268 = vmatprep.subr.bf16.mxu0 %v10260_v25  ;;  %v10295_v25 = vld [vmem:[#allocation40 + $0x38] sm:$0xff]  }
 0xc0b   : > { %4269 = vmatpush1.bf16.msra.mxu0 %v10258_v26  ;;  %v10296_v26 = vld [vmem:[#allocation40 + $0x40] sm:$0xff]  }
 0xc0c   : > { %4270 = vmatprep.subr.bf16.mxu0 %v10263_v27  ;;  %v10297_v27 = vld [vmem:[#allocation40 + $0x48] sm:$0xff]  }
 0xc0f   : > { %4271 = vmatpush1.bf16.msra.mxu0 %v10261_v28  ;;  %v10298_v28 = vld [vmem:[#allocation40 + $0x50] sm:$0xff]  }
 0xc10   : > { %4272 = vmatprep.subr.bf16.mxu0 %v10266_v29  ;;  %v10299_v29 = vld [vmem:[#allocation40 + $0x58] sm:$0xff]  }
 0xc13   : > { %4273 = vmatpush1.bf16.msra.mxu0 %v10264_v30  ;;  %v10300_v30 = vld [vmem:[#allocation40 + $0x60] sm:$0xff]  }
 0xc14   : > { %4442 = vmatprep.subr.bf16.mxu0 %v10269_v31  ;;  %v10301_v31 = vld [vmem:[#allocation40 + $0x68] sm:$0xff]  }
 0xc16   : > { %9003 = vmatmul.mubr.msk.bf16.vlgmr.msra.gmra.mrb[24].mxu0 %vm4140_vm6, %v4003_v8 }
 0xc17   : > { %4443 = vmatpush1.bf16.msra.mxu0 %v10267_v33  ;;  %4474 = vmatprep.mubr.bf16.mxu0 %v12349_v18  ;;  %v10315_v33 = vld [vmem:[#allocation37 + $0x68] sm:$0xff]  }
 0xc18   : > { %4444 = vmatprep.subr.bf16.mxu0 %v10272_v34 }
 0xc1b   : > { %4445 = vmatpush1.bf16.msra.mxu0 %v10270_v35 }
 0xc1c   : > { %4446 = vmatprep.subr.bf16.mxu0 %v10275_v36 }
 0xc1f   : > { %4447 = vmatpush1.bf16.msra.mxu0 %v10273_v37 }
 0xc20   : > { %4448 = vmatprep.subr.bf16.mxu0 %v10278_v38 }
 0xc23   : > { %4449 = vmatpush1.bf16.msra.mxu0 %v10276_v39 }
 0xc24   : > { %4450 = vmatprep.subr.bf16.mxu0 %v10281_v40 }
 0xc27   : > { %4451 = vmatpush1.bf16.msra.mxu0 %v10279_v41 }
 0xc28   : > { %4452 = vmatprep.subr.bf16.mxu0 %v10284_v42 }
 0xc2b   : > { %4453 = vmatpush1.bf16.msra.mxu0 %v10282_v43 }
 0xc2c   : > { %4454 = vmatprep.subr.bf16.mxu0 %v10287_v44 }
 0xc2f   : > { %4455 = vmatpush1.bf16.msra.mxu0 %v10285_v45 }
 0xc30   : > { %4881 = vmatprep.subr.bf16.mxu0 %v12349_v18 }
 0xc32   : > { %9020 = vmatmul.mubr.msk.bf16.vlgmr.msra.gmra.mrb[24].mxu0 %vm4140_vm6, %v4368_v10 }
 0xc33   : > { %4882 = vmatpush1.bf16.msra.mxu0 %v10302_v46  ;;  %v4921_v46 = vld [vmem:[#allocation41] sm:$0xf] }
 0xc34   : > { %4883 = vmatprep.subr.bf16.mxu0 %v12349_v18 }
 0xc37   : > { %4884 = vmatpush1.bf16.msra.mxu0 %v10303_v47  ;;  %v10316_v47 = vld [vmem:[#allocation43] sm:$0xff]  }
 0xc38   : > { %4885 = vmatprep.subr.bf16.mxu0 %v12349_v18 }
 0xc3b   : > { %4886 = vmatpush1.bf16.msra.mxu0 %v10304_v48  ;;  %v10317_v48 = vld [vmem:[#allocation43 + $0x8] sm:$0xff]  }
 0xc3c   : > { %4887 = vmatprep.subr.bf16.mxu0 %v12349_v18 }
 0xc3f   : > { %4888 = vmatpush1.bf16.msra.mxu0 %v10305_v49  ;;  %v10318_v49 = vld [vmem:[#allocation43 + $0x10] sm:$0xff]  }
 0xc40   : > { %4889 = vmatprep.subr.bf16.mxu0 %v12349_v18 }
 0xc43   : > { %4890 = vmatpush1.bf16.msra.mxu0 %v10306_v50  ;;  %v10319_v50 = vld [vmem:[#allocation43 + $0x18] sm:$0xff]  }
 0xc44   : > { %4891 = vmatprep.subr.bf16.mxu0 %v12349_v18 }
 0xc47   : > { %4892 = vmatpush1.bf16.msra.mxu0 %v10307_v51  ;;  %v10320_v51 = vld [vmem:[#allocation43 + $0x20] sm:$0xff]  }
 0xc48   : > { %4893 = vmatprep.subr.bf16.mxu0 %v12349_v18 }
 0xc4b   : > { %4894 = vmatpush1.bf16.msra.mxu0 %v10308_v52  ;;  %v10321_v52 = vld [vmem:[#allocation43 + $0x28] sm:$0xff]  }
 0xc4c   : > { %4895 = vmatprep.subr.bf16.mxu0 %v12349_v18 }
 0xc4f   : > { %4896 = vmatpush1.bf16.msra.mxu0 %v10309_v53  ;;  %v10322_v53 = vld [vmem:[#allocation43 + $0x30] sm:$0xff]  }
 0xc50   : > { %4897 = vmatprep.subr.bf16.mxu0 %v12349_v18 }
 0xc53   : > { %4898 = vmatpush1.bf16.msra.mxu0 %v10310_v54  ;;  %v10323_v54 = vld [vmem:[#allocation43 + $0x38] sm:$0xff]  }
 0xc54   : > { %4899 = vmatprep.subr.bf16.mxu0 %v12349_v18 }
 0xc57   : > { %4900 = vmatpush1.bf16.msra.mxu0 %v10311_v55  ;;  %v10324_v55 = vld [vmem:[#allocation43 + $0x40] sm:$0xff]  }
 0xc58   : > { %4901 = vmatprep.subr.bf16.mxu0 %v12349_v18 }
 0xc5b   : > { %4902 = vmatpush1.bf16.msra.mxu0 %v10312_v56  ;;  %v10325_v56 = vld [vmem:[#allocation43 + $0x48] sm:$0xff]  }
 0xc5c   : > { %4903 = vmatprep.subr.bf16.mxu0 %v12349_v18 }
 0xc5f   : > { %4904 = vmatpush1.bf16.msra.mxu0 %v10313_v57  ;;  %v10326_v57 = vld [vmem:[#allocation43 + $0x50] sm:$0xff]  }
 0xc60   : > { %4905 = vmatprep.subr.bf16.mxu0 %v12349_v18 }
 0xc63   : > { %4906 = vmatpush1.bf16.msra.mxu0 %v10314_v60  ;;  %v10328_v60 = vld [vmem:[#allocation43 + $0x60] sm:$0xff]  }
 0xc64   : > { %4907 = vmatprep.subr.bf16.mxu0 %v12349_v18 }
 0xc67   : > { %4908 = vmatpush1.bf16.msra.mxu0 %v10315_v33 }
 0xc68   : > { %9491 = vmatprep.subr.bf16.mxu0 %v12350_v32 }
 0xd05   : > { %v4476_v0 = vpop.f32.mrb[24].mxu0 }
 0xd06   : > { %v4501_v1 = vadd.f32 %v4494_v62, %v4476_v0  ;;  %v4478_v2 = vpop.f32.mrb[25].mxu0 }
 0xd07   : > { %v4502_v3 = vadd.f32 %v4498_v63, %v4478_v2  ;;  %v4480_v4 = vpop.f32.mrb[26].mxu0 }
 0xd08   : > { %v4503_v5 = vadd.f32 %v4494_v62, %v4480_v4  ;;  %v4482_v6 = vpop.f32.mrb[27].mxu0  ;;  %v4505_v8 = vmax.f32 %v4501_v1, 0.0  ;;  %v10329_v62 = vld [vmem:[#allocation43 + $0x68] sm:$0xff]  }
 0xd09   : > { %v4504_v7 = vadd.f32 %v4498_v63, %v4482_v6  ;;  %v4506_v10 = vmax.f32 %v4502_v3, 0.0 }
 0xd0a   : > { %v4507_v9 = vmax.f32 %v4503_v5, 0.0 }
 0xd0b   : > { %v4508_v11 = vmax.f32 %v4504_v7, 0.0 }
 0xd0c   : > { %v4509_v12 = vpack.c.bf16 %v4507_v9, %v4505_v8 }
 0xd0d   : > { %v4510_v13 = vpack.c.bf16 %v4508_v11, %v4506_v10 }
 0xd0e   : > { %v13779_v14 = vsel %vm3958_vm4, %v4509_v12, 0 }
 0xd0f   : > { %9021 = vmatprep.subr.msk.bf16.mxu1 %vm3958_vm4, %v4510_v13 }
 0xd10   : > { %4550 = vmatpush1.bf16.msra.mxu1 %v13779_v14 }
 0xd11   : > { %9023 = vmatprep.subr.msk.bf16.mxu1 %vm3958_vm4, %v4510_v13 }
 0xd13   : > { %9022 = vmatmul.mubr.msk.bf16.vlgmr.msra.gmra.mrb[32].mxu1 %vm3954_vm5, %v4511_v15  ;;  %v10332_v15 = vld [vmem:[#allocation47 + $0x4] ss:$8 sps:$4 sm:$0xff]  }
 0xd14   : > { %4625 = vmatpush1.bf16.msra.mxu1 %v13779_v14  ;;  %4656 = vmatprep.mubr.bf16.mxu1 %v12349_v18 }
 0xd15   : > { %4754 = vmatprep.subr.bf16.mxu1 %v12349_v18 }
 0xd1b   : > { %9024 = vmatmul.mubr.msk.bf16.vlgmr.msra.gmra.mrb[36].mxu1 %vm3954_vm5, %v4592_v16  ;;  %v10335_v16 = vld [vmem:[#allocation47 + $0x14] ss:$8 sps:$4 sm:$0xff]  }
 0xd1c   : > { %4755 = vmatpush1.bf16.msra.mxu1 %v10288_v17  ;;  %v10333_v17 = vld [vmem:[#allocation47 + $0x10] ss:$8 sps:$4 sm:$0xff]  }
 0xd1d   : > { %4756 = vmatprep.subr.bf16.mxu1 %v12349_v18 }
 0xd20   : > { %4757 = vmatpush1.bf16.msra.mxu1 %v10289_v19  ;;  %v10341_v19 = vld [vmem:[#allocation47 + $0x24] ss:$8 sps:$4 sm:$0xff]  }
 0xd21   : > { %4758 = vmatprep.subr.bf16.mxu1 %v12349_v18 }
 0xd24   : > { %4759 = vmatpush1.bf16.msra.mxu1 %v10290_v20  ;;  %v10339_v20 = vld [vmem:[#allocation47 + $0x20] ss:$8 sps:$4 sm:$0xff]  }
 0xd25   : > { %4760 = vmatprep.subr.bf16.mxu1 %v12349_v18 }
 0xd28   : > { %4761 = vmatpush1.bf16.msra.mxu1 %v10291_v21  ;;  %v10347_v21 = vld [vmem:[#allocation47 + $0x34] ss:$8 sps:$4 sm:$0xff]  }
 0xd29   : > { %4762 = vmatprep.subr.bf16.mxu1 %v12349_v18 }
 0xd2c   : > { %4763 = vmatpush1.bf16.msra.mxu1 %v10292_v22  ;;  %v10345_v22 = vld [vmem:[#allocation47 + $0x30] ss:$8 sps:$4 sm:$0xff]  }
 0xd2d   : > { %4764 = vmatprep.subr.bf16.mxu1 %v12349_v18 }
 0xd30   : > { %4765 = vmatpush1.bf16.msra.mxu1 %v10293_v23  ;;  %v10353_v23 = vld [vmem:[#allocation47 + $0x44] ss:$8 sps:$4 sm:$0xff]  }
 0xd31   : > { %4766 = vmatprep.subr.bf16.mxu1 %v12349_v18 }
 0xd34   : > { %4767 = vmatpush1.bf16.msra.mxu1 %v10294_v24  ;;  %v10351_v24 = vld [vmem:[#allocation47 + $0x40] ss:$8 sps:$4 sm:$0xff]  }
 0xd35   : > { %4768 = vmatprep.subr.bf16.mxu1 %v12349_v18 }
 0xd38   : > { %4769 = vmatpush1.bf16.msra.mxu1 %v10295_v25  ;;  %v10359_v25 = vld [vmem:[#allocation47 + $0x54] ss:$8 sps:$4 sm:$0xff]  }
 0xd39   : > { %4770 = vmatprep.subr.bf16.mxu1 %v12349_v18 }
 0xd3c   : > { %4771 = vmatpush1.bf16.msra.mxu1 %v10296_v26  ;;  %v10357_v26 = vld [vmem:[#allocation47 + $0x50] ss:$8 sps:$4 sm:$0xff]  }
 0xd3d   : > { %4772 = vmatprep.subr.bf16.mxu1 %v12349_v18 }
 0xd40   : > { %4773 = vmatpush1.bf16.msra.mxu1 %v10297_v27  ;;  %v10365_v27 = vld [vmem:[#allocation47 + $0x64] ss:$8 sps:$4 sm:$0xff]  }
 0xd41   : > { %4774 = vmatprep.subr.bf16.mxu1 %v12349_v18 }
 0xd44   : > { %4775 = vmatpush1.bf16.msra.mxu1 %v10298_v28  ;;  %v10363_v28 = vld [vmem:[#allocation47 + $0x60] ss:$8 sps:$4 sm:$0xff]  }
 0xd45   : > { %4776 = vmatprep.subr.bf16.mxu1 %v12349_v18 }
 0xd48   : > { %4777 = vmatpush1.bf16.msra.mxu1 %v10299_v29 }
 0xd49   : > { %4778 = vmatprep.subr.bf16.mxu1 %v12349_v18 }
 0xd4c   : > { %4779 = vmatpush1.bf16.msra.mxu1 %v10300_v30  ;;  %v9072_v30 = vld [vmem:[#allocation44] ss:$0 sm:$0xff] }
 0xd4d   : > { %4780 = vmatprep.subr.bf16.mxu1 %v12349_v18 }
 0xd50   : > { %4781 = vmatpush1.bf16.msra.mxu1 %v10301_v31 }
 0xd51   : > { %9055 = vmatprep.subr.msk.bf16.mxu1 %vm3958_vm4, %v4510_v13 }
 0xde6   : > { %v4583_v34 = vpop.f32.mrb[32].mxu1 }
 0xde7   : > { %v4585_v35 = vpop.f32.mrb[33].mxu1  ;;  %v4590_v38 = vpack.c.bf16 %v4583_v34, %v4583_v34 }
 0xde8   : > { %v4591_v36 = vpack.c.bf16 %v4585_v35, %v4585_v35  ;;  %v4587_v37 = vpop.f32.mrb[34].mxu1 }
 0xde9   : > { %v4588_v39 = vpop.f32.mrb[35].mxu1 }
 0xdea   : > { %9054 = vmatprep.mubr.msk.bf16.mxu0 %vm3535_vm2, %v4591_v36  ;;  %v12352_v36 = vmov 65535  }
 0xdeb   : > { %4914 = vmatmul.mubr.bf16.vlgmr.msra.gmra.mrb[28].mxu0 %v4590_v38  ;;  %v5155_v37 = vsel %vm5153_vm7, 4294967295, %v12352_v36 }
 0xdec   : > { %9493 = vmatprep.mubr.msk.bf16.mxu0 %vm12351_vm3, %v12350_v32 }
 0xdee   : > { %v4658_v40 = vpop.f32.mrb[36].mxu1 }
 0xdef   : > { %v4660_v41 = vpop.f32.mrb[37].mxu1  ;;  %v4665_v44 = vpack.c.bf16 %v4658_v40, %v4658_v40  ;;  %v13827_v40 = vsel %vm5154_vm8, %v5155_v37, 0 }
 0xdf0   : > { %v4666_v42 = vpack.c.bf16 %v4660_v41, %v4660_v41  ;;  %v4662_v43 = vpop.f32.mrb[38].mxu1 }
 0xdf1   : > { %v4663_v45 = vpop.f32.mrb[39].mxu1  ;;  %v5134_v43 = vld [vmem:[#allocation46] sm:$0xf] }
 0xdf2   : > { %9039 = vmatprep.mubr.msk.bf16.mxu1 %vm3535_vm2, %v4666_v42  ;;  %v5201_v45 = vld [vmem:[#allocation49] sm:$0xf] }
 0xdf3   : > { %4787 = vmatmul.mubr.bf16.vlgmr.msra.gmra.mrb[40].mxu1 %v4665_v44  ;;  %v10338_v44 = vld [vmem:[#allocation50 + $0x4] ss:$8 sps:$4 sm:$0xff]  }
 0xdf4   : > { %4954 = vmatpush1.bf16.msra.mxu1 %v13779_v14  ;;  %4985 = vmatprep.mubr.bf16.mxu1 %v12349_v18  ;;  %v10330_v14 = vld [vmem:[#allocation47] ss:$8 sps:$4 sm:$0xff]  }
 0xdf5   : > { %5083 = vmatprep.subr.bf16.mxu1 %v12349_v18 }
 0xdfb   : > { %9056 = vmatmul.mubr.msk.bf16.vlgmr.msra.gmra.mrb[44].mxu1 %vm3954_vm5, %v4921_v46  ;;  %v10336_v46 = vld [vmem:[#allocation50] ss:$8 sps:$4 sm:$0xff]  }
 0xdfc   : > { %5084 = vmatpush1.bf16.msra.mxu1 %v10316_v47  ;;  %v10344_v47 = vld [vmem:[#allocation50 + $0x14] ss:$8 sps:$4 sm:$0xff]  }
 0xdfd   : > { %5085 = vmatprep.subr.bf16.mxu1 %v12349_v18 }
 0xe00   : > { %5086 = vmatpush1.bf16.msra.mxu1 %v10317_v48  ;;  %v10342_v48 = vld [vmem:[#allocation50 + $0x10] ss:$8 sps:$4 sm:$0xff]  }
 0xe01   : > { %5087 = vmatprep.subr.bf16.mxu1 %v12349_v18 }
 0xe04   : > { %5088 = vmatpush1.bf16.msra.mxu1 %v10318_v49  ;;  %v10350_v49 = vld [vmem:[#allocation50 + $0x24] ss:$8 sps:$4 sm:$0xff]  }
 0xe05   : > { %5089 = vmatprep.subr.bf16.mxu1 %v12349_v18 }
 0xe08   : > { %5090 = vmatpush1.bf16.msra.mxu1 %v10319_v50  ;;  %v10348_v50 = vld [vmem:[#allocation50 + $0x20] ss:$8 sps:$4 sm:$0xff]  }
 0xe09   : > { %5091 = vmatprep.subr.bf16.mxu1 %v12349_v18 }
 0xe0c   : > { %5092 = vmatpush1.bf16.msra.mxu1 %v10320_v51  ;;  %v10356_v51 = vld [vmem:[#allocation50 + $0x34] ss:$8 sps:$4 sm:$0xff]  }
 0xe0d   : > { %5093 = vmatprep.subr.bf16.mxu1 %v12349_v18 }
 0xe10   : > { %5094 = vmatpush1.bf16.msra.mxu1 %v10321_v52  ;;  %v10354_v52 = vld [vmem:[#allocation50 + $0x30] ss:$8 sps:$4 sm:$0xff]  }
 0xe11   : > { %5095 = vmatprep.subr.bf16.mxu1 %v12349_v18 }
 0xe14   : > { %5096 = vmatpush1.bf16.msra.mxu1 %v10322_v53  ;;  %v10362_v53 = vld [vmem:[#allocation50 + $0x44] ss:$8 sps:$4 sm:$0xff]  }
 0xe15   : > { %5097 = vmatprep.subr.bf16.mxu1 %v12349_v18 }
 0xe18   : > { %5098 = vmatpush1.bf16.msra.mxu1 %v10323_v54  ;;  %v10360_v54 = vld [vmem:[#allocation50 + $0x40] ss:$8 sps:$4 sm:$0xff]  }
 0xe19   : > { %5099 = vmatprep.subr.bf16.mxu1 %v12349_v18 }
 0xe1c   : > { %5100 = vmatpush1.bf16.msra.mxu1 %v10324_v55  ;;  %v10368_v55 = vld [vmem:[#allocation50 + $0x54] ss:$8 sps:$4 sm:$0xff]  }
 0xe1d   : > { %5101 = vmatprep.subr.bf16.mxu1 %v12349_v18 }
 0xe20   : > { %5102 = vmatpush1.bf16.msra.mxu1 %v10325_v56  ;;  %v10366_v56 = vld [vmem:[#allocation50 + $0x50] ss:$8 sps:$4 sm:$0xff]  }
 0xe21   : > { %5103 = vmatprep.subr.bf16.mxu1 %v12349_v18 }
 0xe24   : > { %5104 = vmatpush1.bf16.msra.mxu1 %v10326_v57  ;;  %v10371_v57 = vld [vmem:[#allocation50 + $0x64] ss:$8 sps:$4 sm:$0xff]  }
 0xe25   : > { %5105 = vmatprep.subr.bf16.mxu1 %v12349_v18 }
 0xe28   : > { %5106 = vmatpush1.bf16.msra.mxu1 %v10327_v58  ;;  %v10369_v58 = vld [vmem:[#allocation50 + $0x60] ss:$8 sps:$4 sm:$0xff]  }
 0xe29   : > { %5107 = vmatprep.subr.bf16.mxu1 %v12349_v18 }
 0xe2c   : > { %5108 = vmatpush1.bf16.msra.mxu1 %v10328_v60 }
 0xe2d   : > { %5109 = vmatprep.subr.bf16.mxu1 %v12349_v18 }
 0xe30   : > { %5110 = vmatpush1.bf16.msra.mxu1 %v10329_v62 }
 0xe31   : > { %5447 = vmatprep.subr.bf16.mxu1 %v10332_v15  ;;  %v10381_v15 = vld [vmem:[#allocation53 + $0x30] ss:$8 sps:$4 sm:$0xff]  }
 0xebe   : > { %v4915_v63 = vpop.f32.mrb[28].mxu0 }
 0xebf   : > { %v4917_v0 = vpop.f32.mrb[29].mxu0 }
 0xec0   : > { %v4918_v1 = vpop.f32.mrb[30].mxu0 }
 0xec1   : > { %v4919_v2 = vpop.f32.mrb[31].mxu0 }
 0xec6   : > { %v4788_v3 = vpop.f32.mrb[40].mxu1 }
 0xec7   : > { %v4916_v4 = vadd.f32 %v4915_v63, %v4788_v3  ;;  %v4790_v5 = vpop.f32.mrb[41].mxu1 }
 0xec8   : > { %v4791_v6 = vpop.f32.mrb[42].mxu1  ;;  %v10374_v5 = vld [vmem:[#allocation53 + $0x4] ss:$8 sps:$4 sm:$0xff]  }
 0xec9   : > { %v4792_v7 = vpop.f32.mrb[43].mxu1 }
 0xece   : > { %v4987_v8 = vpop.f32.mrb[44].mxu1 }
 0xecf   : > { %v4989_v9 = vpop.f32.mrb[45].mxu1  ;;  %v4994_v12 = vpack.c.bf16 %v4987_v8, %v4987_v8  ;;  %v5488_v8 = vld [vmem:[#allocation52] sm:$0xf] }
 0xed0   : > { %v4995_v10 = vpack.c.bf16 %v4989_v9, %v4989_v9  ;;  %v4991_v11 = vpop.f32.mrb[46].mxu1  ;;  %v10372_v9 = vld [vmem:[#allocation53] ss:$8 sps:$4 sm:$0xff]  }
 0xed1   : > { %v4992_v13 = vpop.f32.mrb[47].mxu1  ;;  %v10375_v11 = vld [vmem:[#allocation53 + $0x10] ss:$8 sps:$4 sm:$0xff]  }
 0xed2   : > { %9071 = vmatprep.mubr.msk.bf16.mxu1 %vm3535_vm2, %v4995_v10  ;;  %v10377_v10 = vld [vmem:[#allocation53 + $0x14] ss:$8 sps:$4 sm:$0xff]   ;;  %v10378_v13 = vld [vmem:[#allocation53 + $0x20] ss:$8 sps:$4 sm:$0xff]  }
 0xed3   : > { %5116 = vmatmul.mubr.bf16.vlgmr.msra.gmra.mrb[48].mxu1 %v4994_v12  ;;  %v10380_v12 = vld [vmem:[#allocation53 + $0x24] ss:$8 sps:$4 sm:$0xff]  }
 0xed4   : > { %5479 = vmatprep.mubr.bf16.mxu1 %v12349_v18  ;;  %5448 = vmatpush1.bf16.msra.mxu1 %v10330_v14  ;;  %v10383_v14 = vld [vmem:[#allocation53 + $0x34] ss:$8 sps:$4 sm:$0xff]  }
 0xed5   : > { %5449 = vmatprep.subr.bf16.mxu1 %v10335_v16  ;;  %v10386_v16 = vld [vmem:[#allocation53 + $0x44] ss:$8 sps:$4 sm:$0xff]  }
 0xed8   : > { %5450 = vmatpush1.bf16.msra.mxu1 %v10333_v17  ;;  %v10384_v17 = vld [vmem:[#allocation53 + $0x40] ss:$8 sps:$4 sm:$0xff]  }
 0xed9   : > { %5451 = vmatprep.subr.bf16.mxu1 %v10341_v19  ;;  %v10389_v19 = vld [vmem:[#allocation53 + $0x54] ss:$8 sps:$4 sm:$0xff]  }
 0xedc   : > { %5452 = vmatpush1.bf16.msra.mxu1 %v10339_v20  ;;  %v10387_v20 = vld [vmem:[#allocation53 + $0x50] ss:$8 sps:$4 sm:$0xff]  }
 0xedd   : > { %5453 = vmatprep.subr.bf16.mxu1 %v10347_v21  ;;  %v10392_v21 = vld [vmem:[#allocation53 + $0x64] ss:$8 sps:$4 sm:$0xff]  }
 0xee0   : > { %5454 = vmatpush1.bf16.msra.mxu1 %v10345_v22  ;;  %v10390_v22 = vld [vmem:[#allocation53 + $0x60] ss:$8 sps:$4 sm:$0xff]  }
 0xee1   : > { %5455 = vmatprep.subr.bf16.mxu1 %v10353_v23 }
 0xee4   : > { %5456 = vmatpush1.bf16.msra.mxu1 %v10351_v24 }
 0xee5   : > { %5457 = vmatprep.subr.bf16.mxu1 %v10359_v25 }
 0xee8   : > { %5458 = vmatpush1.bf16.msra.mxu1 %v10357_v26 }
 0xee9   : > { %5459 = vmatprep.subr.bf16.mxu1 %v10365_v27 }
 0xeec   : > { %5460 = vmatpush1.bf16.msra.mxu1 %v10363_v28 }
 0xfa6   : > { %v5117_v29 = vpop.f32.mrb[48].mxu1 }
 0xfa7   : > { %v5123_v31 = vadd.f32 %v5117_v29, %v4916_v4  ;;  %v5119_v33 = vpop.f32.mrb[49].mxu1 }
 0xfa8   : > { %v5120_v34 = vpop.f32.mrb[50].mxu1 }
 0xfa9   : > { %v5131_v35 = vadd.f32 %v9072_v30, %v5123_v31  ;;  %v5121_v38 = vpop.f32.mrb[51].mxu1 }
 0xfab   : > { %v5132_v39 = vmax.f32 %v5131_v35, 0.0  ;;  %v10393_v35 = vld [vmem:[#allocation59] sm:$0xff]  }
 0xfad   : > { %v5133_v41 = vpack.c.bf16 %v5132_v39, %v5132_v39 }
 0xfaf   : > { %v5158_v42 = vand.u32 %v13827_v40, %v5133_v41  ;;  %v10394_v41 = vld [vmem:[#allocation59 + $0x8] sm:$0xff]  }
 0xfb1   : > { %9492 = vmatpush3.bf16.msra.mxu0 %v5158_v42 }
 0xfb2   : > { %9497 = vmatprep.subr.bf16.mxu0 %v12350_v32 }
 0xfb4   : > { %9494 = vmatmul.mubr.msk.bf16.vlgmr.msra.gmra.mrb[32].mxu0 %vm5149_vm9, %v5134_v43  ;;  %v10396_v43 = vld [vmem:[#allocation59 + $0x18] sm:$0xff]  }
 0xfb5   : > { %9498 = vmatpush3.bf16.msra.mxu0 %v5158_v42  ;;  %9499 = vmatprep.mubr.msk.bf16.mxu0 %vm12351_vm3, %v12350_v32 }
 0xfb6   : > { %5333 = vmatprep.subr.bf16.mxu0 %v10338_v44  ;;  %v10397_v44 = vld [vmem:[#allocation59 + $0x20] sm:$0xff]  }
 0xfbc   : > { %9500 = vmatmul.mubr.msk.bf16.vlgmr.msra.gmra.mrb[36].mxu0 %vm5149_vm9, %v5201_v45  ;;  %v10398_v45 = vld [vmem:[#allocation59 + $0x28] sm:$0xff]  }
 0xfbd   : > { %5334 = vmatpush1.bf16.msra.mxu0 %v10336_v46  ;;  %5365 = vmatprep.mubr.bf16.mxu0 %v12349_v18  ;;  %v10399_v46 = vld [vmem:[#allocation59 + $0x30] sm:$0xff]  }
 0xfbe   : > { %5335 = vmatprep.subr.bf16.mxu0 %v10344_v47  ;;  %v10400_v47 = vld [vmem:[#allocation59 + $0x38] sm:$0xff]  }
 0xfc1   : > { %5336 = vmatpush1.bf16.msra.mxu0 %v10342_v48  ;;  %v10401_v48 = vld [vmem:[#allocation59 + $0x40] sm:$0xff]  }
 0xfc2   : > { %5337 = vmatprep.subr.bf16.mxu0 %v10350_v49  ;;  %v10402_v49 = vld [vmem:[#allocation59 + $0x48] sm:$0xff]  }
 0xfc5   : > { %5338 = vmatpush1.bf16.msra.mxu0 %v10348_v50  ;;  %v10403_v50 = vld [vmem:[#allocation59 + $0x50] sm:$0xff]  }
 0xfc6   : > { %5339 = vmatprep.subr.bf16.mxu0 %v10356_v51  ;;  %v10404_v51 = vld [vmem:[#allocation59 + $0x58] sm:$0xff]  }
 0xfc9   : > { %5340 = vmatpush1.bf16.msra.mxu0 %v10354_v52  ;;  %v10405_v52 = vld [vmem:[#allocation59 + $0x60] sm:$0xff]  }
 0xfca   : > { %5341 = vmatprep.subr.bf16.mxu0 %v10362_v53  ;;  %v10406_v53 = vld [vmem:[#allocation59 + $0x68] sm:$0xff]  }
 0xfcd   : > { %5342 = vmatpush1.bf16.msra.mxu0 %v10360_v54  ;;  %v5663_v54 = vld [vmem:[%s14368_s11] sm:$0x3]  ;;  %s14376_s11 = smov %s14375_s0 }
 0xfce   : > { %5343 = vmatprep.subr.bf16.mxu0 %v10368_v55  ;;  %v5668_v55 = vrot.slane %v5663_v54, %v13663_v59 }
 0xfd1   : > { %5344 = vmatpush1.bf16.msra.mxu0 %v10366_v56 }
 0xfd2   : > { %5345 = vmatprep.subr.bf16.mxu0 %v10371_v57  ;;  %v5672_v57 = vrot.slane %v5663_v54, %v13665_v61 }
 0xfd5   : > { %5346 = vmatpush1.bf16.msra.mxu0 %v10369_v58 }
 0xfd6   : > { %9503 = vmatprep.subr.bf16.mxu0 %v12350_v32 }
0x1087   : > { %v5194_v60 = vpop.f32.mrb[32].mxu0 }
0x1088   : > { %v5200_v62 = vpack.c.bf16 %v5194_v60, %v5194_v60  ;;  %v9495_v63 = vpop.f32.mrb[33].mxu0 }
0x1089   : > { %v5197_v0 = vpop.f32.mrb[34].mxu0 }
0x108a   : > { %v9496_v1 = vpop.f32.mrb[35].mxu0  ;;  %9104 = vmatmul.mubr.msk.bf16.vlgmr.msra.gmra.mrb[52].mxu1 %vm4140_vm6, %v5200_v62 }
0x108b   : > { %5751 = vmatprep.mubr.bf16.mxu1 %v12349_v18 }
0x108f   : > { %v5253_v2 = vpop.f32.mrb[36].mxu0 }
0x1090   : > { %v5259_v3 = vpack.c.bf16 %v5253_v2, %v5253_v2  ;;  %v9501_v4 = vpop.f32.mrb[37].mxu0 }
0x1091   : > { %v5256_v6 = vpop.f32.mrb[38].mxu0 }
0x1092   : > { %v9502_v7 = vpop.f32.mrb[39].mxu0  ;;  %9089 = vmatmul.mubr.msk.bf16.vlgmr.msra.gmra.mrb[40].mxu0 %vm4140_vm6, %v5259_v3 }
0x1093   : > { %9504 = vmatpush3.bf16.msra.mxu0 %v5158_v42  ;;  %9505 = vmatprep.mubr.msk.bf16.mxu0 %vm12351_vm3, %v12350_v32  ;;  %v10395_v42 = vld [vmem:[#allocation59 + $0x10] sm:$0xff]  }
0x1094   : > { %5620 = vmatprep.subr.bf16.mxu0 %v10374_v5 }
0x109a   : > { %9506 = vmatmul.mubr.msk.bf16.vlgmr.msra.gmra.mrb[44].mxu0 %vm5149_vm9, %v5488_v8 }
0x109b   : > { %5621 = vmatpush1.bf16.msra.mxu0 %v10372_v9  ;;  %5652 = vmatprep.mubr.bf16.mxu0 %v12349_v18  ;;  %v5681_v9 = vld [vmem:[#allocation55] sm:$0x3] }
0x109c   : > { %5622 = vmatprep.subr.bf16.mxu0 %v10377_v10  ;;  %v5762_v10 = vld [vmem:[#allocation58] sm:$0x3] }
0x109f   : > { %5623 = vmatpush1.bf16.msra.mxu0 %v10375_v11  ;;  %v10407_v11 = vld [vmem:[#allocation56] sm:$0xff]  }
0x10a0   : > { %5624 = vmatprep.subr.bf16.mxu0 %v10380_v12  ;;  %v10409_v12 = vld [vmem:[#allocation56 + $0x10] sm:$0xff]  }
0x10a3   : > { %5625 = vmatpush1.bf16.msra.mxu0 %v10378_v13  ;;  %v10410_v13 = vld [vmem:[#allocation56 + $0x18] sm:$0xff]  }
0x10a4   : > { %5626 = vmatprep.subr.bf16.mxu0 %v10383_v14  ;;  %v10411_v14 = vld [vmem:[#allocation56 + $0x20] sm:$0xff]  }
0x10a7   : > { %5627 = vmatpush1.bf16.msra.mxu0 %v10381_v15  ;;  %v10412_v15 = vld [vmem:[#allocation56 + $0x28] sm:$0xff]  }
0x10a8   : > { %5628 = vmatprep.subr.bf16.mxu0 %v10386_v16  ;;  %v10413_v16 = vld [vmem:[#allocation56 + $0x30] sm:$0xff]  }
0x10ab   : > { %5629 = vmatpush1.bf16.msra.mxu0 %v10384_v17  ;;  %v10414_v17 = vld [vmem:[#allocation56 + $0x38] sm:$0xff]  }
0x10ac   : > { %5630 = vmatprep.subr.bf16.mxu0 %v10389_v19  ;;  %v10415_v19 = vld [vmem:[#allocation56 + $0x40] sm:$0xff]  }
0x10af   : > { %5631 = vmatpush1.bf16.msra.mxu0 %v10387_v20  ;;  %v10416_v20 = vld [vmem:[#allocation56 + $0x48] sm:$0xff]  }
0x10b0   : > { %5632 = vmatprep.subr.bf16.mxu0 %v10392_v21  ;;  %v10417_v21 = vld [vmem:[#allocation56 + $0x50] sm:$0xff]  }
0x10b3   : > { %5633 = vmatpush1.bf16.msra.mxu0 %v10390_v22  ;;  %v10418_v22 = vld [vmem:[#allocation56 + $0x58] sm:$0xff]  }
0x10b4   : > { %5924 = vmatprep.subr.bf16.mxu0 %v12349_v18 }
0x115d   : > { %v5481_v23 = vpop.f32.mrb[52].mxu1 }
0x115e   : > { %v5483_v24 = vpop.f32.mrb[53].mxu1 }
0x115f   : > { %v5485_v25 = vpop.f32.mrb[54].mxu1 }
0x1160   : > { %v5486_v26 = vpop.f32.mrb[55].mxu1 }
0x1165   : > { %v5367_v27 = vpop.f32.mrb[40].mxu0 }
0x1166   : > { %v5482_v28 = vadd.f32 %v5481_v23, %v5367_v27  ;;  %v5369_v29 = vpop.f32.mrb[41].mxu0  ;;  %v10419_v23 = vld [vmem:[#allocation56 + $0x60] sm:$0xff]  }
0x1167   : > { %v5484_v30 = vadd.f32 %v5483_v24, %v5369_v29  ;;  %v5371_v31 = vpop.f32.mrb[42].mxu0  ;;  %v10420_v24 = vld [vmem:[#allocation56 + $0x68] sm:$0xff]  }
0x1168   : > { %v5372_v33 = vpop.f32.mrb[43].mxu0  ;;  %v10421_v29 = vld [vmem:[#allocation62] sm:$0xff]  }
0x1169   : > { %v10422_v33 = vld [vmem:[#allocation62 + $0x8] sm:$0xff]  }
0x116d   : > { %v5540_v34 = vpop.f32.mrb[44].mxu0 }
0x116e   : > { %v5546_v36 = vpack.c.bf16 %v5540_v34, %v5540_v34  ;;  %v9507_v37 = vpop.f32.mrb[45].mxu0 }
0x116f   : > { %v5543_v38 = vpop.f32.mrb[46].mxu0 }
0x1170   : > { %v9508_v39 = vpop.f32.mrb[47].mxu0  ;;  %9120 = vmatmul.mubr.msk.bf16.vlgmr.msra.gmra.mrb[48].mxu0 %vm4140_vm6, %v5546_v36 }
0x1171   : > { %5925 = vmatpush1.bf16.msra.mxu0 %v10393_v35 }
0x1172   : > { %5926 = vmatprep.subr.bf16.mxu0 %v12349_v18 }
0x1175   : > { %5927 = vmatpush1.bf16.msra.mxu0 %v10394_v41  ;;  %v10423_v41 = vld [vmem:[#allocation62 + $0x10] sm:$0xff]  }
0x1176   : > { %5928 = vmatprep.subr.bf16.mxu0 %v12349_v18 }
0x1179   : > { %5929 = vmatpush1.bf16.msra.mxu0 %v10395_v42  ;;  %v10424_v42 = vld [vmem:[#allocation62 + $0x18] sm:$0xff]  }
0x117a   : > { %5930 = vmatprep.subr.bf16.mxu0 %v12349_v18 }
0x117d   : > { %5931 = vmatpush1.bf16.msra.mxu0 %v10396_v43  ;;  %v6091_v43 = vld [vmem:[#allocation61] sm:$0x3] }
0x117e   : > { %5932 = vmatprep.subr.bf16.mxu0 %v12349_v18 }
0x1181   : > { %5933 = vmatpush1.bf16.msra.mxu0 %v10397_v44  ;;  %v10425_v44 = vld [vmem:[#allocation62 + $0x20] sm:$0xff]  }
0x1182   : > { %5934 = vmatprep.subr.bf16.mxu0 %v12349_v18 }
0x1185   : > { %5935 = vmatpush1.bf16.msra.mxu0 %v10398_v45  ;;  %v10426_v45 = vld [vmem:[#allocation62 + $0x28] sm:$0xff]  }
0x1186   : > { %5936 = vmatprep.subr.bf16.mxu0 %v12349_v18 }
0x1189   : > { %5937 = vmatpush1.bf16.msra.mxu0 %v10399_v46  ;;  %v10427_v46 = vld [vmem:[#allocation62 + $0x30] sm:$0xff]  }
0x118a   : > { %5938 = vmatprep.subr.bf16.mxu0 %v12349_v18 }
0x118d   : > { %5939 = vmatpush1.bf16.msra.mxu0 %v10400_v47  ;;  %v10428_v47 = vld [vmem:[#allocation62 + $0x38] sm:$0xff]  }
0x118e   : > { %5940 = vmatprep.subr.bf16.mxu0 %v12349_v18 }
0x1191   : > { %5941 = vmatpush1.bf16.msra.mxu0 %v10401_v48  ;;  %v10429_v48 = vld [vmem:[#allocation62 + $0x40] sm:$0xff]  }
0x1192   : > { %5942 = vmatprep.subr.bf16.mxu0 %v12349_v18 }
0x1195   : > { %5943 = vmatpush1.bf16.msra.mxu0 %v10402_v49  ;;  %v10430_v49 = vld [vmem:[#allocation62 + $0x48] sm:$0xff]  }
0x1196   : > { %5944 = vmatprep.subr.bf16.mxu0 %v12349_v18 }
0x1199   : > { %5945 = vmatpush1.bf16.msra.mxu0 %v10403_v50  ;;  %v10431_v50 = vld [vmem:[#allocation62 + $0x50] sm:$0xff]  }
0x119a   : > { %5946 = vmatprep.subr.bf16.mxu0 %v12349_v18 }
0x119d   : > { %5947 = vmatpush1.bf16.msra.mxu0 %v10404_v51  ;;  %v10432_v51 = vld [vmem:[#allocation62 + $0x58] sm:$0xff]  }
0x119e   : > { %5948 = vmatprep.subr.bf16.mxu0 %v12349_v18 }
0x11a1   : > { %5949 = vmatpush1.bf16.msra.mxu0 %v10405_v52  ;;  %v10433_v52 = vld [vmem:[#allocation62 + $0x60] sm:$0xff]  }
0x11a2   : > { %5950 = vmatprep.subr.bf16.mxu0 %v12349_v18 }
0x11a5   : > { %5951 = vmatpush1.bf16.msra.mxu0 %v10406_v53  ;;  %v10434_v53 = vld [vmem:[#allocation62 + $0x68] sm:$0xff]  }
0x1243   : > { %v5654_v56 = vpop.f32.mrb[48].mxu0 }
0x1244   : > { %v5661_v58 = vadd.f32 %v5654_v56, %v5482_v28  ;;  %v5656_v60 = vpop.f32.mrb[49].mxu0 }
0x1245   : > { %v5662_v62 = vadd.f32 %v5656_v60, %v5484_v30  ;;  %v5658_v63 = vpop.f32.mrb[50].mxu0 }
0x1246   : > { %v5675_v0 = vadd.f32 %v5668_v55, %v5661_v58  ;;  %v5659_v1 = vpop.f32.mrb[51].mxu0 }
0x1247   : > { %v5676_v2 = vadd.f32 %v5672_v57, %v5662_v62 }
0x1248   : > { %v5677_v3 = vmax.f32 %v5675_v0, 0.0 }
0x1249   : > { %v5678_v4 = vmax.f32 %v5676_v2, 0.0 }
0x124a   : > { %v5679_v5 = vpack.c.bf16 %v5677_v3, %v5677_v3 }
0x124b   : > { %v5680_v6 = vpack.c.bf16 %v5678_v4, %v5678_v4 }
0x124c   : > { %v13864_v8 = vand.u32 %v5679_v5, %v13827_v40 }
0x124d   : > { %v5717_v7 = vand.u32 %v5680_v6, %v13827_v40  ;;  %v10408_v40 = vld [vmem:[#allocation56 + $0x8] sm:$0xff]  }
0x124f   : > { %5719 = vmatprep.subr.bf16.mxu1 %v5717_v7  ;;  %6123 = vmatprep.subr.bf16.mxu0 %v5717_v7 }
0x1250   : > { %5720 = vmatpush1.bf16.msra.mxu1 %v13864_v8 }
0x1251   : > { %5794 = vmatprep.subr.bf16.mxu1 %v5717_v7 }
0x1253   : > { %9121 = vmatmul.mubr.msk.bf16.vlgmr.msra.gmra.mrb[56].mxu1 %vm5149_vm9, %v5681_v9 }
0x1254   : > { %5795 = vmatpush1.bf16.msra.mxu1 %v13864_v8  ;;  %5826 = vmatprep.mubr.bf16.mxu1 %v12349_v18 }
0x1255   : > { %6051 = vmatprep.subr.bf16.mxu1 %v12349_v18 }
0x125b   : > { %9122 = vmatmul.mubr.msk.bf16.vlgmr.msra.gmra.mrb[60].mxu1 %vm5149_vm9, %v5762_v10 }
0x125c   : > { %6052 = vmatpush1.bf16.msra.mxu1 %v10407_v11 }
0x125d   : > { %6053 = vmatprep.subr.bf16.mxu1 %v12349_v18 }
0x1260   : > { %6054 = vmatpush1.bf16.msra.mxu1 %v10408_v40 }
0x1261   : > { %6055 = vmatprep.subr.bf16.mxu1 %v12349_v18 }
0x1264   : > { %6056 = vmatpush1.bf16.msra.mxu1 %v10409_v12 }
0x1265   : > { %6057 = vmatprep.subr.bf16.mxu1 %v12349_v18 }
0x1268   : > { %6058 = vmatpush1.bf16.msra.mxu1 %v10410_v13 }
0x1269   : > { %6059 = vmatprep.subr.bf16.mxu1 %v12349_v18 }
0x126c   : > { %6060 = vmatpush1.bf16.msra.mxu1 %v10411_v14 }
0x126d   : > { %6061 = vmatprep.subr.bf16.mxu1 %v12349_v18 }
0x1270   : > { %6062 = vmatpush1.bf16.msra.mxu1 %v10412_v15 }
0x1271   : > { %6063 = vmatprep.subr.bf16.mxu1 %v12349_v18 }
0x1274   : > { %6064 = vmatpush1.bf16.msra.mxu1 %v10413_v16  ;;  %v6304_v16 = vld [vmem:[#allocation65] sm:$0x3] }
0x1275   : > { %6065 = vmatprep.subr.bf16.mxu1 %v12349_v18 }
0x1278   : > { %6066 = vmatpush1.bf16.msra.mxu1 %v10414_v17  ;;  %v6673_v17 = vld [vmem:[#allocation68] sm:$0x3] }
0x1279   : > { %6067 = vmatprep.subr.bf16.mxu1 %v12349_v18 }
0x127c   : > { %6068 = vmatpush1.bf16.msra.mxu1 %v10415_v19  ;;  %v10437_v19 = vld [vmem:[%s14369_s1 + $0x4] ss:$8 sps:$4 sm:$0xff]   ;;  %s14377_s1 = sld [smem:[#allocation174_spill]] }
0x127d   : > { %6069 = vmatprep.subr.bf16.mxu1 %v12349_v18 }
0x1280   : > { %6070 = vmatpush1.bf16.msra.mxu1 %v10416_v20  ;;  %v6370_v20 = vld [vmem:[#allocation67] sm:$0x3] }
0x1281   : > { %6071 = vmatprep.subr.bf16.mxu1 %v12349_v18 }
0x1284   : > { %6072 = vmatpush1.bf16.msra.mxu1 %v10417_v21  ;;  %v10435_v21 = vld [vmem:[%s14370_s6] ss:$8 sps:$4 sm:$0xff]  }
0x1285   : > { %6073 = vmatprep.subr.bf16.mxu1 %v12349_v18 }
0x1288   : > { %6074 = vmatpush1.bf16.msra.mxu1 %v10418_v22  ;;  %v10440_v22 = vld [vmem:[%s14370_s6 + $0x14] ss:$8 sps:$4 sm:$0xff]  }
0x1289   : > { %6075 = vmatprep.subr.bf16.mxu1 %v12349_v18 }
0x128c   : > { %6076 = vmatpush1.bf16.msra.mxu1 %v10419_v23  ;;  %v10438_v23 = vld [vmem:[%s14370_s6 + $0x10] ss:$8 sps:$4 sm:$0xff]  }
0x128d   : > { %6077 = vmatprep.subr.bf16.mxu1 %v12349_v18 }
0x1290   : > { %6078 = vmatpush1.bf16.msra.mxu1 %v10420_v24  ;;  %v10443_v24 = vld [vmem:[%s14370_s6 + $0x24] ss:$8 sps:$4 sm:$0xff]  }
0x1291   : > { %6253 = vmatprep.subr.bf16.mxu1 %v12349_v18 }
0x1326   : > { %v5753_v25 = vpop.f32.mrb[56].mxu1 }
0x1327   : > { %v5755_v26 = vpop.f32.mrb[57].mxu1  ;;  %v5760_v30 = vpack.c.bf16 %v5753_v25, %v5753_v25  ;;  %v10441_v25 = vld [vmem:[%s14370_s6 + $0x20] ss:$8 sps:$4 sm:$0xff]  }
0x1328   : > { %v5761_v27 = vpack.c.bf16 %v5755_v26, %v5755_v26  ;;  %v5757_v28 = vpop.f32.mrb[58].mxu1  ;;  %v10446_v26 = vld [vmem:[%s14370_s6 + $0x34] ss:$8 sps:$4 sm:$0xff]  }
0x1329   : > { %v5758_v31 = vpop.f32.mrb[59].mxu1  ;;  %v10449_v28 = vld [vmem:[%s14370_s6 + $0x44] ss:$8 sps:$4 sm:$0xff]  }
0x132a   : > { %9152 = vmatprep.mubr.msk.bf16.mxu1 %vm3535_vm2, %v5761_v27  ;;  %v10444_v27 = vld [vmem:[%s14370_s6 + $0x30] ss:$8 sps:$4 sm:$0xff]  }
0x132b   : > { %6084 = vmatmul.mubr.bf16.vlgmr.msra.gmra.mrb[64].mxu1 %v5760_v30  ;;  %v10452_v30 = vld [vmem:[%s14370_s6 + $0x54] ss:$8 sps:$4 sm:$0xff]   ;;  %v10450_v31 = vld [vmem:[%s14370_s6 + $0x50] ss:$8 sps:$4 sm:$0xff]  }
0x132c   : > { %6254 = vmatpush1.bf16.msra.mxu1 %v10421_v29  ;;  %v10447_v29 = vld [vmem:[%s14370_s6 + $0x40] ss:$8 sps:$4 sm:$0xff]  }
0x132d   : > { %6255 = vmatprep.subr.bf16.mxu1 %v12349_v18 }
0x132e   : > { %v5828_v34 = vpop.f32.mrb[60].mxu1 }
0x132f   : > { %v5830_v35 = vpop.f32.mrb[61].mxu1  ;;  %v5835_v38 = vpack.c.bf16 %v5828_v34, %v5828_v34  ;;  %v10453_v34 = vld [vmem:[%s14370_s6 + $0x60] ss:$8 sps:$4 sm:$0xff]  }
0x1330   : > { %v5836_v36 = vpack.c.bf16 %v5830_v35, %v5830_v35  ;;  %v5832_v37 = vpop.f32.mrb[62].mxu1  ;;  %6256 = vmatpush1.bf16.msra.mxu1 %v10422_v33  ;;  %v10455_v33 = vld [vmem:[%s14370_s6 + $0x64] ss:$8 sps:$4 sm:$0xff]   ;;  %v10458_v35 = vld [vmem:[%s14370_s6 + $0x74] ss:$8 sps:$4 sm:$0xff]  }
0x1331   : > { %v5833_v39 = vpop.f32.mrb[63].mxu1  ;;  %6257 = vmatprep.subr.bf16.mxu1 %v12349_v18  ;;  %v10461_v37 = vld [vmem:[%s14371_s2 + $0x4] ss:$8 sps:$4 sm:$0xff]   ;;  %s14379_s2 = sld [smem:[#allocation176_spill]] }
0x1332   : > { %9137 = vmatprep.mubr.msk.bf16.mxu0 %vm3535_vm2, %v5836_v36  ;;  %v10456_v36 = vld [vmem:[%s14370_s6 + $0x70] ss:$8 sps:$4 sm:$0xff]   ;;  %v10464_v39 = vld [vmem:[%s14373_s3 + $0x4] ss:$8 sps:$4 sm:$0xff]  }
0x1333   : > { %5957 = vmatmul.mubr.bf16.vlgmr.msra.gmra.mrb[52].mxu0 %v5835_v38  ;;  %v10459_v38 = vld [vmem:[%s14372_s26] ss:$8 sps:$4 sm:$0xff]  }
0x1334   : > { %6124 = vmatpush1.bf16.msra.mxu0 %v13864_v8  ;;  %6155 = vmatprep.mubr.bf16.mxu0 %v12349_v18  ;;  %v9169_v8 = vld [vmem:[#allocation64] ss:$0 sm:$0xff] }
0x1335   : > { %6258 = vmatpush1.bf16.msra.mxu1 %v10423_v41  ;;  %9509 = vmatprep.subr.bf16.mxu0 %v12350_v32  ;;  %v10465_v41 = vld [vmem:[%s14372_s26 + $0x10] ss:$8 sps:$4 sm:$0xff]  }
0x1336   : > { %6259 = vmatprep.subr.bf16.mxu1 %v12349_v18 }
0x1337   : > { %s14380_s5 = smov %s14379_s2 }
0x1339   : > { %6260 = vmatpush1.bf16.msra.mxu1 %v10424_v42  ;;  %v10467_v42 = vld [vmem:[%s14372_s26 + $0x14] ss:$8 sps:$4 sm:$0xff]  }
0x133a   : > { %6261 = vmatprep.subr.bf16.mxu1 %v12349_v18 }
0x133b   : > { %9153 = vmatmul.mubr.msk.bf16.vlgmr.msra.gmra.mrb[56].mxu0 %vm5149_vm9, %v6091_v43  ;;  %v10471_v43 = vld [vmem:[%s14372_s26 + $0x20] ss:$8 sps:$4 sm:$0xff]  }
0x133c   : > { %9511 = vmatprep.mubr.msk.bf16.mxu0 %vm12351_vm3, %v12350_v32 }
0x133d   : > { %6262 = vmatpush1.bf16.msra.mxu1 %v10425_v44  ;;  %v10473_v44 = vld [vmem:[%s14372_s26 + $0x24] ss:$8 sps:$4 sm:$0xff]  }
0x133e   : > { %6263 = vmatprep.subr.bf16.mxu1 %v12349_v18 }
0x1341   : > { %6264 = vmatpush1.bf16.msra.mxu1 %v10426_v45  ;;  %v10477_v45 = vld [vmem:[%s14372_s26 + $0x30] ss:$8 sps:$4 sm:$0xff]  }
0x1342   : > { %6265 = vmatprep.subr.bf16.mxu1 %v12349_v18 }
0x1345   : > { %6266 = vmatpush1.bf16.msra.mxu1 %v10427_v46  ;;  %v10479_v46 = vld [vmem:[%s14372_s26 + $0x34] ss:$8 sps:$4 sm:$0xff]  }
0x1346   : > { %6267 = vmatprep.subr.bf16.mxu1 %v12349_v18 }
0x1349   : > { %6268 = vmatpush1.bf16.msra.mxu1 %v10428_v47  ;;  %v10483_v47 = vld [vmem:[%s14372_s26 + $0x40] ss:$8 sps:$4 sm:$0xff]  }
0x134a   : > { %6269 = vmatprep.subr.bf16.mxu1 %v12349_v18 }
0x134d   : > { %6270 = vmatpush1.bf16.msra.mxu1 %v10429_v48  ;;  %v10485_v48 = vld [vmem:[%s14372_s26 + $0x44] ss:$8 sps:$4 sm:$0xff]  }
0x134e   : > { %6271 = vmatprep.subr.bf16.mxu1 %v12349_v18 }
0x1351   : > { %6272 = vmatpush1.bf16.msra.mxu1 %v10430_v49  ;;  %v10489_v49 = vld [vmem:[%s14372_s26 + $0x50] ss:$8 sps:$4 sm:$0xff]  }
0x1352   : > { %6273 = vmatprep.subr.bf16.mxu1 %v12349_v18 }
0x1355   : > { %6274 = vmatpush1.bf16.msra.mxu1 %v10431_v50  ;;  %v10491_v50 = vld [vmem:[%s14372_s26 + $0x54] ss:$8 sps:$4 sm:$0xff]  }
0x1356   : > { %6275 = vmatprep.subr.bf16.mxu1 %v12349_v18 }
0x1359   : > { %6276 = vmatpush1.bf16.msra.mxu1 %v10432_v51  ;;  %v10495_v51 = vld [vmem:[%s14372_s26 + $0x60] ss:$8 sps:$4 sm:$0xff]  }
0x135a   : > { %6277 = vmatprep.subr.bf16.mxu1 %v12349_v18 }
0x135d   : > { %6278 = vmatpush1.bf16.msra.mxu1 %v10433_v52  ;;  %v10497_v52 = vld [vmem:[%s14372_s26 + $0x64] ss:$8 sps:$4 sm:$0xff]  }
0x135e   : > { %6279 = vmatprep.subr.bf16.mxu1 %v12349_v18 }
0x1361   : > { %6280 = vmatpush1.bf16.msra.mxu1 %v10434_v53  ;;  %v10501_v53 = vld [vmem:[%s14372_s26 + $0x70] ss:$8 sps:$4 sm:$0xff]  }
0x1362   : > { %9521 = vmatprep.subr.bf16.mxu1 %v12350_v32 }
0x13fe   : > { %v6085_v54 = vpop.f32.mrb[64].mxu1 }
0x13ff   : > { %v6087_v55 = vpop.f32.mrb[65].mxu1 }
0x1400   : > { %v6088_v56 = vpop.f32.mrb[66].mxu1 }
0x1401   : > { %v6089_v57 = vpop.f32.mrb[67].mxu1 }
0x1406   : > { %v5958_v58 = vpop.f32.mrb[52].mxu0 }
0x1407   : > { %v6086_v60 = vadd.f32 %v6085_v54, %v5958_v58  ;;  %v5960_v62 = vpop.f32.mrb[53].mxu0  ;;  %v10503_v54 = vld [vmem:[%s14372_s26 + $0x74] ss:$8 sps:$4 sm:$0xff]  }
0x1408   : > { %v5961_v63 = vpop.f32.mrb[54].mxu0 }
0x1409   : > { %v5962_v0 = vpop.f32.mrb[55].mxu0 }
0x140e   : > { %v6157_v1 = vpop.f32.mrb[56].mxu0 }
0x140f   : > { %v6159_v2 = vpop.f32.mrb[57].mxu0  ;;  %v6164_v5 = vpack.c.bf16 %v6157_v1, %v6157_v1 }
0x1410   : > { %v6165_v3 = vpack.c.bf16 %v6159_v2, %v6159_v2  ;;  %v6161_v4 = vpop.f32.mrb[58].mxu0 }
0x1411   : > { %v6162_v6 = vpop.f32.mrb[59].mxu0 }
0x1412   : > { %9168 = vmatprep.mubr.msk.bf16.mxu1 %vm3535_vm2, %v6165_v3  ;;  %v10462_v3 = vld [vmem:[%s14373_s3] ss:$8 sps:$4 sm:$0xff]   ;;  %v10470_v6 = vld [vmem:[%s14373_s3 + $0x14] ss:$8 sps:$4 sm:$0xff]  }
0x1413   : > { %6286 = vmatmul.mubr.bf16.vlgmr.msra.gmra.mrb[68].mxu1 %v6164_v5 }
0x1414   : > { %9523 = vmatprep.mubr.msk.bf16.mxu1 %vm12351_vm3, %v12350_v32 }
0x14e6   : > { %v6287_v7 = vpop.f32.mrb[68].mxu1 }
0x14e7   : > { %v6293_v9 = vadd.f32 %v6287_v7, %v6086_v60  ;;  %v6289_v10 = vpop.f32.mrb[69].mxu1 }
0x14e8   : > { %v6290_v11 = vpop.f32.mrb[70].mxu1  ;;  %v10476_v10 = vld [vmem:[%s14373_s3 + $0x24] ss:$8 sps:$4 sm:$0xff]  }
0x14e9   : > { %v6301_v40 = vadd.f32 %v9169_v8, %v6293_v9  ;;  %v6291_v12 = vpop.f32.mrb[71].mxu1  ;;  %v10468_v9 = vld [vmem:[%s14373_s3 + $0x10] ss:$8 sps:$4 sm:$0xff]   ;;  %v10474_v11 = vld [vmem:[%s14373_s3 + $0x20] ss:$8 sps:$4 sm:$0xff]  }
0x14ea   : > { %v10480_v12 = vld [vmem:[%s14373_s3 + $0x30] ss:$8 sps:$4 sm:$0xff]  }
0x14eb   : > { %v6302_v13 = vmax.f32 %v6301_v40, 0.0  ;;  %v10482_v40 = vld [vmem:[%s14373_s3 + $0x34] ss:$8 sps:$4 sm:$0xff]  }
0x14ed   : > { %v6303_v14 = vpack.c.bf16 %v6302_v13, %v6302_v13  ;;  %v10488_v13 = vld [vmem:[%s14373_s3 + $0x44] ss:$8 sps:$4 sm:$0xff]  }
0x14ef   : > { %v6327_v15 = vsel %vm6325_vm10, %v6303_v14, 0  ;;  %v10486_v14 = vld [vmem:[%s14373_s3 + $0x40] ss:$8 sps:$4 sm:$0xff]  }
0x14f0   : > { %9510 = vmatpush3.bf16.msra.mxu0 %v6327_v15  ;;  %9522 = vmatpush3.bf16.msra.mxu1 %v6327_v15 }
0x14f1   : > { %9515 = vmatprep.subr.bf16.mxu0 %v12350_v32  ;;  %6814 = vmatprep.subr.bf16.mxu1 %v10461_v37  ;;  %v10520_v37 = vld [vmem:[#allocation74 + $0x30] sm:$0xff]  }
0x14f3   : > { %9512 = vmatmul.mubr.msk.bf16.vlgmr.msra.gmra.mrb[60].mxu0 %vm6321_vm11, %v6304_v16  ;;  %9524 = vmatmul.mubr.msk.bf16.vlgmr.msra.gmra.mrb[72].mxu1 %vm6321_vm11, %v6673_v17  ;;  %v10492_v16 = vld [vmem:[%s14373_s3 + $0x50] ss:$8 sps:$4 sm:$0xff]   ;;  %v10500_v17 = vld [vmem:[%s14373_s3 + $0x64] ss:$8 sps:$4 sm:$0xff]  }
0x14f4   : > { %9516 = vmatpush3.bf16.msra.mxu0 %v6327_v15  ;;  %9517 = vmatprep.mubr.msk.bf16.mxu0 %vm12351_vm3, %v12350_v32  ;;  %v10494_v15 = vld [vmem:[%s14373_s3 + $0x54] ss:$8 sps:$4 sm:$0xff]  }
0x14f5   : > { %6511 = vmatprep.subr.bf16.mxu0 %v10437_v19  ;;  %6846 = vmatprep.mubr.bf16.mxu1 %v12349_v18  ;;  %v10498_v19 = vld [vmem:[%s14373_s3 + $0x60] ss:$8 sps:$4 sm:$0xff]  }
0x14f6   : > { %6815 = vmatpush1.bf16.msra.mxu1 %v10459_v38  ;;  %v10521_v38 = vld [vmem:[#allocation74 + $0x78] sm:$0xff]  }
0x14f7   : > { %6816 = vmatprep.subr.bf16.mxu1 %v10467_v42 }
0x14fa   : > { %6817 = vmatpush1.bf16.msra.mxu1 %v10465_v41 }
0x14fb   : > { %9518 = vmatmul.mubr.msk.bf16.vlgmr.msra.gmra.mrb[64].mxu0 %vm6321_vm11, %v6370_v20  ;;  %6818 = vmatprep.subr.bf16.mxu1 %v10473_v44  ;;  %v10506_v20 = vld [vmem:[%s14373_s3 + $0x74] ss:$8 sps:$4 sm:$0xff]  }
0x14fc   : > { %6512 = vmatpush1.bf16.msra.mxu0 %v10435_v21  ;;  %6543 = vmatprep.mubr.bf16.mxu0 %v12349_v18  ;;  %v10504_v21 = vld [vmem:[%s14373_s3 + $0x70] ss:$8 sps:$4 sm:$0xff]   ;;  %s14378_s3 = smov %s14377_s1 }
0x14fd   : > { %6513 = vmatprep.subr.bf16.mxu0 %v10440_v22 }
0x14fe   : > { %6819 = vmatpush1.bf16.msra.mxu1 %v10471_v43 }
0x14ff   : > { %6820 = vmatprep.subr.bf16.mxu1 %v10479_v46 }
0x1500   : > { %6514 = vmatpush1.bf16.msra.mxu0 %v10438_v23  ;;  %v10507_v23 = vld [vmem:[#allocation74 + $0x40] sm:$0xff]  }
0x1501   : > { %6515 = vmatprep.subr.bf16.mxu0 %v10443_v24  ;;  %v10508_v24 = vld [vmem:[#allocation74] sm:$0xff]  }
0x1502   : > { %6821 = vmatpush1.bf16.msra.mxu1 %v10477_v45 }
0x1503   : > { %6822 = vmatprep.subr.bf16.mxu1 %v10485_v48 }
0x1504   : > { %6516 = vmatpush1.bf16.msra.mxu0 %v10441_v25  ;;  %v10509_v25 = vld [vmem:[#allocation74 + $0x48] sm:$0xff]  }
0x1505   : > { %6517 = vmatprep.subr.bf16.mxu0 %v10446_v26  ;;  %v10510_v26 = vld [vmem:[#allocation74 + $0x8] sm:$0xff]  }
0x1506   : > { %6823 = vmatpush1.bf16.msra.mxu1 %v10483_v47 }
0x1507   : > { %6824 = vmatprep.subr.bf16.mxu1 %v10491_v50 }
0x1508   : > { %6518 = vmatpush1.bf16.msra.mxu0 %v10444_v27  ;;  %v10511_v27 = vld [vmem:[#allocation74 + $0x50] sm:$0xff]  }
0x1509   : > { %6519 = vmatprep.subr.bf16.mxu0 %v10449_v28  ;;  %v10512_v28 = vld [vmem:[#allocation74 + $0x10] sm:$0xff]  }
0x150a   : > { %6825 = vmatpush1.bf16.msra.mxu1 %v10489_v49  ;;  %v6857_v49 = vld [vmem:[#allocation70] sm:$0x3] }
0x150b   : > { %6826 = vmatprep.subr.bf16.mxu1 %v10497_v52  ;;  %v6862_v52 = vrot.slane %v6857_v49, %v13663_v59  ;;  %v6875_v59 = vld [vmem:[#allocation71] sm:$0x1] }
0x150c   : > { %6520 = vmatpush1.bf16.msra.mxu0 %v10447_v29  ;;  %v10513_v29 = vld [vmem:[#allocation74 + $0x58] sm:$0xff]  }
0x150d   : > { %6521 = vmatprep.subr.bf16.mxu0 %v10452_v30  ;;  %v10514_v30 = vld [vmem:[#allocation74 + $0x18] sm:$0xff]  }
0x150e   : > { %6827 = vmatpush1.bf16.msra.mxu1 %v10495_v51 }
0x150f   : > { %6828 = vmatprep.subr.bf16.mxu1 %v10503_v54 }
0x1510   : > { %6522 = vmatpush1.bf16.msra.mxu0 %v10450_v31  ;;  %v10515_v31 = vld [vmem:[#allocation74 + $0x60] sm:$0xff]  }
0x1511   : > { %6523 = vmatprep.subr.bf16.mxu0 %v10455_v33  ;;  %v10516_v33 = vld [vmem:[#allocation74 + $0x20] sm:$0xff]  }
0x1512   : > { %6829 = vmatpush1.bf16.msra.mxu1 %v10501_v53 }
0x1513   : > { %9344 = vmatprep.subr.bf16.mxu1 %v10507_v23 }
0x1514   : > { %6524 = vmatpush1.bf16.msra.mxu0 %v10453_v34  ;;  %v10517_v34 = vld [vmem:[#allocation74 + $0x68] sm:$0xff]  }
0x1515   : > { %6525 = vmatprep.subr.bf16.mxu0 %v10458_v35  ;;  %v10518_v35 = vld [vmem:[#allocation74 + $0x28] sm:$0xff]  }
0x1518   : > { %6526 = vmatpush1.bf16.msra.mxu0 %v10456_v36  ;;  %v10519_v36 = vld [vmem:[#allocation74 + $0x70] sm:$0xff]  }
0x1519   : > { %6632 = vmatprep.subr.bf16.mxu0 %v10464_v39  ;;  %v10522_v39 = vld [vmem:[#allocation74 + $0x38] sm:$0xff]  }
0x15c6   : > { %v6363_v55 = vpop.f32.mrb[60].mxu0  ;;  %v6727_v56 = vpop.f32.mrb[72].mxu1 }
0x15c7   : > { %v9513_v57 = vpop.f32.mrb[61].mxu0  ;;  %v6733_v58 = vpack.c.bf16 %v6727_v56, %v6727_v56  ;;  %v9525_v60 = vpop.f32.mrb[73].mxu1  ;;  %v6369_v22 = vpack.c.bf16 %v6363_v55, %v6363_v55  ;;  %v6866_v55 = vrot.slane %v6857_v49, %v13665_v61  ;;  %v10523_v61 = vld [vmem:[%s14374_s13 + $0x40] sm:$0xff]  }
0x15c8   : > { %v6366_v62 = vpop.f32.mrb[62].mxu0  ;;  %v6730_v63 = vpop.f32.mrb[74].mxu1  ;;  %v10553_v49 = vld [vmem:[#allocation77 + $0x78] sm:$0xff]  }
0x15c9   : > { %v9514_v0 = vpop.f32.mrb[63].mxu0  ;;  %v9526_v1 = vpop.f32.mrb[75].mxu1  ;;  %6847 = vmatmul.mubr.bf16.vlgmr.msra.gmra.mrb[76].mxu1 %v6733_v58 }
0x15ca   : > { %9345 = vmatpush3.bf16.msra.mxu1 %v10508_v24 }
0x15cb   : > { %9346 = vmatprep.subr.bf16.mxu1 %v10509_v25 }
0x15ce   : > { %v6424_v2 = vpop.f32.mrb[64].mxu0  ;;  %9347 = vmatpush3.bf16.msra.mxu1 %v10510_v26  ;;  %v10540_v26 = vld [vmem:[#allocation77] sm:$0xff]  }
0x15cf   : > { %v6430_v4 = vpack.c.bf16 %v6424_v2, %v6424_v2  ;;  %v9519_v5 = vpop.f32.mrb[65].mxu0  ;;  %9348 = vmatprep.subr.bf16.mxu1 %v10511_v27 }
0x15d0   : > { %v6427_v7 = vpop.f32.mrb[66].mxu0  ;;  %v6960_v5 = vld [vmem:[#allocation73] sm:$0x1] }
0x15d1   : > { %v9520_v8 = vpop.f32.mrb[67].mxu0  ;;  %6544 = vmatmul.mubr.bf16.vlgmr.msra.gmra.mrb[68].mxu0 %v6430_v4  ;;  %v10525_v7 = vld [vmem:[%s14374_s13 + $0x48] sm:$0xff]  }
0x15d2   : > { %6633 = vmatpush1.bf16.msra.mxu0 %v10462_v3  ;;  %6664 = vmatprep.mubr.bf16.mxu0 %v12349_v18  ;;  %v10526_v8 = vld [vmem:[%s14374_s13 + $0x8] sm:$0xff]  }
0x15d3   : > { %6634 = vmatprep.subr.bf16.mxu0 %v10470_v6  ;;  %9349 = vmatpush3.bf16.msra.mxu1 %v10512_v28  ;;  %v10524_v6 = vld [vmem:[%s14374_s13] sm:$0xff]  }
0x15d4   : > { %9350 = vmatprep.subr.bf16.mxu1 %v10513_v29  ;;  %v10541_v29 = vld [vmem:[#allocation77 + $0x48] sm:$0xff]  }
0x15d6   : > { %6635 = vmatpush1.bf16.msra.mxu0 %v10468_v9  ;;  %v10527_v9 = vld [vmem:[%s14374_s13 + $0x50] sm:$0xff]  }
0x15d7   : > { %6636 = vmatprep.subr.bf16.mxu0 %v10476_v10  ;;  %9351 = vmatpush3.bf16.msra.mxu1 %v10514_v30  ;;  %v10528_v10 = vld [vmem:[%s14374_s13 + $0x10] sm:$0xff]  }
0x15d8   : > { %9352 = vmatprep.subr.bf16.mxu1 %v10515_v31  ;;  %v10542_v30 = vld [vmem:[#allocation77 + $0x8] sm:$0xff]   ;;  %v10543_v31 = vld [vmem:[#allocation77 + $0x50] sm:$0xff]  }
0x15da   : > { %6637 = vmatpush1.bf16.msra.mxu0 %v10474_v11  ;;  %v10529_v11 = vld [vmem:[%s14374_s13 + $0x58] sm:$0xff]  }
0x15db   : > { %6638 = vmatprep.subr.bf16.mxu0 %v10482_v40  ;;  %9353 = vmatpush3.bf16.msra.mxu1 %v10516_v33  ;;  %v10530_v40 = vld [vmem:[%s14374_s13 + $0x18] sm:$0xff]  }
0x15dc   : > { %9354 = vmatprep.subr.bf16.mxu1 %v10517_v34 }
0x15de   : > { %6639 = vmatpush1.bf16.msra.mxu0 %v10480_v12  ;;  %v10531_v12 = vld [vmem:[%s14374_s13 + $0x60] sm:$0xff]  }
0x15df   : > { %6640 = vmatprep.subr.bf16.mxu0 %v10488_v13  ;;  %9355 = vmatpush3.bf16.msra.mxu1 %v10518_v35  ;;  %v10532_v13 = vld [vmem:[%s14374_s13 + $0x20] sm:$0xff]  }
0x15e0   : > { %9356 = vmatprep.subr.bf16.mxu1 %v10519_v36 }
0x15e2   : > { %6641 = vmatpush1.bf16.msra.mxu0 %v10486_v14  ;;  %v10533_v14 = vld [vmem:[%s14374_s13 + $0x68] sm:$0xff]  }
0x15e3   : > { %6642 = vmatprep.subr.bf16.mxu0 %v10494_v15  ;;  %9357 = vmatpush3.bf16.msra.mxu1 %v10520_v37  ;;  %v10534_v15 = vld [vmem:[%s14374_s13 + $0x28] sm:$0xff]  }
0x15e4   : > { %9358 = vmatprep.subr.bf16.mxu1 %v10521_v38 }
0x15e6   : > { %6643 = vmatpush1.bf16.msra.mxu0 %v10492_v16  ;;  %v10535_v16 = vld [vmem:[%s14374_s13 + $0x70] sm:$0xff]  }
0x15e7   : > { %6644 = vmatprep.subr.bf16.mxu0 %v10500_v17  ;;  %9359 = vmatpush3.bf16.msra.mxu1 %v10522_v39  ;;  %v10536_v17 = vld [vmem:[%s14374_s13 + $0x30] sm:$0xff]  }
0x15e8   : > { %v10544_v39 = vld [vmem:[#allocation77 + $0x10] sm:$0xff]  }
0x15ea   : > { %6645 = vmatpush1.bf16.msra.mxu0 %v10498_v19  ;;  %v10537_v19 = vld [vmem:[%s14374_s13 + $0x78] sm:$0xff]  }
0x15eb   : > { %6646 = vmatprep.subr.bf16.mxu0 %v10506_v20  ;;  %v10538_v20 = vld [vmem:[%s14374_s13 + $0x38] sm:$0xff]  }
0x15ee   : > { %6647 = vmatpush1.bf16.msra.mxu0 %v10504_v21  ;;  %v10539_v21 = vld [vmem:[#allocation77 + $0x40] sm:$0xff]  }
0x15f1   : > { %6665 = vmatmul.mubr.bf16.vlgmr.msra.gmra.mrb[72].mxu0 %v6369_v22 }
0x15f2   : > { %6949 = vmatprep.mubr.bf16.mxu0 %v12349_v18 }
0x169c   : > { %v6848_v41 = vpop.f32.mrb[76].mxu1 }
0x169d   : > { %v6850_v42 = vpop.f32.mrb[77].mxu1 }
0x169e   : > { %v6852_v43 = vpop.f32.mrb[78].mxu1 }
0x169f   : > { %v6853_v44 = vpop.f32.mrb[79].mxu1  ;;  %v10546_v43 = vld [vmem:[#allocation77 + $0x18] sm:$0xff]  }
0x16a0   : > { %v10547_v44 = vld [vmem:[#allocation77 + $0x60] sm:$0xff]  }
0x16a4   : > { %v6545_v45 = vpop.f32.mrb[68].mxu0 }
0x16a5   : > { %v6547_v46 = vpop.f32.mrb[69].mxu0 }
0x16a6   : > { %v6549_v47 = vpop.f32.mrb[70].mxu0 }
0x16a7   : > { %v6550_v48 = vpop.f32.mrb[71].mxu0  ;;  %v10550_v47 = vld [vmem:[#allocation77 + $0x28] sm:$0xff]  }
0x16a8   : > { %v10552_v48 = vld [vmem:[#allocation77 + $0x30] sm:$0xff]  }
0x16c4   : > { %v6666_v50 = vpop.f32.mrb[72].mxu0 }
0x16c5   : > { %v6667_v51 = vadd.f32 %v6666_v50, %v6545_v45  ;;  %v6668_v53 = vpop.f32.mrb[73].mxu0  ;;  %v10548_v45 = vld [vmem:[#allocation77 + $0x20] sm:$0xff]   ;;  %v10554_v50 = vld [vmem:[#allocation77 + $0x38] sm:$0xff]  }
0x16c6   : > { %v6669_v54 = vadd.f32 %v6668_v53, %v6547_v46  ;;  %v6670_v56 = vpop.f32.mrb[74].mxu0  ;;  %v10549_v46 = vld [vmem:[#allocation77 + $0x68] sm:$0xff]  }
0x16c7   : > { %v6855_v57 = vadd.f32 %v6848_v41, %v6667_v51  ;;  %v6671_v58 = vpop.f32.mrb[75].mxu0  ;;  %v7311_v41 = vld [vmem:[#allocation76] sm:$0x1] }
0x16c8   : > { %v6856_v60 = vadd.f32 %v6850_v42, %v6669_v54  ;;  %v10545_v42 = vld [vmem:[#allocation77 + $0x58] sm:$0xff]  }
0x16c9   : > { %v6869_v62 = vadd.f32 %v6862_v52, %v6855_v57 }
0x16ca   : > { %v6870_v63 = vadd.f32 %v6866_v55, %v6856_v60 }
0x16cb   : > { %v6871_v0 = vmax.f32 %v6869_v62, 0.0 }
0x16cc   : > { %v6872_v1 = vmax.f32 %v6870_v63, 0.0 }
0x16cd   : > { %v6873_v2 = vpack.c.bf16 %v6871_v0, %v6871_v0 }
0x16ce   : > { %v6874_v3 = vpack.c.bf16 %v6872_v1, %v6872_v1 }
0x16cf   : > { %v13973_v4 = vsel %vm6325_vm10, %v6873_v2, 0 }
0x16d0   : > { %9221 = vmatprep.subr.msk.bf16.mxu0 %vm6325_vm10, %v6874_v3  ;;  %9257 = vmatprep.subr.msk.bf16.mxu1 %vm6325_vm10, %v6874_v3 }
0x16d1   : > { %6918 = vmatpush1.bf16.msra.mxu0 %v13973_v4 }
0x16d2   : > { %9223 = vmatprep.subr.msk.bf16.mxu0 %vm6325_vm10, %v6874_v3 }
0x16d4   : > { %9222 = vmatmul.mubr.msk.bf16.vlgmr.msra.gmra.mrb[76].mxu0 %vm6321_vm11, %v6875_v59 }
0x16d5   : > { %6997 = vmatpush1.bf16.msra.mxu0 %v13973_v4  ;;  %7028 = vmatprep.mubr.bf16.mxu0 %v12349_v18 }
0x16d6   : > { %9366 = vmatprep.subr.bf16.mxu0 %v10523_v61  ;;  %v10555_v61 = vld [vmem:[%s14375_s0] sm:$0xff]   ;;  %s2746_s0 = sand.u32 1, %s12211_s28  }
0x16dc   : > { %9224 = vmatmul.mubr.msk.bf16.vlgmr.msra.gmra.mrb[80].mxu0 %vm6321_vm11, %v6960_v5  ;;  %v10556_v5 = vld [vmem:[%s14376_s11 + $0x8] sm:$0xff]  }
0x16dd   : > { %9367 = vmatpush3.bf16.msra.mxu0 %v10524_v6  ;;  %v10558_v6 = vld [vmem:[%s14376_s11 + $0x10] sm:$0xff]  }
0x16de   : > { %9368 = vmatprep.subr.bf16.mxu0 %v10525_v7  ;;  %v10560_v7 = vld [vmem:[%s14376_s11 + $0x18] sm:$0xff]  }
0x16e1   : > { %9369 = vmatpush3.bf16.msra.mxu0 %v10526_v8  ;;  %v10562_v8 = vld [vmem:[%s14376_s11 + $0x20] sm:$0xff]  }
0x16e2   : > { %9370 = vmatprep.subr.bf16.mxu0 %v10527_v9  ;;  %v10564_v9 = vld [vmem:[%s14376_s11 + $0x28] sm:$0xff]  }
0x16e5   : > { %9371 = vmatpush3.bf16.msra.mxu0 %v10528_v10  ;;  %v10566_v10 = vld [vmem:[%s14376_s11 + $0x30] sm:$0xff]  }
0x16e6   : > { %9372 = vmatprep.subr.bf16.mxu0 %v10529_v11 }
0x16e9   : > { %9373 = vmatpush3.bf16.msra.mxu0 %v10530_v40 }
0x16ea   : > { %9374 = vmatprep.subr.bf16.mxu0 %v10531_v12 }
0x16ed   : > { %9375 = vmatpush3.bf16.msra.mxu0 %v10532_v13 }
0x16ee   : > { %9376 = vmatprep.subr.bf16.mxu0 %v10533_v14  ;;  %v9275_v14 = vld [vmem:[#allocation79] ss:$0 sm:$0xff] }
0x16f1   : > { %9377 = vmatpush3.bf16.msra.mxu0 %v10534_v15 }
0x16f2   : > { %9378 = vmatprep.subr.bf16.mxu0 %v10535_v16 }
0x16f5   : > { %9379 = vmatpush3.bf16.msra.mxu0 %v10536_v17 }
0x16f6   : > { %9380 = vmatprep.subr.bf16.mxu0 %v10537_v19 }
0x16f9   : > { %9381 = vmatpush3.bf16.msra.mxu0 %v10538_v20 }
0x16fa   : > { %9388 = vmatprep.subr.bf16.mxu0 %v10539_v21 }
0x17a7   : > { %v6951_v22 = vpop.f32.mrb[76].mxu0 }
0x17a8   : > { %v6953_v23 = vpop.f32.mrb[77].mxu0  ;;  %v6958_v27 = vpack.c.bf16 %v6951_v22, %v6951_v22  ;;  %v7537_v22 = vld [vmem:[#allocation80] sm:$0x1] }
0x17a9   : > { %v6959_v24 = vpack.c.bf16 %v6953_v23, %v6953_v23  ;;  %v6955_v25 = vpop.f32.mrb[78].mxu0  ;;  %v7603_v23 = vld [vmem:[#allocation82] sm:$0x1] }
0x17aa   : > { %v6956_v28 = vpop.f32.mrb[79].mxu0  ;;  %v10559_v25 = vld [vmem:[#allocation83 + $0x8] sm:$0xff]  }
0x17ab   : > { %7303 = vmatprep.mubr.bf16.mxu0 %v6959_v24  ;;  %v10557_v24 = vld [vmem:[#allocation83] sm:$0xff]  }
0x17ac   : > { %7304 = vmatmul.mubr.bf16.vlgmr.msra.gmra.mrb[84].mxu0 %v6958_v27  ;;  %v10563_v27 = vld [vmem:[#allocation83 + $0x18] sm:$0xff]   ;;  %v10565_v28 = vld [vmem:[#allocation83 + $0x20] sm:$0xff]  }
0x17ad   : > { %9389 = vmatpush3.bf16.msra.mxu0 %v10540_v26  ;;  %v10561_v26 = vld [vmem:[#allocation83 + $0x10] sm:$0xff]  }
0x17ae   : > { %9390 = vmatprep.subr.bf16.mxu0 %v10541_v29  ;;  %v10567_v29 = vld [vmem:[#allocation83 + $0x28] sm:$0xff]  }
0x17af   : > { %v7030_v33 = vpop.f32.mrb[80].mxu0 }
0x17b0   : > { %v7032_v34 = vpop.f32.mrb[81].mxu0  ;;  %v7037_v37 = vpack.c.bf16 %v7030_v33, %v7030_v33  ;;  %v10570_v33 = vld [vmem:[#allocation83 + $0x38] sm:$0xff]  }
0x17b1   : > { %v7038_v35 = vpack.c.bf16 %v7032_v34, %v7032_v34  ;;  %v7034_v36 = vpop.f32.mrb[82].mxu0  ;;  %9391 = vmatpush3.bf16.msra.mxu0 %v10542_v30  ;;  %v10568_v30 = vld [vmem:[%s14376_s11 + $0x38] sm:$0xff]  }
0x17b2   : > { %v7035_v38 = vpop.f32.mrb[83].mxu0  ;;  %9392 = vmatprep.subr.bf16.mxu0 %v10543_v31  ;;  %v10569_v31 = vld [vmem:[#allocation83 + $0x30] sm:$0xff]  }
0x17b3   : > { %7167 = vmatprep.mubr.bf16.mxu1 %v7038_v35 }
0x17b4   : > { %7168 = vmatmul.mubr.bf16.vlgmr.msra.gmra.mrb[80].mxu1 %v7037_v37 }
0x17b5   : > { %7348 = vmatpush1.bf16.msra.mxu1 %v13973_v4  ;;  %7379 = vmatprep.mubr.bf16.mxu1 %v12349_v18  ;;  %v10551_v18 = vld [vmem:[#allocation77 + $0x70] sm:$0xff]  }
0x17b6   : > { %9393 = vmatpush3.bf16.msra.mxu0 %v10544_v39  ;;  %9527 = vmatprep.subr.bf16.mxu1 %v12350_v32 }
0x17b7   : > { %9394 = vmatprep.subr.bf16.mxu0 %v10545_v42 }
0x17ba   : > { %9395 = vmatpush3.bf16.msra.mxu0 %v10546_v43 }
0x17bb   : > { %9396 = vmatprep.subr.bf16.mxu0 %v10547_v44 }
0x17bc   : > { %9258 = vmatmul.mubr.msk.bf16.vlgmr.msra.gmra.mrb[84].mxu1 %vm6321_vm11, %v7311_v41  ;;  %v10571_v41 = vld [vmem:[%s14377_s1] sm:$0xff]   ;;  %s9310_s1 = sshll.u32 %s12725_s7, 4  ;;  %s12353_s7 = smov [#allocation88]  }
0x17bd   : > { %9529 = vmatprep.mubr.msk.bf16.mxu1 %vm12351_vm3, %v12350_v32  ;;  %s12045_s8 = sshll.u32 %s12353_s7, 4  ;;  %s12046_s8 = int_to_ptr.vmem [resolvable:$false] %s12045_s8 }
0x17be   : > { %9397 = vmatpush3.bf16.msra.mxu0 %v10548_v45  ;;  %s12047_s10 = scalar_lea.vmem %s12046_s8, 32 }
0x17bf   : > { %9398 = vmatprep.subr.bf16.mxu0 %v10549_v46  ;;  %v10572_v46 = vld [vmem:[%s14378_s3 + $0x8] sm:$0xff]  }
0x17c2   : > { %9399 = vmatpush3.bf16.msra.mxu0 %v10550_v47  ;;  %v10573_v47 = vld [vmem:[%s14378_s3 + $0x10] sm:$0xff]  }
0x17c3   : > { %9400 = vmatprep.subr.bf16.mxu0 %v10551_v18  ;;  %v10574_v18 = vld [vmem:[%s14378_s3 + $0x18] sm:$0xff]  }
0x17c6   : > { %9401 = vmatpush3.bf16.msra.mxu0 %v10552_v48  ;;  %v10575_v48 = vld [vmem:[%s14378_s3 + $0x20] sm:$0xff]  }
0x17c7   : > { %9402 = vmatprep.subr.bf16.mxu0 %v10553_v49  ;;  %v10576_v49 = vld [vmem:[%s14378_s3 + $0x28] sm:$0xff]  }
0x17ca   : > { %9403 = vmatpush3.bf16.msra.mxu0 %v10554_v50  ;;  %v10577_v50 = vld [vmem:[%s14378_s3 + $0x30] sm:$0xff]  }
0x17cb   : > { %9559 = vmatprep.subr.bf16.mxu0 %v12350_v32 }
0x187f   : > { %v9382_v51 = vpop.f32.mrb[84].mxu0 }
0x1880   : > { %v9383_v52 = vpop.f32.mrb[85].mxu0 }
0x1881   : > { %v9384_v53 = vadd.f32 %v9383_v52, %v9382_v51  ;;  %v9385_v54 = vpop.f32.mrb[86].mxu0  ;;  %v10578_v51 = vld [vmem:[%s14378_s3 + $0x38] sm:$0xff]   ;;  %v10579_v52 = vld [vmem:[%s14379_s2] sm:$0xff]   ;;  %s2747_s2 = scalar_lea.vmem [#allocation88], %s2746_s0 }
0x1882   : > { %v9386_v55 = vpop.f32.mrb[87].mxu0  ;;  %s8106_s3 = sshll.u32 %s2747_s2, 4  ;;  %s14077_s3 = int_to_ptr.vmem [resolvable:$true] %s8106_s3 }
0x1883   : > { %s12041_s6 = scalar_lea.vmem %s14077_s3, 16  ;;  %p12048_p13 = scmp.lt.s32.totalorder %s14077_s3, %s12046_s8 }
0x1884   : > { %p12042_p10 = scmp.ne.s32.totalorder %s14077_s3, %s12041_s6  ;;  %p12049_p0 = scmp.lt.s32.totalorder %s12047_s10, %s12041_s6 }
0x1886   : > { %p12043_p11 = pnand %p12042_p10, %p14382_p6  ;;  %p12050_p1 = por %p12049_p0, %p12048_p13 }
0x1887   : > { %v9360_v56 = vpop.f32.mrb[80].mxu1 }
0x1888   : > { %v9361_v57 = vpop.f32.mrb[81].mxu1  ;;  %p12044_p12 = pneg %p12043_p11 }
0x1889   : > { %v9362_v58 = vadd.f32 %v9361_v57, %v9360_v56  ;;  %v9363_v60 = vpop.f32.mrb[82].mxu1 }
0x188a   : > { %v9364_v62 = vpop.f32.mrb[83].mxu1  ;;  %v7840_v60 = vld [vmem:[#allocation85] sm:$0x1]  ;;  %p12051_p2 = pnand %p12050_p1, %p12044_p12 }
0x188b   : > { %v7306_v63 = vadd.f32 %v9384_v53, %v9362_v58  ;;  %v10580_v53 = vld [vmem:[%s14380_s5 + $0x8] sm:$0xff]  }
0x188f   : > { %v7381_v0 = vpop.f32.mrb[84].mxu1 }
0x1890   : > { %v7383_v1 = vpop.f32.mrb[85].mxu1  ;;  %v7388_v4 = vpack.c.bf16 %v7381_v0, %v7381_v0 }
0x1891   : > { %v7389_v2 = vpack.c.bf16 %v7383_v1, %v7383_v1  ;;  %v7385_v3 = vpop.f32.mrb[86].mxu1 }
0x1892   : > { %v7386_v59 = vpop.f32.mrb[87].mxu1 }
0x1893   : > { %7518 = vmatprep.mubr.bf16.mxu0 %v7389_v2  ;;  %v10581_v59 = vld [vmem:[%s14380_s5 + $0x10] sm:$0xff]  }
0x1894   : > { %7519 = vmatmul.mubr.bf16.vlgmr.msra.gmra.mrb[88].mxu0 %v7388_v4 }
0x1895   : > { %9575 = vmatprep.mubr.msk.bf16.mxu0 %vm12351_vm3, %v12350_v32  ;;  %9560 = vmatpush3.bf16.msra.mxu0 %v10555_v61  ;;  %v10582_v61 = vld [vmem:[%s14380_s5 + $0x18] sm:$0xff]   ;;  %s8094_s5 = scalar_lea.sflag [#allocation4], %s2746_s0 }
0x1896   : > { %9561 = vmatprep.subr.bf16.mxu0 %v12350_v32 }
0x1899   : > { %9562 = vmatpush3.bf16.msra.mxu0 %v10556_v5  ;;  %v7860_v5 = vld [vmem:[#allocation86] sm:$0x1] }
0x189a   : > { %9563 = vmatprep.subr.bf16.mxu0 %v12350_v32 }
0x189d   : > { %9564 = vmatpush3.bf16.msra.mxu0 %v10558_v6 }
0x189e   : > { %9565 = vmatprep.subr.bf16.mxu0 %v12350_v32 }
0x18a1   : > { %9566 = vmatpush3.bf16.msra.mxu0 %v10560_v7 }
0x18a2   : > { %9567 = vmatprep.subr.bf16.mxu0 %v12350_v32 }
0x18a5   : > { %9568 = vmatpush3.bf16.msra.mxu0 %v10562_v8 }
0x18a6   : > { %9569 = vmatprep.subr.bf16.mxu0 %v12350_v32 }
0x18a9   : > { %9570 = vmatpush3.bf16.msra.mxu0 %v10564_v9 }
0x18aa   : > { %9571 = vmatprep.subr.bf16.mxu0 %v12350_v32 }
0x18ad   : > { %9572 = vmatpush3.bf16.msra.mxu0 %v10566_v10 }
0x18ae   : > { %9573 = vmatprep.subr.bf16.mxu0 %v12350_v32 }
0x18b1   : > { %9574 = vmatpush3.bf16.msra.mxu0 %v10568_v30 }
0x18b2   : > { %9599 = vmatprep.subr.bf16.mxu0 %v12350_v32 }
0x1967   : > { %v9404_v11 = vpop.f32.mrb[88].mxu0 }
0x1968   : > { %v9405_v40 = vpop.f32.mrb[89].mxu0 }
0x1969   : > { %v9406_v12 = vadd.f32 %v9405_v40, %v9404_v11  ;;  %v9407_v13 = vpop.f32.mrb[90].mxu0 }
0x196a   : > { %v9408_v15 = vpop.f32.mrb[91].mxu0  ;;  %v10584_v13 = vld [vmem:[%s12692_s17 + $0x8] sm:$0xff]  }
0x196b   : > { %v7526_v16 = vadd.f32 %v9406_v12, %v7306_v63  ;;  %v10583_v12 = vld [vmem:[%s12692_s17] sm:$0xff]  }
0x196d   : > { %v7534_v17 = vadd.f32 %v9275_v14, %v7526_v16  ;;  %v7959_v14 = vld [vmem:[%s14381_s4] sm:$0x1]  ;;  %s14075_s4 = scalar_lea.hbm %s14286_s9, %s9310_s1 }
0x196f   : > { %v7535_v19 = vmax.f32 %v7534_v17, 0.0 }
0x1971   : > { %v7536_v20 = vpack.c.bf16 %v7535_v19, %v7535_v19 }
0x1973   : > { %v7560_v21 = vsel %vm7558_vm12, %v7536_v20, 0 }
0x1974   : > { %9528 = vmatpush3.bf16.msra.mxu1 %v7560_v21 }
0x1975   : > { %9533 = vmatprep.subr.bf16.mxu1 %v12350_v32 }
0x1977   : > { %9530 = vmatmul.mubr.msk.bf16.vlgmr.msra.gmra.mrb[88].mxu1 %vm7554_vm13, %v7537_v22 }
0x1978   : > { %9534 = vmatpush3.bf16.msra.mxu1 %v7560_v21  ;;  %9535 = vmatprep.mubr.msk.bf16.mxu1 %vm12351_vm3, %v12350_v32 }
0x1979   : > { %9539 = vmatprep.subr.bf16.mxu1 %v12350_v32 }
0x197f   : > { %9536 = vmatmul.mubr.msk.bf16.vlgmr.msra.gmra.mrb[92].mxu1 %vm7554_vm13, %v7603_v23  ;;  %v8034_v23 = vld [vmem:[%s12697_s20] sm:$0x1] }
0x1980   : > { %9540 = vmatpush3.bf16.msra.mxu1 %v10557_v24  ;;  %9555 = vmatprep.mubr.msk.bf16.mxu1 %vm12351_vm3, %v12350_v32 }
0x1981   : > { %9541 = vmatprep.subr.bf16.mxu1 %v12350_v32 }
0x1984   : > { %9542 = vmatpush3.bf16.msra.mxu1 %v10559_v25 }
0x1985   : > { %9543 = vmatprep.subr.bf16.mxu1 %v12350_v32 }
0x1988   : > { %9544 = vmatpush3.bf16.msra.mxu1 %v10561_v26 }
0x1989   : > { %9545 = vmatprep.subr.bf16.mxu1 %v12350_v32 }
0x198c   : > { %9546 = vmatpush3.bf16.msra.mxu1 %v10563_v27 }
0x198d   : > { %9547 = vmatprep.subr.bf16.mxu1 %v12350_v32 }
0x1990   : > { %9548 = vmatpush3.bf16.msra.mxu1 %v10565_v28 }
0x1991   : > { %9549 = vmatprep.subr.bf16.mxu1 %v12350_v32 }
0x1994   : > { %9550 = vmatpush3.bf16.msra.mxu1 %v10567_v29 }
0x1995   : > { %9551 = vmatprep.subr.bf16.mxu1 %v12350_v32 }
0x1998   : > { %9552 = vmatpush3.bf16.msra.mxu1 %v10569_v31 }
0x1999   : > { %9553 = vmatprep.subr.bf16.mxu1 %v12350_v32 }
0x199c   : > { %9554 = vmatpush3.bf16.msra.mxu1 %v10570_v33 }
0x199d   : > { %9579 = vmatprep.subr.bf16.mxu1 %v12350_v32 }
0x1a4a   : > { %v7596_v34 = vpop.f32.mrb[88].mxu1 }
0x1a4b   : > { %v7602_v35 = vpack.c.bf16 %v7596_v34, %v7596_v34  ;;  %v9531_v36 = vpop.f32.mrb[89].mxu1 }
0x1a4c   : > { %v7599_v37 = vpop.f32.mrb[90].mxu1 }
0x1a4d   : > { %v9532_v38 = vpop.f32.mrb[91].mxu1  ;;  %9576 = vmatmul.mubr.bf16.vlgmr.msra.gmra.mrb[92].mxu0 %v7602_v35 }
0x1a4e   : > { %9607 = vmatprep.mubr.msk.bf16.mxu0 %vm12351_vm3, %v12350_v32  ;;  %9600 = vmatpush3.bf16.msra.mxu0 %v10579_v52 }
0x1a4f   : > { %9601 = vmatprep.subr.bf16.mxu0 %v12350_v32 }
0x1a52   : > { %v7657_v39 = vpop.f32.mrb[92].mxu1  ;;  %9602 = vmatpush3.bf16.msra.mxu0 %v10580_v53 }
0x1a53   : > { %v7663_v42 = vpack.c.bf16 %v7657_v39, %v7657_v39  ;;  %v9537_v43 = vpop.f32.mrb[93].mxu1  ;;  %9603 = vmatprep.subr.bf16.mxu0 %v12350_v32 }
0x1a54   : > { %v7660_v44 = vpop.f32.mrb[94].mxu1 }
0x1a55   : > { %9556 = vmatmul.mubr.bf16.vlgmr.msra.gmra.mrb[96].mxu1 %v7663_v42  ;;  %v9538_v45 = vpop.f32.mrb[95].mxu1 }
0x1a56   : > { %9580 = vmatpush3.bf16.msra.mxu1 %v10571_v41  ;;  %9595 = vmatprep.mubr.msk.bf16.mxu1 %vm12351_vm3, %v12350_v32 }
0x1a57   : > { %9581 = vmatprep.subr.bf16.mxu1 %v12350_v32  ;;  %9604 = vmatpush3.bf16.msra.mxu0 %v10581_v59 }
0x1a58   : > { %9605 = vmatprep.subr.bf16.mxu0 %v12350_v32 }
0x1a5a   : > { %9582 = vmatpush3.bf16.msra.mxu1 %v10572_v46 }
0x1a5b   : > { %9583 = vmatprep.subr.bf16.mxu1 %v12350_v32  ;;  %9606 = vmatpush3.bf16.msra.mxu0 %v10582_v61 }
0x1a5c   : > { %9611 = vmatprep.subr.bf16.mxu0 %v12350_v32 }
0x1a5e   : > { %9584 = vmatpush3.bf16.msra.mxu1 %v10573_v47 }
0x1a5f   : > { %9585 = vmatprep.subr.bf16.mxu1 %v12350_v32 }
0x1a62   : > { %9586 = vmatpush3.bf16.msra.mxu1 %v10574_v18 }
0x1a63   : > { %9587 = vmatprep.subr.bf16.mxu1 %v12350_v32 }
0x1a66   : > { %9588 = vmatpush3.bf16.msra.mxu1 %v10575_v48 }
0x1a67   : > { %9589 = vmatprep.subr.bf16.mxu1 %v12350_v32 }
0x1a6a   : > { %9590 = vmatpush3.bf16.msra.mxu1 %v10576_v49 }
0x1a6b   : > { %9591 = vmatprep.subr.bf16.mxu1 %v12350_v32 }
0x1a6e   : > { %9592 = vmatpush3.bf16.msra.mxu1 %v10577_v50 }
0x1a6f   : > { %9593 = vmatprep.subr.bf16.mxu1 %v12350_v32 }
0x1a72   : > { %9594 = vmatpush3.bf16.msra.mxu1 %v10578_v51 }
0x1b20   : > { %v7834_v54 = vpop.f32.mrb[92].mxu0 }
0x1b21   : > { %v9577_v55 = vpop.f32.mrb[93].mxu0 }
0x1b22   : > { %v7837_v56 = vpop.f32.mrb[94].mxu0 }
0x1b23   : > { %v9578_v57 = vpop.f32.mrb[95].mxu0 }
0x1b28   : > { %v7746_v58 = vpop.f32.mrb[96].mxu1 }
0x1b29   : > { %v7835_v62 = vadd.f32 %v7834_v54, %v7746_v58  ;;  %v9557_v63 = vpop.f32.mrb[97].mxu1 }
0x1b2a   : > { %v7749_v0 = vpop.f32.mrb[98].mxu1 }
0x1b2b   : > { %v7841_v1 = vadd.f32 %v7840_v60, %v7835_v62  ;;  %v9558_v2 = vpop.f32.mrb[99].mxu1 }
0x1b2d   : > { %v7842_v3 = vmax.f32 %v7841_v1, 0.0 }
0x1b2f   : > { %v7843_v4 = vpack.c.bf16 %v7842_v3, %v7842_v3 }
0x1b31   : > { %9596 = vmatmul.mubr.bf16.vlgmr.msra.gmra.mrb[100].mxu1 %v7843_v4 }
0x1c04   : > { %v7943_v6 = vpop.f32.mrb[100].mxu1 }
0x1c05   : > { %v7944_v7 = vadd.f32 %v7943_v6, %v7860_v5  ;;  %v9597_v8 = vpop.f32.mrb[101].mxu1 }
0x1c06   : > { %v7946_v9 = vpop.f32.mrb[102].mxu1 }
0x1c07   : > { %v7949_v10 = vmax.f32 %v7944_v7, 0.0  ;;  %v9598_v11 = vpop.f32.mrb[103].mxu1 }
0x1c09   : > { %v7950_v40 = vpack.c.bf16 %v7949_v10, %v7949_v10 }
0x1c0b   : > { %9608 = vmatmul.mubr.msk.bf16.vlgmr.msra.gmra.mrb[96].mxu0 %vm7984_vm14, %v7950_v40 }
0x1c0c   : > { %9615 = vmatprep.mubr.msk.bf16.mxu0 %vm12351_vm3, %v12350_v32  ;;  %9612 = vmatpush3.bf16.msra.mxu0 %v10583_v12 }
0x1c0d   : > { %9613 = vmatprep.subr.bf16.mxu0 %v12350_v32 }
0x1c10   : > { %9614 = vmatpush3.bf16.msra.mxu0 %v10584_v13 }
0x1cde   : > { %v8022_v15 = vpop.f32.mrb[96].mxu0 }
0x1cdf   : > { %v8023_v16 = vadd.f32 %v8022_v15, %v7959_v14  ;;  %v9609_v17 = vpop.f32.mrb[97].mxu0 }
0x1ce0   : > { %v8025_v19 = vpop.f32.mrb[98].mxu0 }
0x1ce1   : > { %v8028_v20 = vmax.f32 %v8023_v16, 0.0  ;;  %v9610_v21 = vpop.f32.mrb[99].mxu0 }
0x1ce3   : > { %v8029_v22 = vpack.c.bf16 %v8028_v20, %v8028_v20 }
0x1ce5   : > { %9616 = vmatmul.mubr.msk.bf16.vlgmr.msra.gmra.mrb[100].mxu0 %vm8047_vm15, %v8029_v22 }
0x1db8   : > { %v8085_v32 = vpop.f32.mrb[100].mxu0 }
0x1db9   : > { %v8086_v24 = vadd.f32 %v8085_v32, %v8034_v23  ;;  %v9617_v25 = vpop.f32.mrb[101].mxu0 }
0x1dba   : > { %v8088_v26 = vpop.f32.mrb[102].mxu0 }
0x1dbb   : > { %v9618_v27 = vpop.f32.mrb[103].mxu0  ;;  %8092 = vst.msk [vmem:[%s2747_s2] sm:$0x1] %vm8091_vm0, %v8086_v24 }
0x1dbc   : > { %12054 = shalt.err (!%p12051_p2)
}
0x1dbd   : > { %s12055_s0 = scalar_lea.hbm %s14075_s4, 16  ;;  %s12059_s1 = scalar_lea.hbm %s14286_s9, 32 }
0x1dbe   : > { %p12056_p3 = scmp.ne.s32.totalorder %s14075_s4, %s12055_s0  ;;  %p12060_p8 = scmp.lt.u32.totalorder %s14075_s4, %s14286_s9 }
0x1dbf   : > { %p12061_p5 = scmp.lt.u32.totalorder %s12059_s1, %s12055_s0  ;;  %p12063_p10 = scmp.lt.u32.totalorder %s12055_s0, %s14075_s4 }
0x1dc0   : > { %p12057_p4 = pnand %p12056_p3, %p14382_p6 }
0x1dc1   : > { %p12062_p9 = por %p12061_p5, %p12060_p8 }
0x1dc2   : > { %p12058_p7 = pneg %p12057_p4 }
0x1dc3   : > { %p12064_p11 = por %p12063_p10, %p12062_p9 }
0x1dc5   : > { %p12065_p12 = pnand %p12064_p11, %p12058_p7 }
0x1dc7   : > { %12068 = shalt.err (!%p12065_p12)
}
0x1dc8   : > { %9870 = dma.vmem_to_hbm [thread:$0]  (%p14382_p6), %s14077_s3, 16, %s14075_s4, %s8094_s5  }
0x1dc9 PF: > { %s14383_s8 = sld [smem:[#allocation181_spill]]  ;;  %s14384_s10 = sld [smem:[#allocation179_spill]] }
0x1dca   : > { %s14385_s6 = sld [smem:[#allocation184_spill]] }
0x1dcf   : > { %p9988_p13 = scmp.ge.s32.totalorder %s14383_s8, 2  ;;  %s8118_s2 = sand.u32 1, %s14384_s10  }
0x1dd0   : > { %p14386_p0 = scmp.ne.s32.totalorder %s14385_s6, 0  ;;  %s8119_s7 = scalar_lea.sflag [#allocation4], %s8118_s2 }
0x1dd2   : > { %p9873_p1 = pnand %p9988_p13, %p14386_p0 }
0x1dd4   : > { %12202 = dma.done.wait (!%p9873_p1), %s8119_s7, 16  }
0x1dd5   : > { %12204 = vsyncadd (!%p9873_p1), %s8119_s7, 4294967280  ;;  %s14387_s2 = sld [smem:[#allocation182_spill]]  ;;  %s14388_s1 = sld [smem:[#allocation180_spill]] }
0x1dd6   : > { %s14389_s9 = sld [smem:[#allocation183_spill]]  ;;  %s14390_s0 = smov %s12211_s28 }
0x1ddb   : > { %p176_p2 = scmp.ge.s32.totalorder %s14387_s2, 4   ;;  %s14391_s28 = smov %s14388_s1 }
0x1ddc   : > { %s14392_s1 = smov %s14389_s9 }
0x1ddd   :  { %178 = sbr.rel (!%p176_p2) target bundleno = 175 (0xaf), region = 620 }
0x1de4   :  { %8123 = vsyncpa [#allocation3], 1 }
0x1de5   :  { %8125 = vsyncpa [#allocation3 + $0x1], 1 }
0x1de6   :  { %8126 = vsyncpa [#allocation6], 1 }
0x1de7   :  { %8127 = vsyncpa [#allocation9], 1 }
0x1de8   :  { %8128 = vsyncpa [#allocation12], 1 }
0x1de9   :  { %8129 = vsyncpa [#allocation15], 1 }
0x1dea   :  { %8130 = vsyncpa [#allocation18], 1 }
0x1deb   :  { %8131 = vsyncpa [#allocation21], 1 }
0x1dec   :  { %8132 = vsyncpa [#allocation24], 1 }
0x1ded   :  { %8133 = vsyncpa [#allocation27], 1 }
0x1dee   :  { %8134 = vsyncpa [#allocation30], 1 }
0x1def   :  { %8135 = vsyncpa [#allocation33], 1 }
0x1df0   :  { %8136 = vsyncpa [#allocation36], 1 }
0x1df1   :  { %8137 = vsyncpa [#allocation39], 1 }
0x1df2   :  { %8138 = vsyncpa [#allocation42], 1 }
0x1df3   :  { %8139 = vsyncpa [#allocation45], 1 }
0x1df4   :  { %8140 = vsyncpa [#allocation48], 1 }
0x1df5   :  { %8141 = vsyncpa [#allocation51], 1 }
0x1df6   :  { %8142 = vsyncpa [#allocation54], 1 }
0x1df7   :  { %8143 = vsyncpa [#allocation57], 1 }
0x1df8   :  { %8144 = vsyncpa [#allocation60], 1 }
0x1df9   :  { %8145 = vsyncpa [#allocation63], 1 }
0x1dfa   :  { %8146 = vsyncpa [#allocation66], 1 }
0x1dfb   :  { %8147 = vsyncpa [#allocation69], 1 }
0x1dfc   :  { %8148 = vsyncpa [#allocation72], 1 }
0x1dfd   :  { %8149 = vsyncpa [#allocation75], 1 }
0x1dfe   :  { %8150 = vsyncpa [#allocation78], 1 }
0x1dff   :  { %8151 = vsyncpa [#allocation81], 1 }
0x1e00   :  { %8152 = vsyncpa [#allocation84], 1 }
0x1e01   :  { %8153 = vsyncpa [#allocation87], 1 }
0x1e02   :  { %8154 = vsyncpa [#allocation4], 1 }
0x1e03   :  { %8156 = vsyncpa [#allocation4 + $0x1], 1 }

</bundles_post_ra>
